<compile_context>
chip_gen: v7x
topology: tpu7x:2x2x1
jax: 0.10.0
libtpu: 0.0.40
codegen_flags: <defaults>
</compile_context>

<pallas_src>
import functools

import jax
import jax.numpy as jnp
from jax import lax
from jax.experimental import pallas as pl
from jax.experimental.pallas import tpu as pltpu

_SQRT_2_OVER_PI = 0.7978845608028654
_GELU_C = 0.044715
_INV_SQRT_2 = 0.7071067811865476


# --------------------------------------------------------------------------
# GELU helpers
# --------------------------------------------------------------------------
def _erf_approx(z):
    """Abramowitz & Stegun 7.1.26 erf (|abs err| < 1.5e-7).

    Built only from exp / mul / add / select so it lowers on every TPU
    generation (EUP exp slot; no dependence on an erf primitive lowering).
    """
    a1, a2, a3, a4, a5 = (0.254829592, -0.284496736, 1.421413741,
                          -1.453152027, 1.061405429)
    p = 0.3275911
    s = jnp.where(z < 0.0, -1.0, 1.0)
    az = jnp.abs(z)
    t = 1.0 / (1.0 + p * az)
    poly = ((((a5 * t + a4) * t + a3) * t + a2) * t + a1) * t
    return s * (1.0 - poly * jnp.exp(-az * az))


def _gelu_to_bf16(h_f32, b1_row_f32, exact_gelu):
    """bias add + GELU; returns bf16 activations for the second MXU matmul."""
    if exact_gelu:
        # Near-exact erf GELU (matches PyTorch nn.GELU() default); kept in f32.
        h = h_f32 + b1_row_f32
        g = 0.5 * h * (1.0 + _erf_approx(h * _INV_SQRT_2))
        return g.astype(jnp.bfloat16)
    # tanh-approximate GELU, elementwise work in bf16 (v6e/v7x VPU/EUP are
    # bf16-capable; halves VALU slot pressure, result is needed in bf16 anyway).
    h = h_f32.astype(jnp.bfloat16) + b1_row_f32.astype(jnp.bfloat16)
    inner = h + _GELU_C * h * h * h
    g = 0.5 * h * (1.0 + jnp.tanh(_SQRT_2_OVER_PI * inner))
    return g.astype(jnp.bfloat16)


def _layer_norm(r_f32, gamma_row, beta_row, eps):
    mean = jnp.mean(r_f32, axis=-1, keepdims=True)
    cent = r_f32 - mean
    var = jnp.mean(cent * cent, axis=-1, keepdims=True)
    return cent * (lax.rsqrt(var + eps) * gamma_row) + beta_row


# --------------------------------------------------------------------------
# Kernels
# --------------------------------------------------------------------------
def _ffn_ln_resident_kernel(x_ref, w1_ref, b1_ref, w2_ref, b2_ref, g_ref,
                            beta_ref, o_ref, *, eps, exact_gelu):
    """Single-pass kernel: grid = (row tiles,); full bf16 W1/W2 resident."""
    x_f32 = x_ref[...].astype(jnp.float32)
    h = jnp.dot(x_f32.astype(jnp.bfloat16), w1_ref[...],
                preferred_element_type=jnp.float32)
    g = _gelu_to_bf16(h, b1_ref[...], exact_gelu)
    y = jnp.dot(g, w2_ref[...], preferred_element_type=jnp.float32)
    r = x_f32 + y + b2_ref[...]
    out = _layer_norm(r, g_ref[...], beta_ref[...], eps)
    # TODO(synk): dropout omitted (identity at inference / eval mode).
    o_ref[...] = out.astype(o_ref.dtype)


def _ffn_ln_reduce_kernel(x_ref, w1_ref, b1_ref, w2_ref, b2_ref, g_ref,
                          beta_ref, o_ref, xbf_ref, *acc_scratch,
                          eps, exact_gelu):
    """Grid = (row tiles [parallel], d_ffn chunks [arbitrary/reduction]).

    If no acc scratch is given the (f32) output block itself is the
    accumulator (it is resident across the reduction axis).
    """
    acc_ref = acc_scratch[0] if acc_scratch else o_ref
    j = pl.program_id(1)

    @pl.when(j == 0)
    def _init():
        # Hoisted x -> bf16 cast: done once per row tile, reused for every j.
        xbf_ref[...] = x_ref[...].astype(jnp.bfloat16)
        acc_ref[...] = jnp.zeros_like(acc_ref)

    h = jnp.dot(xbf_ref[...], w1_ref[...], preferred_element_type=jnp.float32)
    g = _gelu_to_bf16(h, b1_ref[...], exact_gelu)
    acc_ref[...] += jnp.dot(g, w2_ref[...],
                            preferred_element_type=jnp.float32
                            ).astype(acc_ref.dtype)

    @pl.when(j == pl.num_programs(1) - 1)
    def _finalize():
        r = (x_ref[...].astype(jnp.float32)
             + acc_ref[...].astype(jnp.float32) + b2_ref[...])
        out = _layer_norm(r, g_ref[...], beta_ref[...], eps)
        # TODO(synk): dropout omitted (identity at inference / eval mode).
        o_ref[...] = out.astype(o_ref.dtype)


# --------------------------------------------------------------------------
# Wrapper
# --------------------------------------------------------------------------
def _round_up(a, b):
    return (a + b - 1) // b * b


def _vmem_budget_bytes():
    capacity = None
    try:
        capacity = int(getattr(pltpu.get_tpu_info(), "vmem_capacity_bytes", 0))
        capacity = capacity or None
    except Exception:
        capacity = None
    if capacity is None:
        capacity = 64 * 1024 * 1024   # conservative: assume v7x-sized VMEM
    # Up to 112 MiB on 128 MiB parts (v5e/v6e); 48 MiB on the 64 MiB part
    # (v7x) -> headroom for compiler internal scratch.
    return max(32 << 20, min(capacity - (16 << 20), 112 << 20))


def _auto_ffn_chunk(d_model, d_ffn, block_rows, x_bytes, out_bytes, budget):
    """Largest d_ffn chunk whose working set fits the VMEM budget."""
    def est(chunk):
        weights = 2 * 2 * (d_model * chunk * 2)           # W1+W2, 2 bufs, bf16
        xio = 2 * block_rows * d_model * (x_bytes + out_bytes)
        scratch = block_rows * d_model * (2 + 4)          # xbf + f32 acc
        inter = block_rows * chunk * (4 + 2)              # h (f32) + gelu (bf16)
        small = 2 * 4 * (chunk + 3 * d_model)
        return weights + xio + scratch + inter + small

    if est(d_ffn) <= budget:
        return d_ffn
    c = (d_ffn // 128) * 128
    while c >= 128:
        if d_ffn % c == 0 and est(c) <= budget:
            return c
        c -= 128
    return 128 if d_ffn % 128 == 0 else d_ffn


def _weight_spec(block_shape, index_map, buffers):
    """W1/W2 BlockSpec, optionally with deeper (>2) pipelining."""
    if buffers and buffers > 2:
        try:
            return pl.BlockSpec(block_shape, index_map,
                                pipeline_mode=pl.Buffered(buffers))
        except Exception:
            pass  # older API surface: fall back to default double-buffering
    return pl.BlockSpec(block_shape, index_map)


def ffn_sublayer(x, w1, b1, w2, b2, gamma, beta, *, eps=1e-5,
                 block_rows=512, ffn_chunk=None, exact_gelu=True,
                 weight_buffers=2):
    """x: [batch, seq, d_model] -> [batch, seq, d_model]."""
    batch, seq, d_model = x.shape
    d_ffn = w1.shape[1]
    rows = batch * seq
    out_dtype = x.dtype

    x2 = x.reshape(rows, d_model)   # no padding: ragged final tile is masked

    # --- row tiling --------------------------------------------------------
    block_rows = max(8, min(_round_up(block_rows, 8), _round_up(rows, 8)))
    if rows >= 16 and pl.cdiv(rows, block_rows) == 1:
        # Make the "parallel" row axis at least 2 tiles wide (v7x has 2 TCs).
        block_rows = _round_up(pl.cdiv(rows, 2), 8)
    n_row_tiles = pl.cdiv(rows, block_rows)

    # --- VMEM budget / d_ffn tiling ----------------------------------------
    budget = _vmem_budget_bytes()
    if ffn_chunk is None:
        ffn_chunk = _auto_ffn_chunk(d_model, d_ffn, block_rows,
                                    x2.dtype.itemsize,
                                    jnp.dtype(out_dtype).itemsize, budget)
    else:
        ffn_chunk = min(ffn_chunk, d_ffn)
        assert d_ffn % ffn_chunk == 0
        assert ffn_chunk == d_ffn or ffn_chunk % 128 == 0
    resident = (ffn_chunk == d_ffn)

    # bf16 weights: half the residency and HBM traffic; f32 MXU accumulation.
    w1_bf = w1.astype(jnp.bfloat16)
    w2_bf = w2.astype(jnp.bfloat16)
    b1_2d = b1.reshape(1, d_ffn).astype(jnp.float32)
    b2_2d = b2.reshape(1, d_model).astype(jnp.float32)
    g_2d = gamma.reshape(1, d_model).astype(jnp.float32)
    be_2d = beta.reshape(1, d_model).astype(jnp.float32)

    # --- cost estimate (weights once total if resident, else once per tile) -
    weight_bytes = 2 * d_model * d_ffn * 2
    weight_traffic = weight_bytes if resident else n_row_tiles * weight_bytes
    cost = pl.CostEstimate(
        flops=4 * rows * d_model * d_ffn,
        transcendentals=rows * d_ffn,
        bytes_accessed=(rows * d_model * (x2.dtype.itemsize
                                          + jnp.dtype(out_dtype).itemsize)
                        + weight_traffic
                        + 4 * (d_ffn + 3 * d_model)),
    )

    if resident:
        kernel = functools.partial(_ffn_ln_resident_kernel,
                                   eps=eps, exact_gelu=exact_gelu)
        grid_spec = pltpu.PrefetchScalarGridSpec(
            num_scalar_prefetch=0,
            grid=(n_row_tiles,),
            in_specs=[
                pl.BlockSpec((block_rows, d_model), lambda i: (i, 0)),  # x
                pl.BlockSpec((d_model, d_ffn), lambda i: (0, 0)),       # W1
                pl.BlockSpec((1, d_ffn), lambda i: (0, 0)),             # b1
                pl.BlockSpec((d_ffn, d_model), lambda i: (0, 0)),       # W2
                pl.BlockSpec((1, d_model), lambda i: (0, 0)),           # b2
                pl.BlockSpec((1, d_model), lambda i: (0, 0)),           # gamma
                pl.BlockSpec((1, d_model), lambda i: (0, 0)),           # beta
            ],
            out_specs=pl.BlockSpec((block_rows, d_model), lambda i: (i, 0)),
        )
        dim_sem = ("parallel",)
    else:
        n_chunks = d_ffn // ffn_chunk
        acc_into_out = (jnp.dtype(out_dtype) == jnp.dtype(jnp.float32))
        scratch = [pltpu.VMEM((block_rows, d_model), jnp.bfloat16)]  # x in bf16
        if not acc_into_out:
            scratch.append(pltpu.VMEM((block_rows, d_model), jnp.float32))
        kernel = functools.partial(_ffn_ln_reduce_kernel,
                                   eps=eps, exact_gelu=exact_gelu)
        grid_spec = pltpu.PrefetchScalarGridSpec(
            num_scalar_prefetch=0,
            grid=(n_row_tiles, n_chunks),
            in_specs=[
                pl.BlockSpec((block_rows, d_model), lambda i, j: (i, 0)),   # x
                _weight_spec((d_model, ffn_chunk), lambda i, j: (0, j),
                             weight_buffers),                               # W1
                pl.BlockSpec((1, ffn_chunk), lambda i, j: (0, j)),          # b1
                _weight_spec((ffn_chunk, d_model), lambda i, j: (j, 0),
                             weight_buffers),                               # W2
                pl.BlockSpec((1, d_model), lambda i, j: (0, 0)),            # b2
                pl.BlockSpec((1, d_model), lambda i, j: (0, 0)),            # gamma
                pl.BlockSpec((1, d_model), lambda i, j: (0, 0)),            # beta
            ],
            out_specs=pl.BlockSpec((block_rows, d_model), lambda i, j: (i, 0)),
            scratch_shapes=scratch,
        )
        dim_sem = ("parallel", "arbitrary")

    out2 = pl.pallas_call(
        kernel,
        out_shape=jax.ShapeDtypeStruct((rows, d_model), out_dtype),
        grid_spec=grid_spec,
        compiler_params=pltpu.CompilerParams(
            dimension_semantics=dim_sem,
            vmem_limit_bytes=int(budget),
        ),
        cost_estimate=cost,
    )(x2, w1_bf, b1_2d, w2_bf, b2_2d, g_2d, be_2d)

    return out2.reshape(batch, seq, d_model)


# --------------------------------------------------------------------------
# Reference + demo
# --------------------------------------------------------------------------
def _reference(x, w1, b1, w2, b2, gamma, beta, eps=1e-5, exact_gelu=True):
    h = jnp.dot(x, w1) + b1
    if exact_gelu:
        h = 0.5 * h * (1.0 + lax.erf(h * _INV_SQRT_2))
    else:
        h = 0.5 * h * (1.0 + jnp.tanh(_SQRT_2_OVER_PI * (h + _GELU_C * h ** 3)))
    y = jnp.dot(h, w2) + b2
    r = x + y
    mean = jnp.mean(r, axis=-1, keepdims=True)
    var = jnp.mean((r - mean) ** 2, axis=-1, keepdims=True)
    return (r - mean) / jnp.sqrt(var + eps) * gamma + beta


if __name__ == "__main__":
    # Small but lane-dense shapes (d_model multiple of 128).
    batch, seq, d_model, d_ffn = 2, 200, 128, 256

    key = jax.random.PRNGKey(0)
    kx, k1, kb1, k2, kb2 = jax.random.split(key, 5)

    x = jax.random.normal(kx, (batch, seq, d_model), dtype=jnp.float32)

    # nn.Linear-style uniform init bounds.
    lim1 = 1.0 / jnp.sqrt(d_model)
    lim2 = 1.0 / jnp.sqrt(d_ffn)
    w1 = jax.random.uniform(k1, (d_model, d_ffn), jnp.float32, -lim1, lim1)
    b1 = jax.random.uniform(kb1, (d_ffn,), jnp.float32, -lim1, lim1)
    w2 = jax.random.uniform(k2, (d_ffn, d_model), jnp.float32, -lim2, lim2)
    b2 = jax.random.uniform(kb2, (d_model,), jnp.float32, -lim2, lim2)
    gamma = jnp.ones((d_model,), jnp.float32)   # nn.LayerNorm default weight
    beta = jnp.zeros((d_model,), jnp.float32)   # nn.LayerNorm default bias

    ref = _reference(x, w1, b1, w2, b2, gamma, beta)   # exact erf GELU

    # 1) Auto path: resident bf16 weights (single-pass kernel), row axis split
    #    into 2 tiles so both TensorCores get work on v7x.
    out_a = jax.block_until_ready(ffn_sublayer(x, w1, b1, w2, b2, gamma, beta))
    assert out_a.shape == (batch, seq, d_model)
    assert jnp.allclose(out_a, ref, atol=2e-2, rtol=2e-2), "resident path mismatch"

    # 2) Forced d_ffn-reduction path with a ragged (masked) final row tile:
    #    exercises the accumulate-into-output + hoisted bf16-cast variant.
    out_b = jax.block_until_ready(
        ffn_sublayer(x, w1, b1, w2, b2, gamma, beta,
                     block_rows=192, ffn_chunk=128))
    assert jnp.allclose(out_b, ref, atol=2e-2, rtol=2e-2), "reduction path mismatch"

    print("KERNEL_OK")
</pallas_src>

<mosaic_0001>
module attributes {stable_mosaic.version = 11 : i64} {
  func.func @_ffn_ln_resident_kernel(%arg0: i32, %arg1: memref<200x128xf32, #tpu.memory_space<vmem>>, %arg2: memref<128x256xbf16, #tpu.memory_space<vmem>>, %arg3: memref<1x256xf32, #tpu.memory_space<vmem>>, %arg4: memref<256x128xbf16, #tpu.memory_space<vmem>>, %arg5: memref<1x128xf32, #tpu.memory_space<vmem>>, %arg6: memref<1x128xf32, #tpu.memory_space<vmem>>, %arg7: memref<1x128xf32, #tpu.memory_space<vmem>>, %arg8: memref<200x128xf32, #tpu.memory_space<vmem>>) attributes {dimension_semantics = [#tpu.dimension_semantics<parallel>], iteration_bounds = array<i64: 2>, scalar_prefetch = 0 : i64, scratch_operands = 0 : i64, tpu.core_type = #tpu.core_type<tc>, window_params = [{transform_indices = @transform_0, window_bounds = array<i64: 200, 128>}, {pipeline_mode = #tpu.pipeline_mode<synchronous>, transform_indices = @transform_1, window_bounds = array<i64: 128, 256>}, {pipeline_mode = #tpu.pipeline_mode<synchronous>, transform_indices = @transform_2, window_bounds = array<i64: 1, 256>}, {pipeline_mode = #tpu.pipeline_mode<synchronous>, transform_indices = @transform_3, window_bounds = array<i64: 256, 128>}, {pipeline_mode = #tpu.pipeline_mode<synchronous>, transform_indices = @transform_4, window_bounds = array<i64: 1, 128>}, {pipeline_mode = #tpu.pipeline_mode<synchronous>, transform_indices = @transform_5, window_bounds = array<i64: 1, 128>}, {pipeline_mode = #tpu.pipeline_mode<synchronous>, transform_indices = @transform_6, window_bounds = array<i64: 1, 128>}, {transform_indices = @transform_7, window_bounds = array<i64: 200, 128>}]} {
    %c0 = arith.constant 0 : index
    %c0_0 = arith.constant 0 : index
    %0 = vector.load %arg1[%c0, %c0_0] : memref<200x128xf32, #tpu.memory_space<vmem>>, vector<200x128xf32>
    %1 = arith.truncf %0 : vector<200x128xf32> to vector<200x128xbf16>
    %c0_1 = arith.constant 0 : index
    %c0_2 = arith.constant 0 : index
    %2 = vector.load %arg2[%c0_1, %c0_2] : memref<128x256xbf16, #tpu.memory_space<vmem>>, vector<128x256xbf16>
    %cst = arith.constant dense<0.000000e+00> : vector<200x256xf32>
    %3 = tpu.matmul %1, %2, %cst {dimension_numbers = #tpu.dot_dimension_numbers<[1], [0], [0], [1], [0, 0, 1, 1], [], []>} : vector<200x128xbf16>, vector<128x256xbf16>, vector<200x256xf32> -> vector<200x256xf32>
    %c0_3 = arith.constant 0 : index
    %c0_4 = arith.constant 0 : index
    %4 = vector.load %arg3[%c0_3, %c0_4] : memref<1x256xf32, #tpu.memory_space<vmem>>, vector<1x256xf32>
    %5 = vector.broadcast %4 : vector<1x256xf32> to vector<200x256xf32>
    %6 = arith.addf %3, %5 : vector<200x256xf32>
    %cst_5 = arith.constant 5.000000e-01 : f32
    %7 = vector.broadcast %cst_5 : f32 to vector<200x256xf32>
    %8 = arith.mulf %7, %6 : vector<200x256xf32>
    %cst_6 = arith.constant 0.707106769 : f32
    %9 = vector.broadcast %cst_6 : f32 to vector<200x256xf32>
    %10 = arith.mulf %6, %9 : vector<200x256xf32>
    %cst_7 = arith.constant 0.000000e+00 : f32
    %11 = vector.broadcast %cst_7 : f32 to vector<200x256xf32>
    %12 = arith.cmpf olt, %10, %11 : vector<200x256xf32>
    %cst_8 = arith.constant -1.000000e+00 : f32
    %cst_9 = arith.constant 1.000000e+00 : f32
    %13 = vector.broadcast %cst_8 : f32 to vector<200x256xf32>
    %14 = vector.broadcast %cst_9 : f32 to vector<200x256xf32>
    %15 = arith.select %12, %13, %14 : vector<200x256xi1>, vector<200x256xf32>
    %16 = math.absf %10 : vector<200x256xf32>
    %cst_10 = arith.constant 0.327591091 : f32
    %17 = vector.broadcast %cst_10 : f32 to vector<200x256xf32>
    %18 = arith.mulf %17, %16 : vector<200x256xf32>
    %cst_11 = arith.constant 1.000000e+00 : f32
    %19 = vector.broadcast %cst_11 : f32 to vector<200x256xf32>
    %20 = arith.addf %19, %18 : vector<200x256xf32>
    %cst_12 = arith.constant 1.000000e+00 : f32
    %21 = vector.broadcast %cst_12 : f32 to vector<200x256xf32>
    %22 = arith.divf %21, %20 : vector<200x256xf32>
    %cst_13 = arith.constant 1.06140542 : f32
    %23 = vector.broadcast %cst_13 : f32 to vector<200x256xf32>
    %24 = arith.mulf %23, %22 : vector<200x256xf32>
    %cst_14 = arith.constant -1.45315206 : f32
    %25 = vector.broadcast %cst_14 : f32 to vector<200x256xf32>
    %26 = arith.addf %24, %25 : vector<200x256xf32>
    %27 = arith.mulf %26, %22 : vector<200x256xf32>
    %cst_15 = arith.constant 1.42141378 : f32
    %28 = vector.broadcast %cst_15 : f32 to vector<200x256xf32>
    %29 = arith.addf %27, %28 : vector<200x256xf32>
    %30 = arith.mulf %29, %22 : vector<200x256xf32>
    %cst_16 = arith.constant -0.284496725 : f32
    %31 = vector.broadcast %cst_16 : f32 to vector<200x256xf32>
    %32 = arith.addf %30, %31 : vector<200x256xf32>
    %33 = arith.mulf %32, %22 : vector<200x256xf32>
    %cst_17 = arith.constant 0.254829586 : f32
    %34 = vector.broadcast %cst_17 : f32 to vector<200x256xf32>
    %35 = arith.addf %33, %34 : vector<200x256xf32>
    %36 = arith.mulf %35, %22 : vector<200x256xf32>
    %cst_18 = arith.constant 0.000000e+00 : f32
    %37 = vector.broadcast %cst_18 : f32 to vector<200x256xf32>
    %38 = arith.subf %37, %16 : vector<200x256xf32>
    %39 = arith.mulf %38, %16 : vector<200x256xf32>
    %40 = math.exp %39 : vector<200x256xf32>
    %41 = arith.mulf %36, %40 : vector<200x256xf32>
    %cst_19 = arith.constant 1.000000e+00 : f32
    %42 = vector.broadcast %cst_19 : f32 to vector<200x256xf32>
    %43 = arith.subf %42, %41 : vector<200x256xf32>
    %44 = arith.mulf %15, %43 : vector<200x256xf32>
    %cst_20 = arith.constant 1.000000e+00 : f32
    %45 = vector.broadcast %cst_20 : f32 to vector<200x256xf32>
    %46 = arith.addf %45, %44 : vector<200x256xf32>
    %47 = arith.mulf %8, %46 : vector<200x256xf32>
    %48 = arith.truncf %47 : vector<200x256xf32> to vector<200x256xbf16>
    %c0_21 = arith.constant 0 : index
    %c0_22 = arith.constant 0 : index
    %49 = vector.load %arg4[%c0_21, %c0_22] : memref<256x128xbf16, #tpu.memory_space<vmem>>, vector<256x128xbf16>
    %cst_23 = arith.constant dense<0.000000e+00> : vector<200x128xf32>
    %50 = tpu.matmul %48, %49, %cst_23 {dimension_numbers = #tpu.dot_dimension_numbers<[1], [0], [0], [1], [0, 0, 1, 1], [], []>} : vector<200x256xbf16>, vector<256x128xbf16>, vector<200x128xf32> -> vector<200x128xf32>
    %51 = arith.addf %0, %50 : vector<200x128xf32>
    %c0_24 = arith.constant 0 : index
    %c0_25 = arith.constant 0 : index
    %52 = vector.load %arg5[%c0_24, %c0_25] : memref<1x128xf32, #tpu.memory_space<vmem>>, vector<1x128xf32>
    %53 = vector.broadcast %52 : vector<1x128xf32> to vector<200x128xf32>
    %54 = arith.addf %51, %53 : vector<200x128xf32>
    %c0_26 = arith.constant 0 : index
    %c0_27 = arith.constant 0 : index
    %55 = vector.load %arg6[%c0_26, %c0_27] : memref<1x128xf32, #tpu.memory_space<vmem>>, vector<1x128xf32>
    %c0_28 = arith.constant 0 : index
    %c0_29 = arith.constant 0 : index
    %56 = vector.load %arg7[%c0_28, %c0_29] : memref<1x128xf32, #tpu.memory_space<vmem>>, vector<1x128xf32>
    %cst_30 = arith.constant dense<0.000000e+00> : vector<200xf32>
    %57 = vector.multi_reduction <add>, %54, %cst_30 [1] : vector<200x128xf32> to vector<200xf32>
    %58 = vector.shape_cast %57 : vector<200xf32> to vector<200x1xf32>
    %cst_31 = arith.constant 1.280000e+02 : f32
    %59 = vector.broadcast %cst_31 : f32 to vector<200x1xf32>
    %60 = arith.divf %58, %59 : vector<200x1xf32>
    %61 = vector.broadcast %60 : vector<200x1xf32> to vector<200x128xf32>
    %62 = arith.subf %54, %61 : vector<200x128xf32>
    %63 = arith.mulf %62, %62 : vector<200x128xf32>
    %cst_32 = arith.constant dense<0.000000e+00> : vector<200xf32>
    %64 = vector.multi_reduction <add>, %63, %cst_32 [1] : vector<200x128xf32> to vector<200xf32>
    %65 = vector.shape_cast %64 : vector<200xf32> to vector<200x1xf32>
    %cst_33 = arith.constant 1.280000e+02 : f32
    %66 = vector.broadcast %cst_33 : f32 to vector<200x1xf32>
    %67 = arith.divf %65, %66 : vector<200x1xf32>
    %cst_34 = arith.constant 9.99999974E-6 : f32
    %68 = vector.broadcast %cst_34 : f32 to vector<200x1xf32>
    %69 = arith.addf %67, %68 : vector<200x1xf32>
    %70 = math.rsqrt %69 : vector<200x1xf32>
    %71 = vector.broadcast %70 : vector<200x1xf32> to vector<200x128xf32>
    %72 = vector.broadcast %55 : vector<1x128xf32> to vector<200x128xf32>
    %73 = arith.mulf %71, %72 : vector<200x128xf32>
    %74 = arith.mulf %62, %73 : vector<200x128xf32>
    %75 = vector.broadcast %56 : vector<1x128xf32> to vector<200x128xf32>
    %76 = arith.addf %74, %75 : vector<200x128xf32>
    %c0_35 = arith.constant 0 : index
    %c0_36 = arith.constant 0 : index
    %77 = vector.load %arg8[%c0_35, %c0_36] : memref<200x128xf32, #tpu.memory_space<vmem>>, vector<200x128xf32>
    tpu.vector_store %arg8[%c0_35, %c0_36], %76 {strides = array<i32>} : memref<200x128xf32, #tpu.memory_space<vmem>>, vector<200x128xf32>,
    return
  }
  func.func @transform_0(%arg0: i32) -> (i32, i32) {
    %c0_i32 = arith.constant 0 : i32
    %c0_i32_0 = arith.constant 0 : i32
    return %arg0, %c0_i32 : i32, i32
  }
  func.func @transform_1(%arg0: i32) -> (i32, i32) {
    %c0_i32 = arith.constant 0 : i32
    %c0_i32_0 = arith.constant 0 : i32
    %c0_i32_1 = arith.constant 0 : i32
    return %c0_i32, %c0_i32_0 : i32, i32
  }
  func.func @transform_2(%arg0: i32) -> (i32, i32) {
    %c0_i32 = arith.constant 0 : i32
    %c0_i32_0 = arith.constant 0 : i32
    %c0_i32_1 = arith.constant 0 : i32
    return %c0_i32, %c0_i32_0 : i32, i32
  }
  func.func @transform_3(%arg0: i32) -> (i32, i32) {
    %c0_i32 = arith.constant 0 : i32
    %c0_i32_0 = arith.constant 0 : i32
    %c0_i32_1 = arith.constant 0 : i32
    return %c0_i32, %c0_i32_0 : i32, i32
  }
  func.func @transform_4(%arg0: i32) -> (i32, i32) {
    %c0_i32 = arith.constant 0 : i32
    %c0_i32_0 = arith.constant 0 : i32
    %c0_i32_1 = arith.constant 0 : i32
    return %c0_i32, %c0_i32_0 : i32, i32
  }
  func.func @transform_5(%arg0: i32) -> (i32, i32) {
    %c0_i32 = arith.constant 0 : i32
    %c0_i32_0 = arith.constant 0 : i32
    %c0_i32_1 = arith.constant 0 : i32
    return %c0_i32, %c0_i32_0 : i32, i32
  }
  func.func @transform_6(%arg0: i32) -> (i32, i32) {
    %c0_i32 = arith.constant 0 : i32
    %c0_i32_0 = arith.constant 0 : i32
    %c0_i32_1 = arith.constant 0 : i32
    return %c0_i32, %c0_i32_0 : i32, i32
  }
  func.func @transform_7(%arg0: i32) -> (i32, i32) {
    %c0_i32 = arith.constant 0 : i32
    %c0_i32_0 = arith.constant 0 : i32
    return %arg0, %c0_i32 : i32, i32
  }
}

</mosaic_0001>

<bundles_post_ra>
// kernel: tpu_custom_call.1
= control target key start
LH: loop header
LB: loop body
LE: loop exit
PB: predicated region body
PF: predicated region fallthrough
CT: control target
= control target key end

     0   :  { %s5840_s0 = inlined_call_operand.hbm [shape: f32[400,128], index: 0, kind: input, shape index: {}]   ;;  %s5841_s1 = inlined_call_operand.hbm [shape: bf16[128,256], index: 1, kind: input, shape index: {}]   ;;  %s5842_s2 = inlined_call_operand.vmem [shape: f32[1,256], index: 2, kind: input, shape index: {}]   ;;  %s5843_s3 = inlined_call_operand.hbm [shape: bf16[256,128], index: 3, kind: input, shape index: {}]   ;;  %s5844_s4 = inlined_call_operand.vmem [shape: f32[1,128], index: 4, kind: input, shape index: {}]   ;;  %s5845_s5 = inlined_call_operand.vmem [shape: f32[1,128], index: 5, kind: input, shape index: {}]   ;;  %s5846_s6 = inlined_call_operand.vmem [shape: f32[1,128], index: 6, kind: input, shape index: {}]   ;;  %s5847_s7 = inlined_call_operand.hbm [shape: f32[400,128], index: 7, kind: output, shape index: {}]  }
   0x1   :  { %5863 = sst [smem:[#allocation49_spill]] %s5841_s1 }
   0x2   :  { %12 = vsyncpa [#allocation3], 0 }
   0x3   :  { %14 = vsyncpa [#allocation3 + $0x1], 0 }
   0x4   :  { %15 = vsyncpa [#allocation6], 0 }
   0x5   :  { %16 = vsyncpa [#allocation4], 0 }
   0x6   :  { %18 = vsyncpa [#allocation4 + $0x1], 0  ;;  %s3549_s24 = smov 0   ;;  %s3551_s25 = smov 0  }
   0x7   :  { %s3553_s26 = smov 0   ;;  %s3555_s27 = smov 0  }
   0x8 LB: > { %s3570_s28 = sadd.s32 4294967295, %s3495_s27   ;;  %s2804_s29 = sadd.s32 4294967294, %s3495_s27   ;;  %s3495_s27 = sphi %s3555_s27, %s5999_s27   ;;  %s3491_s26 = sphi %s3553_s26, %s5998_s26   ;;  %s3487_s25 = sphi %s3551_s25, %s5997_s25   ;;  %s3483_s24 = sphi %s3549_s24, %s5996_s24  }
   0x9   : > { %p44_p0 = scmp.ne.s32.totalorder %s3487_s25, %s3483_s24  ;;  %p5848_p1 = scmp.eq.s32.totalorder %s3570_s28, 0 }
   0xa   : > { %p200_p3 = scmp.eq.s32.totalorder %s2804_s29, 1  ;;  %p2805_p5 = scmp.ge.s32.totalorder %s3495_s27, 1 }
   0xb   : > { %p3579_p4 = por %p5848_p1, %p44_p0  ;;  %p207_p7 = scmp.lt.s32.totalorder %s3495_s27, 3 }
   0xc   : > { %p3584_p6 = por %p200_p3, %p44_p0  ;;  %s3497_s10 = smov [#allocation5]  }
   0xd   : > { %s5864_s30 = scalar_select %p3579_p4, 1, 0 }
   0xe   : > { %s5865_s8 = scalar_select %p3584_p6, 1, 0 }
   0xf   : > { %p3589_p8 = pnand %p2805_p5, %p207_p7  ;;  %s219_s11 = sshll.u32 %s3497_s10, 4  ;;  %s3593_s11 = int_to_ptr.vmem [resolvable:$true] %s219_s11 }
  0x10   : > { %s3498_s13 = smov [#allocation7]   ;;  %s5868_s1 = sld [smem:[#allocation49_spill]] }
  0x11   : > { %p2961_p9 = pneg %p3589_p8  ;;  %s235_s14 = sshll.u32 %s3498_s13, 4  ;;  %s3604_s14 = int_to_ptr.vmem [resolvable:$true] %s235_s14 }
  0x13   : > { %p3600_p11 = pnand %p2961_p9, %p5848_p1 }
  0x15   : > { %p3341_p13 = pneg %p3600_p11 }
  0x16   : > { %s3339_s17 = scalar_lea.hbm %s5868_s1, 2048 }
  0x17   : > { %p3340_p12 = scmp.ne.s32.totalorder %s5868_s1, %s3339_s17  ;;  %p3346_p5 = scmp.lt.u32.totalorder %s3339_s17, %s5868_s1 }
  0x19   : > { %p3342_p0 = pnand %p3341_p13, %p3340_p12 }
  0x1b   : > { %p3343_p3 = pneg %p3342_p0 }
  0x1d   : > { %p3348_p7 = pnand %p3346_p5, %p3343_p3 }
  0x1f   : > { %3351 = shalt.err (!%p3348_p7)
}
  0x20   : > { %s3352_s22 = scalar_lea.vmem %s3593_s11, 2048  ;;  %p3360_p2 = scmp.lt.s32.totalorder %s3593_s11, %s3593_s11 }
  0x21   : > { %p3353_p9 = scmp.ne.s32.totalorder %s3593_s11, %s3352_s22  ;;  %p3361_p12 = scmp.lt.s32.totalorder %s3352_s22, %s3352_s22 }
  0x23   : > { %p3355_p10 = pnand %p3353_p9, %p3341_p13  ;;  %p3362_p0 = por %p3361_p12, %p3360_p2 }
  0x25   : > { %p3356_p1 = pneg %p3355_p10 }
  0x27   : > { %p3363_p6 = pnand %p3362_p0, %p3356_p1 }
  0x29   : > { %3366 = shalt.err (!%p3363_p6)
}
  0x2a   : > { %s5849_s23 = smov 128   ;;  %s5850_s29 = smov 8  }
  0x2b   : > { %2964 = dma.hbm_to_vmem [thread:$0]  (!%p3600_p11), %s5868_s1, 2048, %s3593_s11, [#allocation6], %s5849_s23, %s5849_s23, %s5850_s29  }
  0x2c   : > { %s3367_s17 = scalar_lea.hbm %s5843_s3, 2048 }
  0x2d   : > { %p3368_p1 = scmp.ne.s32.totalorder %s5843_s3, %s3367_s17  ;;  %p3374_p10 = scmp.lt.u32.totalorder %s3367_s17, %s5843_s3 }
  0x2f   : > { %p3370_p2 = pnand %p3368_p1, %p3341_p13 }
  0x31   : > { %p3371_p6 = pneg %p3370_p2 }
  0x33   : > { %p3376_p3 = pnand %p3374_p10, %p3371_p6 }
  0x35   : > { %3379 = shalt.err (!%p3376_p3)
}
  0x36   : > { %s3380_s11 = scalar_lea.vmem %s3604_s14, 2048  ;;  %p3388_p12 = scmp.lt.s32.totalorder %s3604_s14, %s3604_s14 }
  0x37   : > { %p3381_p5 = scmp.ne.s32.totalorder %s3604_s14, %s3380_s11  ;;  %p3389_p0 = scmp.lt.s32.totalorder %s3380_s11, %s3380_s11 }
  0x39   : > { %p3383_p7 = pnand %p3381_p5, %p3341_p13  ;;  %p3390_p1 = por %p3389_p0, %p3388_p12 }
  0x3b   : > { %p3384_p9 = pneg %p3383_p7 }
  0x3d   : > { %p3391_p2 = pnand %p3390_p1, %p3384_p9 }
  0x3f   : > { %3394 = shalt.err (!%p3391_p2)
}
  0x40   : > { %s3501_s22 = smov 64   ;;  %s3502_s10 = smov 4  }
  0x41   : > { %2967 = dma.hbm_to_vmem [thread:$0]  (!%p3600_p11), %s5843_s3, 2048, %s3604_s14, [#allocation6], %s3501_s22, %s3501_s22, %s3502_s10  }
  0x42   : > { %s3662_s16 = sadd.s32 1, %s3495_s27   ;;  %s31_s18 = sadd.s32 1, %s3491_s26 }
  0x43   : > { %s28_s17 = ssub.s32 %s3495_s27, %s3662_s16  ;;  %p38_p6 = scmp.ne.s32.totalorder %s3491_s26, %s3487_s25 }
  0x44   : > { %p29_p13 = scmp.eq.s32.totalorder %s28_s17, 0  ;;  %p39_p10 = scmp.eq.s32.totalorder %s3495_s27, 0 }
  0x45   : > { %p5869_p5 = scmp.eq.s32.totalorder %s3570_s28, 1  ;;  %p2978_p9 = scmp.lt.s32.totalorder %s3495_s27, 2 }
  0x46   : > { %s3671_s19 = scalar_select %p29_p13, %s3491_s26, %s31_s18  }
  0x47   : > { %p40_p3 = por %p39_p10, %p38_p6  ;;  %p3675_p7 = por %p5869_p5, %p38_p6 }
  0x48   : > { %s258_s12 = sand.u32 1, %s3491_s26   ;;  %s2851_s14 = smul.u32 3200, %s3495_s27 }
  0x49   : > { %s5870_s20 = scalar_select %p3675_p7, 1, 0 }
  0x4a   : > { %s2947_s21 = smul.u32 200, %s258_s12  ;;  %p3682_p11 = pnand %p2978_p9, %p40_p3 }
  0x4b   : > { %s3689_s13 = scalar_lea.hbm %s5840_s0, %s2851_s14  ;;  %s3693_s18 = scalar_lea.sflag [#allocation3], %s258_s12 }
  0x4c   : > { %s262_s15 = scalar_lea.vmem [#allocation2], %s2947_s21  ;;  %s3395_s23 = scalar_lea.hbm %s3689_s13, 3200 }
  0x4d   : > { %s269_s17 = sshll.u32 %s262_s15, 4  ;;  %p3396_p12 = scmp.ne.s32.totalorder %s3689_s13, %s3395_s23  ;;  %s3691_s17 = int_to_ptr.vmem [resolvable:$true] %s269_s17 }
  0x4e   : > { %p3397_p0 = pneg %p3682_p11  ;;  %s3400_s10 = scalar_lea.hbm %s5840_s0, 6400 }
  0x4f   : > { %p3401_p13 = scmp.lt.u32.totalorder %s3689_s13, %s5840_s0  ;;  %p3402_p6 = scmp.lt.u32.totalorder %s3400_s10, %s3395_s23 }
  0x50   : > { %p3398_p1 = pnand %p3397_p0, %p3396_p12  ;;  %p3404_p3 = scmp.lt.u32.totalorder %s3395_s23, %s3689_s13 }
  0x51   : > { %p3403_p10 = por %p3402_p6, %p3401_p13 }
  0x52   : > { %p3399_p2 = pneg %p3398_p1 }
  0x53   : > { %p3405_p5 = por %p3404_p3, %p3403_p10 }
  0x55   : > { %p3406_p9 = pnand %p3405_p5, %p3399_p2 }
  0x57   : > { %3409 = shalt.err (!%p3406_p9)
}
  0x58   : > { %s3410_s12 = scalar_lea.vmem %s3691_s17, 3200  ;;  %s3503_s21 = smov [#allocation2]  }
  0x59   : > { %p3411_p12 = scmp.ne.s32.totalorder %s3691_s17, %s3410_s12  ;;  %s3415_s15 = sshll.u32 %s3503_s21, 4  ;;  %s3416_s15 = int_to_ptr.vmem [resolvable:$false] %s3415_s15 }
  0x5a   : > { %s3417_s1 = scalar_lea.vmem %s3416_s15, 6400  ;;  %p3418_p4 = scmp.lt.s32.totalorder %s3691_s17, %s3416_s15 }
  0x5b   : > { %p3413_p1 = pnand %p3411_p12, %p3397_p0  ;;  %p3419_p13 = scmp.lt.s32.totalorder %s3417_s1, %s3410_s12 }
  0x5d   : > { %p3414_p7 = pneg %p3413_p1  ;;  %p3420_p6 = por %p3419_p13, %p3418_p4 }
  0x5f   : > { %p3421_p10 = pnand %p3420_p6, %p3414_p7 }
  0x61   : > { %3424 = shalt.err (!%p3421_p10)
}
  0x62   : > { %s5872_s23 = smov 8   ;;  %s5873_s29 = smov 128  }
  0x63   : > { %2971 = dma.hbm_to_vmem [thread:$0]  (!%p3682_p11), %s3689_s13, 3200, %s3691_s17, %s3693_s18, %s5873_s29, %s5873_s29, %s5872_s23  }
  0x64   : > { %281 = sbr.rel (%p3589_p8) target bundleno = 1275 (0x4fb), region = 48 }
  0x6b   : > { %s3727_s14 = sand.u32 1, %s3487_s25   ;;  %p5874_p4 = scmp.ne.s32.totalorder %s5864_s30, 0 }
  0x6c   : > { %s2948_s22 = smul.u32 200, %s3727_s14  ;;  %s284_s10 = scalar_lea.sflag [#allocation3], %s3727_s14 }
  0x6e   : > { %s3733_s11 = scalar_lea.vmem [#allocation2], %s2948_s22 }
  0x6f   : > { %3470 = dma.done.wait (%p5874_p4), %s284_s10, 3200  }
  0x70   : > { %3472 = vsyncadd (%p5874_p4), %s284_s10, 4294964096  ;;  %p5875_p7 = scmp.eq.s32.totalorder %s3570_s28, 0 }
  0x72   : > { %3474 = dma.done.wait (%p5875_p7), [#allocation6], 4096   ;;  %p5876_p8 = pmov %p5875_p7 }
  0x73   : > { %v3504_v0 = vmov 0   ;;  %v3024_v1 = vld [vmem:[#allocation5 + $0x4] ss:$8 sps:$4 sm:$0xff]   ;;  %v3026_v2 = vld [vmem:[#allocation5] ss:$8 sps:$4 sm:$0xff]   ;;  %v329_v17 = vld [vmem:[%s3733_s11] sm:$0xff] }
  0x74   : > { %3476 = vsyncadd (%p5876_p8), [#allocation6], 4294963200  ;;  %507 = vmatprep.mubr.bf16.mxu0 %v3504_v0  ;;  %475 = vmatprep.subr.bf16.mxu0 %v3024_v1  ;;  %v3027_v3 = vld [vmem:[#allocation5 + $0x14] ss:$8 sps:$4 sm:$0xff]   ;;  %v3029_v4 = vld [vmem:[#allocation5 + $0x10] ss:$8 sps:$4 sm:$0xff]  }
  0x75   : > { %476 = vmatpush1.bf16.msra.mxu0 %v3026_v2  ;;  %v3030_v5 = vld [vmem:[#allocation5 + $0x24] ss:$8 sps:$4 sm:$0xff]   ;;  %v3032_v6 = vld [vmem:[#allocation5 + $0x20] ss:$8 sps:$4 sm:$0xff]   ;;  %v3033_v7 = vld [vmem:[#allocation5 + $0x34] ss:$8 sps:$4 sm:$0xff]  }
  0x76   : > { %477 = vmatprep.subr.bf16.mxu0 %v3027_v3  ;;  %v3035_v8 = vld [vmem:[#allocation5 + $0x30] ss:$8 sps:$4 sm:$0xff]   ;;  %v3036_v9 = vld [vmem:[#allocation5 + $0x44] ss:$8 sps:$4 sm:$0xff]   ;;  %v3038_v10 = vld [vmem:[#allocation5 + $0x40] ss:$8 sps:$4 sm:$0xff]  }
  0x77   : > { %v3039_v11 = vld [vmem:[#allocation5 + $0x54] ss:$8 sps:$4 sm:$0xff]   ;;  %v3041_v12 = vld [vmem:[#allocation5 + $0x50] ss:$8 sps:$4 sm:$0xff]   ;;  %v3042_v13 = vld [vmem:[#allocation5 + $0x64] ss:$8 sps:$4 sm:$0xff]  }
  0x78   : > { %v3044_v14 = vld [vmem:[#allocation5 + $0x60] ss:$8 sps:$4 sm:$0xff]   ;;  %v3045_v15 = vld [vmem:[#allocation5 + $0x74] ss:$8 sps:$4 sm:$0xff]   ;;  %v3047_v16 = vld [vmem:[#allocation5 + $0x70] ss:$8 sps:$4 sm:$0xff]  }
  0x79   : > { %478 = vmatpush1.bf16.msra.mxu0 %v3029_v4  ;;  %v330_v18 = vld [vmem:[%s3733_s11 + $0x8] sm:$0xff]  ;;  %v331_v20 = vld [vmem:[%s3733_s11 + $0x10] sm:$0xff]  ;;  %v332_v21 = vld [vmem:[%s3733_s11 + $0x18] sm:$0xff]  ;;  %s5691_s1 = scalar_lea.vmem [#allocation8], %s2948_s22  ;;  %s2852_s23 = smul.u32 3200, %s3570_s28 }
  0x7a   : > { %479 = vmatprep.subr.bf16.mxu0 %v3030_v5  ;;  %v354_v19 = vpack.c.bf16 %v330_v18, %v329_v17  ;;  %v355_v22 = vpack.c.bf16 %v332_v21, %v331_v20  ;;  %v333_v23 = vld [vmem:[%s3733_s11 + $0x20] sm:$0xff]  ;;  %v334_v24 = vld [vmem:[%s3733_s11 + $0x28] sm:$0xff]  ;;  %v335_v26 = vld [vmem:[%s3733_s11 + $0x30] sm:$0xff]  ;;  %s2712_s29 = sshll.u32 %s5691_s1, 4  ;;  %s2699_s28 = scalar_lea.sflag [#allocation4], %s3727_s14  ;;  %s5795_s29 = int_to_ptr.vmem [resolvable:$true] %s2712_s29 }
  0x7b   : > { %v356_v25 = vpack.c.bf16 %v334_v24, %v333_v23  ;;  %v336_v27 = vld [vmem:[%s3733_s11 + $0x38] sm:$0xff]  ;;  %v337_v29 = vld [vmem:[%s3733_s11 + $0x40] sm:$0xff]  ;;  %v338_v30 = vld [vmem:[%s3733_s11 + $0x48] sm:$0xff]  ;;  %s3425_s30 = scalar_lea.vmem %s5795_s29, 3200  ;;  %p5993_p0 = scmp.ne.s32.totalorder %s5870_s20, 0 }
  0x7c   : > { %v357_v28 = vpack.c.bf16 %v336_v27, %v335_v26  ;;  %v358_v31 = vpack.c.bf16 %v338_v30, %v337_v29  ;;  %v339_v32 = vld [vmem:[%s3733_s11 + $0x50] sm:$0xff]  ;;  %v340_v33 = vld [vmem:[%s3733_s11 + $0x58] sm:$0xff]  ;;  %v341_v35 = vld [vmem:[%s3733_s11 + $0x60] sm:$0xff]  ;;  %p3426_p11 = scmp.ne.s32.totalorder %s5795_s29, %s3425_s30  ;;  %s3506_s9 = smov [#allocation8]  }
  0x7d   : > { %480 = vmatpush1.bf16.msra.mxu0 %v3032_v6  ;;  %v359_v34 = vpack.c.bf16 %v340_v33, %v339_v32  ;;  %v342_v36 = vld [vmem:[%s3733_s11 + $0x68] sm:$0xff]  ;;  %v343_v38 = vld [vmem:[%s3733_s11 + $0x70] sm:$0xff]  ;;  %v344_v39 = vld [vmem:[%s3733_s11 + $0x78] sm:$0xff]  ;;  %s3429_s13 = sshll.u32 %s3506_s9, 4  ;;  %s3430_s13 = int_to_ptr.vmem [resolvable:$false] %s3429_s13 }
  0x7e   : > { %481 = vmatprep.subr.bf16.mxu0 %v3033_v7  ;;  %v360_v37 = vpack.c.bf16 %v342_v36, %v341_v35  ;;  %v361_v40 = vpack.c.bf16 %v344_v39, %v343_v38  ;;  %v345_v41 = vld [vmem:[%s3733_s11 + $0x80] sm:$0xff]  ;;  %v346_v42 = vld [vmem:[%s3733_s11 + $0x88] sm:$0xff]  ;;  %v347_v44 = vld [vmem:[%s3733_s11 + $0x90] sm:$0xff]  ;;  %p3427_p2 = pnand %p3426_p11, %p5993_p0  ;;  %s3431_s17 = scalar_lea.vmem %s3430_s13, 6400 }
  0x7f   : > { %v362_v43 = vpack.c.bf16 %v346_v42, %v345_v41  ;;  %v348_v45 = vld [vmem:[%s3733_s11 + $0x98] sm:$0xff]  ;;  %v349_v47 = vld [vmem:[%s3733_s11 + $0xa0] sm:$0xff]  ;;  %v350_v48 = vld [vmem:[%s3733_s11 + $0xa8] sm:$0xff]  ;;  %p3432_p5 = scmp.lt.s32.totalorder %s5795_s29, %s3430_s13  ;;  %p3433_p9 = scmp.lt.s32.totalorder %s3431_s17, %s3425_s30 }
  0x80   : > { %v363_v46 = vpack.c.bf16 %v348_v45, %v347_v44  ;;  %v364_v49 = vpack.c.bf16 %v350_v48, %v349_v47  ;;  %v351_v50 = vld [vmem:[%s3733_s11 + $0xb0] sm:$0xff]  ;;  %v352_v51 = vld [vmem:[%s3733_s11 + $0xb8] sm:$0xff]  ;;  %v353_v53 = vld [vmem:[%s3733_s11 + $0xc0] sm:$0xff]  ;;  %p3428_p3 = pneg %p3427_p2 }
  0x81   : > { %482 = vmatpush1.bf16.msra.mxu0 %v3035_v8  ;;  %v365_v52 = vpack.c.bf16 %v352_v51, %v351_v50  ;;  %v366_v54 = vpack.c.bf16 %v353_v53, %v353_v53  ;;  %v3048_v55 = vld [vmem:[#allocation7 + $0x40] sm:$0xff]   ;;  %v3050_v57 = vld [vmem:[#allocation7 + $0x48] sm:$0xff]   ;;  %v3052_v59 = vld [vmem:[#allocation7 + $0x50] sm:$0xff]   ;;  %p3434_p12 = por %p3433_p9, %p3432_p5 }
  0x82   : > { %483 = vmatprep.subr.bf16.mxu0 %v3036_v9  ;;  %2853 = vmatprep.subr.bf16.mxu1 %v3048_v55  ;;  %v3049_v56 = vld [vmem:[#allocation7] sm:$0xff]   ;;  %v3051_v58 = vld [vmem:[#allocation7 + $0x8] sm:$0xff]   ;;  %v3053_v60 = vld [vmem:[#allocation7 + $0x10] sm:$0xff]  }
  0x83   : > { %2854 = vmatpush3.bf16.msra.mxu1 %v3049_v56  ;;  %v3054_v61 = vld [vmem:[#allocation7 + $0x58] sm:$0xff]   ;;  %v3056_v63 = vld [vmem:[#allocation7 + $0x60] sm:$0xff]   ;;  %v383_v4 = vld [vmem:[%s5842_s2] sm:$0x3]  ;;  %p3435_p1 = pnand %p3434_p12, %p3428_p3 }
  0x84   : > { %2855 = vmatprep.subr.bf16.mxu1 %v3050_v57  ;;  %v3055_v62 = vld [vmem:[#allocation7 + $0x18] sm:$0xff]   ;;  %v3057_v2 = vld [vmem:[#allocation7 + $0x20] sm:$0xff]   ;;  %v3060_v27 = vld [vmem:[#allocation7 + $0x70] sm:$0xff]   ;;  %v5853_v57 = vmov 1.0  }
  0x85   : > { %484 = vmatpush1.bf16.msra.mxu0 %v3038_v10  ;;  %v3061_v39 = vld [vmem:[#allocation7 + $0x30] sm:$0xff]  }
  0x86   : > { %485 = vmatprep.subr.bf16.mxu0 %v3039_v11 }
  0x87   : > { %2856 = vmatpush3.bf16.msra.mxu1 %v3051_v58 }
  0x88   : > { %2857 = vmatprep.subr.bf16.mxu1 %v3052_v59 }
  0x89   : > { %486 = vmatpush1.bf16.msra.mxu0 %v3041_v12 }
  0x8a   : > { %487 = vmatprep.subr.bf16.mxu0 %v3042_v13 }
  0x8b   : > { %2858 = vmatpush3.bf16.msra.mxu1 %v3053_v60 }
  0x8c   : > { %2859 = vmatprep.subr.bf16.mxu1 %v3054_v61 }
  0x8d   : > { %488 = vmatpush1.bf16.msra.mxu0 %v3044_v14 }
  0x8e   : > { %489 = vmatprep.subr.bf16.mxu0 %v3045_v15 }
  0x8f   : > { %2860 = vmatpush3.bf16.msra.mxu1 %v3055_v62 }
  0x90   : > { %2861 = vmatprep.subr.bf16.mxu1 %v3056_v63 }
  0x91   : > { %490 = vmatpush1.bf16.msra.mxu0 %v3047_v16  ;;  %v3058_v16 = vld [vmem:[#allocation7 + $0x68] sm:$0xff]  }
  0x93   : > { %2862 = vmatpush3.bf16.msra.mxu1 %v3057_v2 }
  0x94   : > { %508 = vmatmul.mubr.bf16.vlgmr.msra.gmra.mrb[0].mxu0 %v354_v19  ;;  %2863 = vmatprep.subr.bf16.mxu1 %v3058_v16  ;;  %v3059_v19 = vld [vmem:[#allocation7 + $0x28] sm:$0xff]  }
  0x95   : > { %517 = vmatprep.mubr.bf16.mxu0 %v3504_v0 }
  0x97   : > { %2864 = vmatpush3.bf16.msra.mxu1 %v3059_v19 }
  0x98   : > { %2865 = vmatprep.subr.bf16.mxu1 %v3060_v27 }
  0x9b   : > { %2866 = vmatpush3.bf16.msra.mxu1 %v3061_v39 }
  0x9c   : > { %518 = vmatmul.mubr.bf16.gmra.mrb[4].mxu0 %v355_v22 }
  0x9d   : > { %527 = vmatprep.mubr.bf16.mxu0 %v3504_v0 }
  0xa4   : > { %528 = vmatmul.mubr.bf16.gmra.mrb[8].mxu0 %v356_v25 }
  0xa5   : > { %537 = vmatprep.mubr.bf16.mxu0 %v3504_v0 }
  0xac   : > { %538 = vmatmul.mubr.bf16.gmra.mrb[12].mxu0 %v357_v28 }
  0xad   : > { %547 = vmatprep.mubr.bf16.mxu0 %v3504_v0 }
  0xb4   : > { %548 = vmatmul.mubr.bf16.gmra.mrb[16].mxu0 %v358_v31 }
  0xb5   : > { %557 = vmatprep.mubr.bf16.mxu0 %v3504_v0 }
  0xbc   : > { %558 = vmatmul.mubr.bf16.gmra.mrb[20].mxu0 %v359_v34 }
  0xbd   : > { %567 = vmatprep.mubr.bf16.mxu0 %v3504_v0 }
  0xc4   : > { %568 = vmatmul.mubr.bf16.gmra.mrb[24].mxu0 %v360_v37 }
  0xc5   : > { %577 = vmatprep.mubr.bf16.mxu0 %v3504_v0 }
  0xcc   : > { %578 = vmatmul.mubr.bf16.gmra.mrb[28].mxu0 %v361_v40 }
  0xcd   : > { %587 = vmatprep.mubr.bf16.mxu0 %v3504_v0 }
  0xd4   : > { %588 = vmatmul.mubr.bf16.gmra.mrb[32].mxu0 %v362_v43 }
  0xd5   : > { %597 = vmatprep.mubr.bf16.mxu0 %v3504_v0 }
  0xdc   : > { %598 = vmatmul.mubr.bf16.gmra.mrb[36].mxu0 %v363_v46 }
  0xdd   : > { %607 = vmatprep.mubr.bf16.mxu0 %v3504_v0 }
  0xe4   : > { %608 = vmatmul.mubr.bf16.gmra.mrb[40].mxu0 %v364_v49 }
  0xe5   : > { %617 = vmatprep.mubr.bf16.mxu0 %v3504_v0 }
  0xec   : > { %618 = vmatmul.mubr.bf16.gmra.mrb[44].mxu0 %v365_v52 }
  0xed   : > { %627 = vmatprep.mubr.bf16.mxu0 %v3504_v0  ;;  %v385_v0 = vlaneseq }
  0xef   : > { %v386_v1 = vshrl.u32 %v385_v0, 7 }
  0xf1   : > { %v387_v3 = vsub.s32 0, %v386_v1  ;;  %v391_v5 = vsub.s32 1, %v386_v1 }
  0xf3   : > { %v3784_v6 = vrot.slane %v383_v4, %v387_v3  ;;  %v3786_v8 = vrot.slane %v383_v4, %v391_v5 }
  0xf4   : > { %628 = vmatmul.mubr.bf16.gmra.mrb[48].mxu0 %v366_v54 }
 0x167   : > { %v509_v7 = vpop.f32.mrb[0].mxu0 }
 0x168   : > { %v510_v9 = vadd.f32 %v509_v7, %v3784_v6  ;;  %v511_v10 = vpop.f32.mrb[1].mxu0 }
 0x169   : > { %v513_v11 = vpop.f32.mrb[2].mxu0  ;;  %v512_v15 = vadd.f32 %v511_v10, %v3786_v8 }
 0x16a   : > { %v686_v12 = vmul.f32 0.70710677, %v510_v9  ;;  %v514_v13 = vadd.f32 %v513_v11, %v3784_v6  ;;  %v515_v14 = vpop.f32.mrb[3].mxu0  ;;  %v3823_v48 = vmul.f32 0.5, %v510_v9 }
 0x16b   : > { %v3794_v22 = vmul.f32 0.70710677, %v512_v15  ;;  %v516_v29 = vadd.f32 %v515_v14, %v3786_v8  ;;  %v3825_v49 = vmul.f32 0.5, %v512_v15 }
 0x16c   : > { %v836_v17 = vand.u32 2147483647, %v686_v12  ;;  %v3791_v18 = vmul.f32 0.70710677, %v514_v13  ;;  %vm736_vm0 = vcmp.lt.f32.partialorder %v686_v12, 0.0  ;;  %v3827_v50 = vmul.f32 0.5, %v514_v13 }
 0x16d   : > { %5877 = vst [vmem:[#allocation12_spill] sm:$0xff] %v3794_v22  ;;  %v837_v31 = vand.u32 2147483647, %v3794_v22  ;;  %v3807_v37 = vmul.f32 0.70710677, %v516_v29  ;;  %5879 = vst [vmem:[#allocation14_spill] sm:$0xff] %v3825_v49 }
 0x16e   : > { %v886_v20 = vmul.f32 0.3275911, %v836_v17  ;;  %v838_v21 = vand.u32 2147483647, %v3791_v18  ;;  %v1536_v33 = vsub.f32 0.0, %v836_v17  ;;  %v3840_v58 = vsel %vm736_vm0, -1.0, %v5853_v57 }
 0x16f   : > { %v519_v25 = vpop.f32.mrb[4].mxu0  ;;  %5878 = vst [vmem:[#allocation13_spill] sm:$0xff] %v3807_v37  ;;  %v887_v40 = vmul.f32 0.3275911, %v837_v31  ;;  %v1537_v41 = vsub.f32 0.0, %v837_v31  ;;  %vm738_vm1 = vcmp.lt.f32.partialorder %v3791_v18, 0.0 }
 0x170   : > { %v936_v23 = vadd.f32 1.0, %v886_v20  ;;  %v888_v24 = vmul.f32 0.3275911, %v838_v21  ;;  %v521_v26 = vpop.f32.mrb[5].mxu0  ;;  %v3799_v34 = vadd.f32 %v519_v25, %v3784_v6  ;;  %v1586_v44 = vmul.f32 %v1536_v33, %v836_v17 }
 0x171   : > { %v523_v30 = vpop.f32.mrb[6].mxu0  ;;  %v3802_v35 = vadd.f32 %v521_v26, %v3786_v8  ;;  %v1538_v53 = vsub.f32 0.0, %v838_v21  ;;  %v839_v54 = vand.u32 2147483647, %v3807_v37  ;;  %v1587_v59 = vmul.f32 %v1537_v41, %v837_v31 }
 0x172   : > { %3064 = vrcp.f32 %v936_v23  ;;  %v938_v28 = vadd.f32 1.0, %v888_v24  ;;  %v525_v32 = vpop.f32.mrb[7].mxu0  ;;  %v3805_v36 = vadd.f32 %v523_v30, %v3784_v6  ;;  %v3810_v38 = vmul.f32 0.70710677, %v3799_v34 }
 0x173   : > { %v3813_v42 = vmul.f32 0.70710677, %v3802_v35  ;;  %v1636_v63 = vmul.f32 1.442695, %v1586_v44  ;;  %v937_v0 = vadd.f32 1.0, %v887_v40  ;;  %v3849_v2 = vadd.f32 %v525_v32, %v3786_v8 }
 0x174   : > { %3066 = vrcp.f32 %v938_v28  ;;  %v3816_v45 = vand.u32 2147483647, %v3810_v38  ;;  %v3819_v46 = vmul.f32 0.70710677, %v3805_v36  ;;  %v1588_v9 = vmul.f32 %v1538_v53, %v838_v21 }
 0x175   : > { %v3830_v51 = vand.u32 2147483647, %v3813_v42  ;;  %v1539_v10 = vsub.f32 0.0, %v839_v54  ;;  %v1638_v12 = vmul.f32 1.442695, %v1587_v59  ;;  %v3861_v16 = vmul.f32 0.5, %v516_v29 }
 0x176   : > { %v890_v55 = vmul.f32 0.3275911, %v3816_v45  ;;  %v3844_v61 = vand.u32 2147483647, %v3819_v46  ;;  %v889_v17 = vmul.f32 0.3275911, %v839_v54 }
 0x177   : > { %v529_v43 = vpop.f32.mrb[8].mxu0  ;;  %v891_v60 = vmul.f32 0.3275911, %v3830_v51  ;;  %5880 = vst [vmem:[#allocation15_spill] sm:$0xff] %v3861_v16  ;;  %v3864_v19 = vmul.f32 0.70710677, %v3849_v2  ;;  %v1589_v27 = vmul.f32 %v1539_v10, %v839_v54 }
 0x178   : > { %v3821_v47 = vpop.f32.mrb[9].mxu0  ;;  %v940_v1 = vadd.f32 1.0, %v890_v55  ;;  %v892_v5 = vmul.f32 0.3275911, %v3844_v61  ;;  %v3854_v7 = vadd.f32 %v529_v43, %v3784_v6  ;;  %v3878_v26 = vsel %vm738_vm1, -1.0, %v5853_v57 }
 0x179   : > { %v3832_v52 = vpop.f32.mrb[10].mxu0  ;;  %v941_v4 = vadd.f32 1.0, %v891_v60  ;;  %v3881_v28 = vand.u32 2147483647, %v3864_v19  ;;  %v1640_v32 = vmul.f32 1.442695, %v1588_v9 }
 0x17a   : > { %v3836_v56 = vpop.f32.mrb[11].mxu0  ;;  %3068 = vrcp.f32 %v940_v1  ;;  %v942_v13 = vadd.f32 1.0, %v892_v5  ;;  %v3871_v24 = vmul.f32 0.70710677, %v3854_v7  ;;  %v939_v33 = vadd.f32 1.0, %v889_v17 }
 0x17b   : > { %3070 = vrcp.f32 %v941_v4  ;;  %v3886_v39 = vmul.f32 0.5, %v3799_v34  ;;  %v3889_v40 = vmul.f32 0.5, %v3802_v35  ;;  %v893_v18 = vmul.f32 0.3275911, %v3881_v28  ;;  %v3062_v35 = vld [vmem:[#allocation7 + $0x78] sm:$0xff]  }
 0x17c   : > { %v3846_v62 = vpop.eup %3064  ;;  %3072 = vrcp.f32 %v937_v0  ;;  %v1540_v44 = vsub.f32 0.0, %v3816_v45  ;;  %v3896_v53 = vand.u32 2147483647, %v3871_v24  ;;  %v1642_v54 = vmul.f32 1.442695, %v1589_v27  ;;  %2867 = vmatprep.subr.bf16.mxu1 %v3062_v35 }
 0x17d   : > { %v1086_v3 = vmul.f32 1.0614054, %v3846_v62  ;;  %3074 = vpow2.f32 %v1636_v63  ;;  %v1541_v55 = vsub.f32 0.0, %v3830_v51  ;;  %v943_v59 = vadd.f32 1.0, %v893_v18 }
 0x17e   : > { %v3859_v15 = vpop.eup %3066  ;;  %3076 = vrcp.f32 %v942_v13  ;;  %v3901_v34 = vadd.f32 %v3821_v47, %v3786_v8  ;;  %v3904_v63 = vmul.f32 0.5, %v3805_v36  ;;  %v894_v0 = vmul.f32 0.3275911, %v3896_v53  ;;  %v3063_v47 = vld [vmem:[#allocation7 + $0x38] sm:$0xff]  }
 0x17f   : > { %v1136_v11 = vadd.f32 -1.4531521, %v1086_v3  ;;  %v3857_v14 = vpop.f32.mrb[12].mxu0  ;;  %v1088_v23 = vmul.f32 1.0614054, %v3859_v15  ;;  %3078 = vpow2.f32 %v1638_v12  ;;  %vm740_vm2 = vcmp.lt.f32.partialorder %v3810_v38, 0.0  ;;  %2868 = vmatpush3.bf16.msra.mxu1 %v3063_v47 }
 0x180   : > { %v3866_v20 = vpop.f32.mrb[13].mxu0  ;;  %3080 = vpow2.f32 %v1640_v32  ;;  %vm741_vm3 = vcmp.lt.f32.partialorder %v3813_v42, 0.0  ;;  %v1590_v36 = vmul.f32 %v1540_v44, %v3816_v45  ;;  %vm742_vm4 = vcmp.lt.f32.partialorder %v3819_v46, 0.0 }
 0x181   : > { %v1186_v21 = vmul.f32 %v3846_v62, %v1136_v11  ;;  %v3873_v25 = vpop.f32.mrb[14].mxu0  ;;  %v1138_v31 = vadd.f32 -1.4531521, %v1088_v23  ;;  %3082 = vrcp.f32 %v943_v59  ;;  %v944_v10 = vadd.f32 1.0, %v894_v0 }
 0x182   : > { %v3883_v29 = vpop.f32.mrb[15].mxu0  ;;  %v1591_v17 = vmul.f32 %v1541_v55, %v3830_v51  ;;  %v3926_v23 = vmul.f32 0.70710677, %v3901_v34  ;;  %v3947_v44 = vsel %vm742_vm4, -1.0, %v5853_v57  ;;  %v1644_v59 = vmul.f32 1.442695, %v1590_v36 }
 0x183   : > { %v1236_v30 = vadd.f32 1.4214138, %v1186_v21  ;;  %v1188_v43 = vmul.f32 %v3859_v15, %v1138_v31  ;;  %v1542_v21 = vsub.f32 0.0, %v3844_v61  ;;  %v3934_v31 = vsel %vm740_vm2, -1.0, %v5853_v57 }
 0x184   : > { %v3907_v1 = vpop.eup %3068  ;;  %3084 = vrcp.f32 %v944_v10  ;;  %v3961_v46 = vand.u32 2147483647, %v3926_v23  ;;  %vm743_vm5 = vcmp.lt.f32.partialorder %v3864_v19, 0.0  ;;  %vm744_vm6 = vcmp.lt.f32.partialorder %v3871_v24, 0.0 }
 0x185   : > { %v1286_v41 = vmul.f32 %v3846_v62, %v1236_v30  ;;  %v1238_v3 = vadd.f32 1.4214138, %v1188_v43  ;;  %v3913_v5 = vpop.eup %3070  ;;  %v1090_v9 = vmul.f32 1.0614054, %v3907_v1  ;;  %v1592_v47 = vmul.f32 %v1542_v21, %v3844_v61 }
 0x186   : > { %v3920_v12 = vpop.eup %3072  ;;  %v1091_v13 = vmul.f32 1.0614054, %v3913_v5  ;;  %3086 = vrcp.f32 %v939_v33  ;;  %v3969_v61 = vmul.f32 0.5, %v3854_v7  ;;  %vm745_vm7 = vcmp.lt.f32.partialorder %v3926_v23, 0.0 }
 0x187   : > { %v1336_v60 = vadd.f32 -0.28449672, %v1286_v41  ;;  %v3911_v4 = vpop.f32.mrb[16].mxu0  ;;  %5881 = vst [vmem:[#allocation16_spill] sm:$0xff] %v3920_v12  ;;  %v3075_v45 = vpop.eup %3074  ;;  %v1140_v32 = vadd.f32 -1.4531521, %v1090_v9  ;;  %v1288_v51 = vmul.f32 %v3859_v15, %v1238_v3  ;;  %3088 = vpow2.f32 %v1642_v54 }
 0x188   : > { %v3918_v11 = vpop.f32.mrb[17].mxu0  ;;  %v3936_v18 = vpop.eup %3076  ;;  %v3942_v41 = vsel %vm741_vm3, -1.0, %v5853_v57  ;;  %v1141_v43 = vadd.f32 -1.4531521, %v1091_v13  ;;  %v1646_v3 = vmul.f32 1.442695, %v1591_v17  ;;  %3090 = vpow2.f32 %v1644_v59 }
 0x189   : > { %v3928_v27 = vpop.f32.mrb[18].mxu0  ;;  %v1386_v30 = vmul.f32 %v3846_v62, %v1336_v60  ;;  %v3949_v38 = vpop.eup %3078  ;;  %v1190_v55 = vmul.f32 %v3907_v1, %v1140_v32  ;;  %v1092_v35 = vmul.f32 1.0614054, %v3936_v18  ;;  %v3954_v60 = vmul.f32 0.5, %v3849_v2 }
 0x18a   : > { %5882 = vst [vmem:[#allocation17_spill] sm:$0xff] %v3949_v38  ;;  %v3956_v0 = vpop.f32.mrb[19].mxu0  ;;  %v1191_v42 = vmul.f32 %v3913_v5, %v1141_v43  ;;  %v1338_v36 = vadd.f32 -0.28449672, %v1288_v51  ;;  %v895_v2 = vmul.f32 0.3275911, %v3961_v46  ;;  %v3964_v57 = vpop.eup %3080  ;;  %v3978_v43 = vadd.f32 %v3832_v52, %v3784_v6 }
 0x18b   : > { %v1436_v9 = vadd.f32 0.2548296, %v1386_v30  ;;  %v1240_v10 = vadd.f32 1.4214138, %v1190_v55  ;;  %v1142_v13 = vadd.f32 -1.4531521, %v1092_v35  ;;  %v3973_v33 = vpop.eup %3082 }
 0x18c   : > { %v1241_v32 = vadd.f32 1.4214138, %v1191_v42  ;;  %v1648_v54 = vmul.f32 1.442695, %v1592_v47  ;;  %v945_v51 = vadd.f32 1.0, %v895_v2 }
 0x18d   : > { %v1290_v16 = vmul.f32 %v3907_v1, %v1240_v10  ;;  %v1192_v17 = vmul.f32 %v3936_v18, %v1142_v13  ;;  %v1486_v59 = vmul.f32 %v3846_v62, %v1436_v9  ;;  %v1388_v10 = vmul.f32 %v3859_v15, %v1338_v36 }
 0x18e   : > { %v1291_v30 = vmul.f32 %v3913_v5, %v1241_v32  ;;  %v1093_v47 = vmul.f32 1.0614054, %v3973_v33  ;;  %3092 = vrcp.f32 %v945_v51  ;;  %v3988_v32 = vpop.eup %3084  ;;  %v1543_v62 = vsub.f32 0.0, %v3881_v28 }
 0x18f   : > { %v3971_v21 = vpop.f32.mrb[20].mxu0  ;;  %v1340_v35 = vadd.f32 -0.28449672, %v1290_v16  ;;  %v1242_v42 = vadd.f32 1.4214138, %v1192_v17  ;;  %v1544_v16 = vsub.f32 0.0, %v3896_v53  ;;  %v1736_v51 = vmul.f32 %v3075_v45, %v1486_v59 }
 0x190   : > { %v3980_v55 = vpop.f32.mrb[21].mxu0  ;;  %v1341_v13 = vadd.f32 -0.28449672, %v1291_v30  ;;  %v1143_v49 = vadd.f32 -1.4531521, %v1093_v47  ;;  %3094 = vpow2.f32 %v1646_v3  ;;  %v1593_v59 = vmul.f32 %v1543_v62, %v3881_v28 }
 0x191   : > { %5883 = vst [vmem:[#allocation18_spill] sm:$0xff] %v3980_v55  ;;  %v3984_v7 = vpop.f32.mrb[22].mxu0  ;;  %v1390_v52 = vmul.f32 %v3907_v1, %v1340_v35  ;;  %v1292_v2 = vmul.f32 %v3936_v18, %v1242_v42  ;;  %v1094_v36 = vmul.f32 1.0614054, %v3988_v32  ;;  %v3999_v30 = vmul.f32 0.70710677, %v3978_v43 }
 0x192   : > { %5884 = vst [vmem:[#allocation19_spill] sm:$0xff] %v3984_v7  ;;  %v3994_v9 = vpop.f32.mrb[23].mxu0  ;;  %v1391_v17 = vmul.f32 %v3913_v5, %v1341_v13  ;;  %v5886_v35 = vmov 1.0   ;;  %v1438_v12 = vadd.f32 0.2548296, %v1388_v10  ;;  %v1193_v22 = vmul.f32 %v3973_v33, %v1143_v49 }
 0x193   : > { %5885 = vst [vmem:[#allocation20_spill] sm:$0xff] %v3994_v9  ;;  %v1342_v38 = vadd.f32 -0.28449672, %v1292_v2  ;;  %v4004_v42 = vsel %vm743_vm5, -1.0, %v5886_v35  ;;  %v1144_v13 = vadd.f32 -1.4531521, %v1094_v36  ;;  %v4012_v9 = vpop.eup %3086  ;;  %3096 = vpow2.f32 %v1648_v54 }
 0x194   : > { %5889 = vst [vmem:[#allocation23_spill] sm:$0xff] %v4012_v9  ;;  %v1440_v45 = vadd.f32 0.2548296, %v1390_v52  ;;  %v1441_v3 = vadd.f32 0.2548296, %v1391_v17  ;;  %v4017_v2 = vpop.eup %3088  ;;  %v1594_v49 = vmul.f32 %v1544_v16, %v3896_v53  ;;  %v1786_v52 = vsub.f32 1.0, %v1736_v51 }
 0x195   : > { %5891 = vst [vmem:[#allocation25_spill] sm:$0xff] %v4017_v2  ;;  %v1194_v10 = vmul.f32 %v3988_v32, %v1144_v13  ;;  %v4022_v36 = vand.u32 2147483647, %v3999_v30  ;;  %v3091_v9 = vpop.eup %3090  ;;  %v1392_v54 = vmul.f32 %v3936_v18, %v1342_v38  ;;  %v1545_v28 = vsub.f32 0.0, %v3961_v46 }
 0x196   : > { %v536_v62 = vadd.f32 %v3836_v56, %v3786_v8  ;;  %v1490_v16 = vmul.f32 %v3907_v1, %v1440_v45  ;;  %v1650_v2 = vmul.f32 1.442695, %v1593_v59  ;;  %v4037_v51 = vsel %vm744_vm6, -1.0, %v5886_v35 }
 0x197   : > { %v4006_v37 = vpop.f32.mrb[24].mxu0  ;;  %v1244_v13 = vadd.f32 1.4214138, %v1194_v10  ;;  %v896_v53 = vmul.f32 0.3275911, %v4022_v36  ;;  %v4041_v38 = vadd.f32 %v3857_v14, %v3784_v6  ;;  %v1595_v24 = vmul.f32 %v1545_v28, %v3961_v46 }
 0x198   : > { %5887 = vst [vmem:[#allocation21_spill] sm:$0xff] %v4006_v37  ;;  %v4010_v47 = vpop.f32.mrb[25].mxu0  ;;  %v1243_v37 = vadd.f32 1.4214138, %v1193_v22  ;;  %v1488_v22 = vmul.f32 %v3859_v15, %v1438_v12  ;;  %v4043_v56 = vpop.eup %3092  ;;  %v1491_v15 = vmul.f32 %v3913_v5, %v1441_v3  ;;  %v1652_v12 = vmul.f32 1.442695, %v1594_v49 }
 0x199   : > { %5888 = vst [vmem:[#allocation22_spill] sm:$0xff] %v4010_v47  ;;  %v4015_v19 = vpop.f32.mrb[26].mxu0  ;;  %v946_v10 = vadd.f32 1.0, %v896_v53  ;;  %v1095_v45 = vmul.f32 1.0614054, %v4043_v56  ;;  %v1836_v59 = vmul.f32 %v1786_v52, %v3840_v58  ;;  %v1740_v55 = vmul.f32 %v3091_v9, %v1490_v16 }
 0x19a   : > { %5890 = vst [vmem:[#allocation24_spill] sm:$0xff] %v4015_v19  ;;  %v4024_v47 = vpop.f32.mrb[27].mxu0  ;;  %v1293_v17 = vmul.f32 %v3973_v33, %v1243_v37  ;;  %v1294_v37 = vmul.f32 %v3988_v32, %v1244_v13  ;;  %v1738_v19 = vmul.f32 %v3964_v57, %v1488_v22  ;;  %v4051_v14 = vmul.f32 0.70710677, %v536_v62  ;;  %v3095_v7 = vpop.eup %3094 }
 0x19b   : > { %5892 = vst [vmem:[#allocation26_spill] sm:$0xff] %v4024_v47  ;;  %v1442_v47 = vadd.f32 0.2548296, %v1392_v54  ;;  %3098 = vrcp.f32 %v946_v10  ;;  %v4054_v3 = vmul.f32 0.5, %v3901_v34  ;;  %v1145_v49 = vadd.f32 -1.4531521, %v1095_v45 }
 0x19c   : > { %v1343_v1 = vadd.f32 -0.28449672, %v1293_v17  ;;  %v1344_v5 = vadd.f32 -0.28449672, %v1294_v37  ;;  %v1741_v54 = vmul.f32 %v3095_v7, %v1491_v15  ;;  %3100 = vpow2.f32 %v1650_v2 }
 0x19d   : > { %v4058_v46 = vmul.f32 0.5, %v3978_v43  ;;  %v3097_v58 = vpop.eup %3096  ;;  %v1492_v57 = vmul.f32 %v3936_v18, %v1442_v47  ;;  %3102 = vpow2.f32 %v1652_v12  ;;  %v1195_v9 = vmul.f32 %v4043_v56, %v1145_v49 }
 0x19e   : > { %v1393_v52 = vmul.f32 %v3973_v33, %v1343_v1  ;;  %v1886_v28 = vadd.f32 1.0, %v1836_v59  ;;  %v1788_v22 = vsub.f32 1.0, %v1738_v19  ;;  %v1654_v34 = vmul.f32 1.442695, %v1595_v24 }
 0x19f   : > { %v4064_v17 = vand.u32 2147483647, %v4051_v14  ;;  %v1790_v7 = vsub.f32 1.0, %v1740_v55  ;;  %v1394_v2 = vmul.f32 %v3988_v32, %v1344_v5  ;;  %v1245_v13 = vadd.f32 1.4214138, %v1195_v9 }
 0x1a0   : > { %v4068_v43 = vmul.f32 0.70710677, %v4041_v38  ;;  %v1791_v53 = vsub.f32 1.0, %v1741_v54  ;;  %v4073_v18 = vsel %vm745_vm7, -1.0, %v5886_v35  ;;  %v1546_v47 = vsub.f32 0.0, %v4022_v36 }
 0x1a1   : > { %v897_v19 = vmul.f32 0.3275911, %v4064_v17  ;;  %v1742_v16 = vmul.f32 %v3097_v58, %v1492_v57  ;;  %v1443_v15 = vadd.f32 0.2548296, %v1393_v52  ;;  %v1295_v55 = vmul.f32 %v4043_v56, %v1245_v13 }
 0x1a2   : > { %v4079_v37 = vand.u32 2147483647, %v4068_v43  ;;  %v1838_v12 = vmul.f32 %v1788_v22, %v3878_v26  ;;  %3104 = vpow2.f32 %v1654_v34  ;;  %v4082_v10 = vmul.f32 0.5, %v536_v62 }
 0x1a3   : > { %v947_v1 = vadd.f32 1.0, %v897_v19  ;;  %v4085_v23 = vmul.f32 %v1886_v28, %v3823_v48  ;;  %v1840_v45 = vmul.f32 %v1790_v7, %v3934_v31  ;;  %v1444_v24 = vadd.f32 0.2548296, %v1394_v2 }
 0x1a4   : > { %v898_v59 = vmul.f32 0.3275911, %v4079_v37  ;;  %v1841_v49 = vmul.f32 %v1791_v53, %v3942_v41  ;;  %v1345_v54 = vadd.f32 -0.28449672, %v1295_v55  ;;  %v1596_v58 = vmul.f32 %v1546_v47, %v4022_v36 }
 0x1a5   : > { %v4089_v5 = vpop.eup %3098  ;;  %3106 = vrcp.f32 %v947_v1  ;;  %v1792_v26 = vsub.f32 1.0, %v1742_v16  ;;  %v1493_v62 = vmul.f32 %v3973_v33, %v1443_v15  ;;  %v1888_v9 = vadd.f32 1.0, %v1838_v12 }
 0x1a6   : > { %v1096_v57 = vmul.f32 1.0614054, %v4089_v5  ;;  %v948_v48 = vadd.f32 1.0, %v898_v59  ;;  %v3101_v52 = vpop.eup %3100  ;;  %vm746_vm8 = vcmp.lt.f32.partialorder %v3999_v30, 0.0  ;;  %vm747_vm9 = vcmp.lt.f32.partialorder %v4051_v14, 0.0 }
 0x1a7   : > { %v4099_v31 = vadd.f32 %v3866_v20, %v3786_v8  ;;  %v3103_v41 = vpop.eup %3102  ;;  %v1890_v28 = vadd.f32 1.0, %v1840_v45  ;;  %v1494_v36 = vmul.f32 %v3988_v32, %v1444_v24  ;;  %v1891_v33 = vadd.f32 1.0, %v1841_v49 }
 0x1a8   : > { %v1146_v22 = vadd.f32 -1.4531521, %v1096_v57  ;;  %3108 = vrcp.f32 %v948_v48  ;;  %v1395_v34 = vmul.f32 %v4043_v56, %v1345_v54  ;;  %v1656_v7 = vmul.f32 1.442695, %v1596_v58 }
 0x1a9   : > { %v4104_v2 = vmul.f32 0.70710677, %v4099_v31  ;;  %v1842_v13 = vmul.f32 %v1792_v26, %v3947_v44  ;;  %v1743_v53 = vmul.f32 %v3101_v52, %v1493_v62  ;;  %v4110_v20 = vadd.f32 %v3873_v25, %v3784_v6 }
 0x1aa   : > { %v1196_v47 = vmul.f32 %v4089_v5, %v1146_v22  ;;  %v4113_v32 = vmul.f32 %v1888_v9, %v3827_v50  ;;  %v4118_v19 = vsel %vm746_vm8, -1.0, %v5886_v35  ;;  %v4123_v16 = vsel %vm747_vm9, -1.0, %v5886_v35 }
 0x1ab   : > { %v4126_v44 = vand.u32 2147483647, %v4104_v2  ;;  %v4129_v15 = vmul.f32 %v1890_v28, %v3886_v39  ;;  %v1744_v25 = vmul.f32 %v3103_v41, %v1494_v36  ;;  %v1547_v50 = vsub.f32 0.0, %v4064_v17 }
 0x1ac   : > { %v1246_v55 = vadd.f32 1.4214138, %v1196_v47  ;;  %v3105_v12 = vpop.eup %3104  ;;  %v1445_v1 = vadd.f32 0.2548296, %v1395_v34  ;;  %v4134_v45 = vmul.f32 0.70710677, %v4110_v20  ;;  %v4138_v14 = vadd.f32 %v3883_v29, %v3786_v8 }
 0x1ad   : > { %5893 = vst [vmem:[#allocation27_spill] sm:$0xff] %v4129_v15  ;;  %v899_v30 = vmul.f32 0.3275911, %v4126_v44  ;;  %v4141_v24 = vmul.f32 %v1891_v33, %v3889_v40  ;;  %v1892_v39 = vadd.f32 1.0, %v1842_v13  ;;  %v1793_v59 = vsub.f32 1.0, %v1743_v53 }
 0x1ae   : > { %3110 = vpow2.f32 %v1656_v7  ;;  %v1296_v54 = vmul.f32 %v4089_v5, %v1246_v55  ;;  %v1548_v58 = vsub.f32 0.0, %v4079_v37  ;;  %v4148_v62 = vand.u32 2147483647, %v4134_v45 }
 0x1af   : > { %v4143_v49 = vpop.eup %3106  ;;  %v949_v26 = vadd.f32 1.0, %v899_v30  ;;  %v1794_v57 = vsub.f32 1.0, %v1744_v25  ;;  %v1597_v48 = vmul.f32 %v1547_v50, %v4064_v17  ;;  %v4153_v40 = vmul.f32 0.5, %v4041_v38  ;;  %v4168_v38 = vpop.f32.mrb[28].mxu0 }
 0x1b0   : > { %v1097_v29 = vmul.f32 1.0614054, %v4143_v49  ;;  %v1495_v52 = vmul.f32 %v4043_v56, %v1445_v1  ;;  %v900_v9 = vmul.f32 0.3275911, %v4148_v62  ;;  %v4158_v41 = vmul.f32 0.70710677, %v4138_v14 }
 0x1b1   : > { %3112 = vrcp.f32 %v949_v26  ;;  %v1843_v36 = vmul.f32 %v1793_v59, %v4004_v42  ;;  %vm748_vm10 = vcmp.lt.f32.partialorder %v4068_v43, 0.0  ;;  %v4166_v17 = vadd.f32 %v3911_v4, %v3784_v6  ;;  %v4191_v59 = vpop.f32.mrb[29].mxu0 }
 0x1b2   : > { %v4160_v28 = vpop.eup %3108  ;;  %v1147_v22 = vadd.f32 -1.4531521, %v1097_v29  ;;  %v1346_v56 = vadd.f32 -0.28449672, %v1296_v54  ;;  %v1598_v34 = vmul.f32 %v1548_v58, %v4079_v37  ;;  %v950_v7 = vadd.f32 1.0, %v900_v9 }
 0x1b3   : > { %v1098_v33 = vmul.f32 1.0614054, %v4160_v28  ;;  %v4173_v13 = vmul.f32 %v1892_v39, %v3904_v63  ;;  %v1844_v42 = vmul.f32 %v1794_v57, %v4037_v51  ;;  %v1658_v47 = vmul.f32 1.442695, %v1597_v48  ;;  %v4197_v57 = vpop.f32.mrb[30].mxu0 }
 0x1b4   : > { %v1197_v53 = vmul.f32 %v4143_v49, %v1147_v22  ;;  %v1745_v25 = vmul.f32 %v3105_v12, %v1495_v52  ;;  %3114 = vrcp.f32 %v950_v7  ;;  %v4178_v4 = vand.u32 2147483647, %v4158_v41 }
 0x1b5   : > { %5894 = vst [vmem:[#allocation28_spill] sm:$0xff] %v4173_v13  ;;  %v1148_v55 = vadd.f32 -1.4531521, %v1098_v33  ;;  %v1893_v50 = vadd.f32 1.0, %v1843_v36  ;;  %v4183_v37 = vsel %vm748_vm10, -1.0, %v5886_v35  ;;  %v1396_v51 = vmul.f32 %v4089_v5, %v1346_v56  ;;  %v4200_v36 = vpop.f32.mrb[31].mxu0 }
 0x1b6   : > { %v1247_v1 = vadd.f32 1.4214138, %v1197_v53  ;;  %v4186_v63 = vmul.f32 0.70710677, %v4166_v17  ;;  %v1660_v12 = vmul.f32 1.442695, %v1598_v34  ;;  %3116 = vpow2.f32 %v1658_v47 }
 0x1b7   : > { %v1198_v30 = vmul.f32 %v4160_v28, %v1148_v55  ;;  %v901_v39 = vmul.f32 0.3275911, %v4178_v4  ;;  %v1894_v58 = vadd.f32 1.0, %v1844_v42  ;;  %v1549_v26 = vsub.f32 0.0, %v4126_v44 }
 0x1b8   : > { %v3111_v54 = vpop.eup %3110  ;;  %v4195_v43 = vand.u32 2147483647, %v4186_v63  ;;  %v1795_v29 = vsub.f32 1.0, %v1745_v25  ;;  %v1297_v48 = vmul.f32 %v4143_v49, %v1247_v1  ;;  %v4203_v22 = vmul.f32 %v1893_v50, %v3954_v60 }
 0x1b9   : > { %v1248_v52 = vadd.f32 1.4214138, %v1198_v30  ;;  %v951_v9 = vadd.f32 1.0, %v901_v39  ;;  %v4206_v56 = vmul.f32 0.5, %v4099_v31  ;;  %vm749_vm11 = vcmp.lt.f32.partialorder %v4104_v2, 0.0  ;;  %v4229_v30 = vpop.f32.mrb[32].mxu0 }
 0x1ba   : > { %v902_v33 = vmul.f32 0.3275911, %v4195_v43  ;;  %v1446_v7 = vadd.f32 0.2548296, %v1396_v51  ;;  %v4215_v53 = vadd.f32 %v3918_v11, %v3786_v8  ;;  %v1599_v31 = vmul.f32 %v1549_v26, %v4126_v44  ;;  %v4241_v39 = vpop.f32.mrb[33].mxu0 }
 0x1bb   : > { %v4210_v34 = vpop.eup %3112  ;;  %v1298_v42 = vmul.f32 %v4160_v28, %v1248_v52  ;;  %3118 = vrcp.f32 %v951_v9  ;;  %v4220_v2 = vmul.f32 %v1894_v58, %v3969_v61  ;;  %v1845_v25 = vmul.f32 %v1795_v29, %v4073_v18  ;;  %5896 = vst [vmem:[#allocation30_spill] sm:$0xff] %v4241_v39 }
 0x1bc   : > { %3120 = vpow2.f32 %v1660_v12  ;;  %v1099_v60 = vmul.f32 1.0614054, %v4210_v34  ;;  %v952_v47 = vadd.f32 1.0, %v902_v33  ;;  %v1347_v55 = vadd.f32 -0.28449672, %v1297_v48  ;;  %v4246_v48 = vpop.f32.mrb[34].mxu0 }
 0x1bd   : > { %5895 = vst [vmem:[#allocation29_spill] sm:$0xff] %v4220_v2  ;;  %v4224_v50 = vsel %vm749_vm11, -1.0, %v5886_v35  ;;  %v1348_v1 = vadd.f32 -0.28449672, %v1298_v42  ;;  %v4227_v11 = vmul.f32 0.5, %v4110_v20  ;;  %v1496_v44 = vmul.f32 %v4089_v5, %v1446_v7  ;;  %5897 = vst [vmem:[#allocation31_spill] sm:$0xff] %v4246_v48 }
 0x1be   : > { %v1149_v51 = vadd.f32 -1.4531521, %v1099_v60  ;;  %3122 = vrcp.f32 %v952_v47  ;;  %v4231_v12 = vpop.eup %3114  ;;  %vm750_vm12 = vcmp.lt.f32.partialorder %v4134_v45, 0.0  ;;  %v4236_v61 = vmul.f32 0.5, %v4138_v14  ;;  %v4253_v9 = vpop.f32.mrb[35].mxu0 }
 0x1bf   : > { %v4239_v18 = vmul.f32 0.70710677, %v4215_v53  ;;  %v1662_v58 = vmul.f32 1.442695, %v1599_v31  ;;  %v1100_v26 = vmul.f32 1.0614054, %v4231_v12  ;;  %v1397_v52 = vmul.f32 %v4143_v49, %v1347_v55 }
 0x1c0   : > { %v1199_v20 = vmul.f32 %v4210_v34, %v1149_v51  ;;  %v1550_v29 = vsub.f32 0.0, %v4148_v62  ;;  %v1895_v5 = vadd.f32 1.0, %v1845_v25  ;;  %vm751_vm13 = vcmp.lt.f32.partialorder %v4158_v41, 0.0  ;;  %5898 = vst [vmem:[#allocation32_spill] sm:$0xff] %v4253_v9  ;;  %v3117_v33 = vpop.eup %3116 }
 0x1c1   : > { %v4251_v14 = vand.u32 2147483647, %v4239_v18  ;;  %v1398_v7 = vmul.f32 %v4160_v28, %v1348_v1  ;;  %v1150_v60 = vadd.f32 -1.4531521, %v1100_v26  ;;  %v1551_v31 = vsub.f32 0.0, %v4178_v4 }
 0x1c2   : > { %v1249_v42 = vadd.f32 1.4214138, %v1199_v20  ;;  %v1746_v47 = vmul.f32 %v3111_v54, %v1496_v44  ;;  %v4260_v25 = vsel %vm750_vm12, -1.0, %v5886_v35  ;;  %v4265_v51 = vadd.f32 %v3928_v27, %v3784_v6 }
 0x1c3   : > { %v903_v55 = vmul.f32 0.3275911, %v4251_v14  ;;  %3124 = vpow2.f32 %v1662_v58  ;;  %v1200_v1 = vmul.f32 %v4231_v12, %v1150_v60  ;;  %v1600_v20 = vmul.f32 %v1550_v29, %v4148_v62 }
 0x1c4   : > { %v1299_v2 = vmul.f32 %v4210_v34, %v1249_v42  ;;  %v4273_v54 = vmul.f32 %v1895_v5, %v4054_v3  ;;  %v1447_v45 = vadd.f32 0.2548296, %v1397_v52  ;;  %v4278_v44 = vsel %vm751_vm13, -1.0, %v5886_v35  ;;  %v4285_v5 = vpop.f32.mrb[36].mxu0 }
 0x1c5   : > { %v4270_v26 = vpop.eup %3118  ;;  %v953_v27 = vadd.f32 1.0, %v903_v55  ;;  %v1448_v48 = vadd.f32 0.2548296, %v1398_v7  ;;  %v1250_v42 = vadd.f32 1.4214138, %v1200_v1  ;;  %v1601_v60 = vmul.f32 %v1551_v31, %v4178_v4  ;;  %5900 = vst [vmem:[#allocation34_spill] sm:$0xff] %v4285_v5 }
 0x1c6   : > { %5899 = vst [vmem:[#allocation33_spill] sm:$0xff] %v4273_v54  ;;  %v3121_v9 = vpop.eup %3120  ;;  %v1101_v58 = vmul.f32 1.0614054, %v4270_v26  ;;  %v1796_v62 = vsub.f32 1.0, %v1746_v47  ;;  %v1349_v29 = vadd.f32 -0.28449672, %v1299_v2  ;;  %v4293_v1 = vadd.f32 %v3956_v0, %v3786_v8 }
 0x1c7   : > { %3126 = vrcp.f32 %v953_v27  ;;  %v4283_v3 = vmul.f32 0.70710677, %v4265_v51  ;;  %v1300_v41 = vmul.f32 %v4231_v12, %v1250_v42  ;;  %v1552_v7 = vsub.f32 0.0, %v4195_v43 }
 0x1c8   : > { %v4287_v52 = vpop.eup %3122  ;;  %v1151_v55 = vadd.f32 -1.4531521, %v1101_v58  ;;  %v1497_v4 = vmul.f32 %v4143_v49, %v1447_v45  ;;  %v1664_v2 = vmul.f32 1.442695, %v1600_v20  ;;  %v4297_v31 = vmul.f32 0.5, %v4166_v17 }
 0x1c9   : > { %v1102_v47 = vmul.f32 1.0614054, %v4287_v52  ;;  %v1350_v27 = vadd.f32 -0.28449672, %v1300_v41  ;;  %v1666_v54 = vmul.f32 1.442695, %v1601_v60  ;;  %v1498_v42 = vmul.f32 %v4160_v28, %v1448_v48 }
 0x1ca   : > { %v1201_v5 = vmul.f32 %v4270_v26, %v1151_v55  ;;  %vm752_vm14 = vcmp.lt.f32.partialorder %v4186_v63, 0.0  ;;  %v1399_v58 = vmul.f32 %v4210_v34, %v1349_v29  ;;  %v4305_v39 = vand.u32 2147483647, %v4283_v3  ;;  %v4312_v41 = vpop.f32.mrb[37].mxu0 }
 0x1cb   : > { %v1152_v0 = vadd.f32 -1.4531521, %v1102_v47  ;;  %v1846_v49 = vmul.f32 %v1796_v62, %v4118_v19  ;;  %v1602_v20 = vmul.f32 %v1552_v7, %v4195_v43  ;;  %v4310_v45 = vmul.f32 0.70710677, %v4293_v1  ;;  %5901 = vst [vmem:[#allocation35_spill] sm:$0xff] %v4312_v41  ;;  %v4330_v13 = vpop.f32.mrb[38].mxu0 }
 0x1cc   : > { %v1251_v17 = vadd.f32 1.4214138, %v1201_v5  ;;  %v1747_v60 = vmul.f32 %v3117_v33, %v1497_v4  ;;  %v1400_v55 = vmul.f32 %v4231_v12, %v1350_v27  ;;  %v904_v48 = vmul.f32 0.3275911, %v4305_v39  ;;  %5902 = vst [vmem:[#allocation36_spill] sm:$0xff] %v4330_v13 }
 0x1cd   : > { %v1202_v28 = vmul.f32 %v4287_v52, %v1152_v0  ;;  %v3125_v29 = vpop.eup %3124  ;;  %3128 = vpow2.f32 %v1664_v2  ;;  %v4321_v19 = vsel %vm752_vm14, -1.0, %v5886_v35  ;;  %v1553_v43 = vsub.f32 0.0, %v4251_v14 }
 0x1ce   : > { %v1301_v47 = vmul.f32 %v4270_v26, %v1251_v17  ;;  %v1748_v62 = vmul.f32 %v3121_v9, %v1498_v42  ;;  %v1449_v5 = vadd.f32 0.2548296, %v1399_v58  ;;  %v954_v7 = vadd.f32 1.0, %v904_v48 }
 0x1cf   : > { %v1252_v33 = vadd.f32 1.4214138, %v1202_v28  ;;  %v1896_v4 = vadd.f32 1.0, %v1846_v49  ;;  %3130 = vpow2.f32 %v1666_v54  ;;  %v1668_v27 = vmul.f32 1.442695, %v1602_v20 }
 0x1d0   : > { %v4325_v0 = vand.u32 2147483647, %v4310_v45  ;;  %v1797_v17 = vsub.f32 1.0, %v1747_v60  ;;  %v1450_v41 = vadd.f32 0.2548296, %v1400_v55  ;;  %3132 = vrcp.f32 %v954_v7 }
 0x1d1   : > { %v4327_v2 = vpop.eup %3126  ;;  %v1302_v63 = vmul.f32 %v4287_v52, %v1252_v33  ;;  %v1351_v15 = vadd.f32 -0.28449672, %v1301_v47  ;;  %v4333_v9 = vmul.f32 0.5, %v4215_v53  ;;  %v1603_v54 = vmul.f32 %v1553_v43, %v4251_v14 }
 0x1d2   : > { %v1103_v42 = vmul.f32 1.0614054, %v4327_v2  ;;  %v1798_v58 = vsub.f32 1.0, %v1748_v62  ;;  %v1499_v49 = vmul.f32 %v4210_v34, %v1449_v5  ;;  %v905_v20 = vmul.f32 0.3275911, %v4325_v0 }
 0x1d3   : > { %v4341_v60 = vadd.f32 %v3971_v21, %v3784_v6  ;;  %v4344_v55 = vmul.f32 %v1896_v4, %v4058_v46  ;;  %3134 = vpow2.f32 %v1668_v27  ;;  %vm753_vm15 = vcmp.lt.f32.partialorder %v4239_v18, 0.0 }
 0x1d4   : > { %v1153_v53 = vadd.f32 -1.4531521, %v1103_v42  ;;  %v1847_v28 = vmul.f32 %v1797_v17, %v4123_v16  ;;  %v1500_v14 = vmul.f32 %v4231_v12, %v1450_v41  ;;  %v1352_v48 = vadd.f32 -0.28449672, %v1302_v63 }
 0x1d5   : > { %5903 = vst [vmem:[#allocation37_spill] sm:$0xff] %v4344_v55  ;;  %v955_v47 = vadd.f32 1.0, %v905_v20  ;;  %v1401_v34 = vmul.f32 %v4270_v26, %v1351_v15  ;;  %v1670_v62 = vmul.f32 1.442695, %v1603_v54  ;;  %vm754_vm0 = vcmp.lt.f32.partialorder %v4283_v3, 0.0  ;;  %v5904_v15 = vld [vmem:[#allocation18_spill] sm:$0xff] }
 0x1d6   : > { %v1203_v43 = vmul.f32 %v4327_v2, %v1153_v53  ;;  %v1848_v21 = vmul.f32 %v1798_v58, %v4183_v37  ;;  %v1749_v46 = vmul.f32 %v3125_v29, %v1499_v49  ;;  %v4354_v18 = vmul.f32 0.70710677, %v4341_v60  ;;  %v4376_v54 = vpop.f32.mrb[39].mxu0 }
 0x1d7   : > { %3136 = vrcp.f32 %v955_v47  ;;  %v3129_v5 = vpop.eup %3128  ;;  %v4357_v16 = vsel %vm753_vm15, -1.0, %v5886_v35  ;;  %v1554_v41 = vsub.f32 0.0, %v4305_v39  ;;  %v4362_v33 = vadd.f32 %v5904_v15, %v3786_v8  ;;  %5905 = vst [vmem:[#allocation18_spill] sm:$0xff] %v4376_v54 }
 0x1d8   : > { %v1253_v12 = vadd.f32 1.4214138, %v1203_v43  ;;  %v1750_v7 = vmul.f32 %v3129_v5, %v1500_v14  ;;  %v1402_v4 = vmul.f32 %v4287_v52, %v1352_v48  ;;  %v4366_v37 = vmul.f32 0.5, %v4265_v51 }
 0x1d9   : > { %v4369_v29 = vand.u32 2147483647, %v4354_v18  ;;  %v3131_v27 = vpop.eup %3130  ;;  %v1897_v17 = vadd.f32 1.0, %v1847_v28  ;;  %v1451_v63 = vadd.f32 0.2548296, %v1401_v34  ;;  %3138 = vpow2.f32 %v1670_v62  ;;  %v5906_v62 = vld [vmem:[#allocation19_spill] sm:$0xff] }
 0x1da   : > { %v4374_v42 = vsel %vm754_vm0, -1.0, %v5886_v35  ;;  %v4378_v58 = vpop.eup %3132  ;;  %v1898_v49 = vadd.f32 1.0, %v1848_v21  ;;  %v1799_v20 = vsub.f32 1.0, %v1749_v46  ;;  %v1303_v51 = vmul.f32 %v4327_v2, %v1253_v12 }
 0x1db   : > { %v906_v53 = vmul.f32 0.3275911, %v4369_v29  ;;  %v1104_v14 = vmul.f32 1.0614054, %v4378_v58  ;;  %v1604_v28 = vmul.f32 %v1554_v41, %v4305_v39  ;;  %v1555_v48 = vsub.f32 0.0, %v4325_v0 }
 0x1dc   : > { %v4386_v3 = vmul.f32 0.70710677, %v4362_v33  ;;  %v1800_v47 = vsub.f32 1.0, %v1750_v7  ;;  %v1452_v34 = vadd.f32 0.2548296, %v1402_v4  ;;  %v4390_v21 = vadd.f32 %v5906_v62, %v3784_v6 }
 0x1dd   : > { %v956_v43 = vadd.f32 1.0, %v906_v53  ;;  %v3135_v46 = vpop.eup %3134  ;;  %v4393_v5 = vmul.f32 %v1897_v17, %v4082_v10  ;;  %v1501_v12 = vmul.f32 %v4270_v26, %v1451_v63  ;;  %v1154_v15 = vadd.f32 -1.4531521, %v1104_v14 }
 0x1de   : > { %v4397_v39 = vmul.f32 0.5, %v4293_v1  ;;  %v4400_v41 = vmul.f32 %v1898_v49, %v4153_v40  ;;  %v1849_v7 = vmul.f32 %v1799_v20, %v4224_v50  ;;  %v1353_v4 = vadd.f32 -0.28449672, %v1303_v51 }
 0x1df   : > { %5907 = vst [vmem:[#allocation19_spill] sm:$0xff] %v4393_v5  ;;  %3140 = vrcp.f32 %v956_v43  ;;  %v1204_v53 = vmul.f32 %v4378_v58, %v1154_v15  ;;  %vm755_vm1 = vcmp.lt.f32.partialorder %v4310_v45, 0.0  ;;  %v1605_v10 = vmul.f32 %v1555_v48, %v4325_v0 }
 0x1e0   : > { %5908 = vst [vmem:[#allocation38_spill] sm:$0xff] %v4400_v41  ;;  %v4407_v17 = vand.u32 2147483647, %v4386_v3  ;;  %v1850_v1 = vmul.f32 %v1800_v47, %v4260_v25  ;;  %v1502_v40 = vmul.f32 %v4287_v52, %v1452_v34  ;;  %v1672_v63 = vmul.f32 1.442695, %v1604_v28  ;;  %v4425_v52 = vpop.f32.mrb[40].mxu0 }
 0x1e1   : > { %v4409_v26 = vpop.eup %3136  ;;  %v4414_v50 = vmul.f32 0.70710677, %v4390_v21  ;;  %v1751_v49 = vmul.f32 %v3131_v27, %v1501_v12  ;;  %v1254_v20 = vadd.f32 1.4214138, %v1204_v53  ;;  %v1899_v0 = vadd.f32 1.0, %v1849_v7  ;;  %5909 = vst [vmem:[#allocation39_spill] sm:$0xff] %v4425_v52 }
 0x1e2   : > { %v1105_v51 = vmul.f32 1.0614054, %v4409_v26  ;;  %v907_v45 = vmul.f32 0.3275911, %v4407_v17  ;;  %v1403_v14 = vmul.f32 %v4327_v2, %v1353_v4  ;;  %v4420_v48 = vsel %vm755_vm1, -1.0, %v5886_v35 }
 0x1e3   : > { %v4423_v25 = vand.u32 2147483647, %v4414_v50  ;;  %v3139_v28 = vpop.eup %3138  ;;  %v1304_v47 = vmul.f32 %v4378_v58, %v1254_v20  ;;  %v1674_v34 = vmul.f32 1.442695, %v1605_v10  ;;  %v1900_v62 = vadd.f32 1.0, %v1850_v1  ;;  %v5910_v20 = vld [vmem:[#allocation20_spill] sm:$0xff] }
 0x1e4   : > { %v1155_v27 = vadd.f32 -1.4531521, %v1105_v51  ;;  %v957_v43 = vadd.f32 1.0, %v907_v45  ;;  %v1752_v12 = vmul.f32 %v3135_v46, %v1502_v40  ;;  %3142 = vpow2.f32 %v1672_v63 }
 0x1e5   : > { %v908_v15 = vmul.f32 0.3275911, %v4423_v25  ;;  %v1801_v7 = vsub.f32 1.0, %v1751_v49  ;;  %v4431_v53 = vmul.f32 0.5, %v4341_v60  ;;  %v1453_v41 = vadd.f32 0.2548296, %v1403_v14 }
 0x1e6   : > { %v1205_v4 = vmul.f32 %v4409_v26, %v1155_v27  ;;  %3144 = vrcp.f32 %v957_v43  ;;  %v1354_v52 = vadd.f32 -0.28449672, %v1304_v47  ;;  %v4435_v51 = vadd.f32 %v5910_v20, %v3786_v8  ;;  %v5913_v14 = vld [vmem:[#allocation21_spill] sm:$0xff] }
 0x1e7   : > { %v958_v54 = vadd.f32 1.0, %v908_v15  ;;  %v4438_v10 = vmul.f32 %v1899_v0, %v4206_v56  ;;  %3146 = vpow2.f32 %v1674_v34  ;;  %v1556_v1 = vsub.f32 0.0, %v4369_v29 }
 0x1e8   : > { %v1255_v46 = vadd.f32 1.4214138, %v1205_v4  ;;  %v4444_v60 = vmul.f32 %v1900_v62, %v4227_v11  ;;  %v1802_v63 = vsub.f32 1.0, %v1752_v12  ;;  %vm756_vm2 = vcmp.lt.f32.partialorder %v4354_v18, 0.0 }
 0x1e9   : > { %5911 = vst [vmem:[#allocation20_spill] sm:$0xff] %v4438_v10  ;;  %v4441_v40 = vpop.eup %3140  ;;  %v4448_v49 = vmul.f32 0.70710677, %v4435_v51  ;;  %v1851_v45 = vmul.f32 %v1801_v7, %v4278_v44  ;;  %v4455_v47 = vadd.f32 %v5913_v14, %v3784_v6  ;;  %v1503_v27 = vmul.f32 %v4327_v2, %v1453_v41 }
 0x1ea   : > { %5912 = vst [vmem:[#allocation40_spill] sm:$0xff] %v4444_v60  ;;  %v1305_v56 = vmul.f32 %v4409_v26, %v1255_v46  ;;  %v1106_v0 = vmul.f32 1.0614054, %v4441_v40  ;;  %v1404_v11 = vmul.f32 %v4378_v58, %v1354_v52  ;;  %3148 = vrcp.f32 %v958_v54  ;;  %v4478_v52 = vpop.f32.mrb[41].mxu0 }
 0x1eb   : > { %v4460_v18 = vand.u32 2147483647, %v4448_v49  ;;  %v1606_v44 = vmul.f32 %v1556_v1, %v4369_v29  ;;  %v1557_v62 = vsub.f32 0.0, %v4407_v17  ;;  %v1852_v12 = vmul.f32 %v1802_v63, %v4321_v19  ;;  %5914 = vst [vmem:[#allocation21_spill] sm:$0xff] %v4478_v52  ;;  %v4484_v63 = vpop.f32.mrb[42].mxu0 }
 0x1ec   : > { %v1355_v34 = vadd.f32 -0.28449672, %v1305_v56  ;;  %v1156_v43 = vadd.f32 -1.4531521, %v1106_v0  ;;  %v4466_v15 = vsel %vm756_vm2, -1.0, %v5886_v35  ;;  %v4469_v7 = vmul.f32 0.5, %v4362_v33 }
 0x1ed   : > { %v909_v2 = vmul.f32 0.3275911, %v4460_v18  ;;  %vm757_vm3 = vcmp.lt.f32.partialorder %v4386_v3, 0.0  ;;  %v4476_v29 = vmul.f32 0.70710677, %v4455_v47  ;;  %v1753_v4 = vmul.f32 %v3139_v28, %v1503_v27  ;;  %v5915_v33 = vld [vmem:[#allocation22_spill] sm:$0xff] }
 0x1ee   : > { %v1405_v54 = vmul.f32 %v4409_v26, %v1355_v34  ;;  %v1206_v41 = vmul.f32 %v4441_v40, %v1156_v43  ;;  %v3143_v19 = vpop.eup %3142  ;;  %v1454_v20 = vadd.f32 0.2548296, %v1404_v11  ;;  %v4482_v1 = vadd.f32 %v5915_v33, %v3786_v8  ;;  %5916 = vst [vmem:[#allocation22_spill] sm:$0xff] %v4484_v63  ;;  %v4493_v27 = vpop.f32.mrb[43].mxu0 }
 0x1ef   : > { %v959_v46 = vadd.f32 1.0, %v909_v2  ;;  %v1901_v0 = vadd.f32 1.0, %v1851_v45  ;;  %v1676_v3 = vmul.f32 1.442695, %v1606_v44  ;;  %v1607_v34 = vmul.f32 %v1557_v62, %v4407_v17  ;;  %5917 = vst [vmem:[#allocation41_spill] sm:$0xff] %v4493_v27 }
 0x1f0   : > { %v4486_v56 = vpop.eup %3144  ;;  %v1256_v14 = vadd.f32 1.4214138, %v1206_v41  ;;  %v1902_v43 = vadd.f32 1.0, %v1852_v12  ;;  %v4490_v52 = vsel %vm757_vm3, -1.0, %v5886_v35  ;;  %v1455_v2 = vadd.f32 0.2548296, %v1405_v54 }
 0x1f1   : > { %v1107_v28 = vmul.f32 1.0614054, %v4486_v56  ;;  %3150 = vrcp.f32 %v959_v46  ;;  %v3147_v11 = vpop.eup %3146  ;;  %v1558_v63 = vsub.f32 0.0, %v4423_v25  ;;  %v4498_v45 = vand.u32 2147483647, %v4476_v29 }
 0x1f2   : > { %v1306_v33 = vmul.f32 %v4441_v40, %v1256_v14  ;;  %v1803_v44 = vsub.f32 1.0, %v1753_v4  ;;  %v1504_v17 = vmul.f32 %v4378_v58, %v1454_v20  ;;  %v4502_v12 = vmul.f32 0.70710677, %v4482_v1 }
 0x1f3   : > { %v1157_v62 = vadd.f32 -1.4531521, %v1107_v28  ;;  %v4505_v41 = vmul.f32 %v1901_v0, %v4236_v61  ;;  %v1678_v27 = vmul.f32 1.442695, %v1607_v34  ;;  %v910_v54 = vmul.f32 0.3275911, %v4498_v45 }
 0x1f4   : > { %v1356_v46 = vadd.f32 -0.28449672, %v1306_v33  ;;  %v4508_v14 = vpop.eup %3148  ;;  %3152 = vpow2.f32 %v1676_v3  ;;  %v4512_v4 = vmul.f32 0.5, %v4390_v21  ;;  %v861_v58 = vand.u32 2147483647, %v4502_v12 }
 0x1f5   : > { %5918 = vst [vmem:[#allocation42_spill] sm:$0xff] %v4505_v41  ;;  %v1207_v60 = vmul.f32 %v4486_v56, %v1157_v62  ;;  %v1505_v20 = vmul.f32 %v4409_v26, %v1455_v2  ;;  %vm758_vm4 = vcmp.lt.f32.partialorder %v4414_v50, 0.0  ;;  %v1108_v61 = vmul.f32 1.0614054, %v4508_v14  ;;  %v5920_v50 = vld [vmem:[#allocation24_spill] sm:$0xff] }
 0x1f6   : > { %v1559_v0 = vsub.f32 0.0, %v4460_v18  ;;  %v1754_v34 = vmul.f32 %v3143_v19, %v1504_v17  ;;  %v1406_v28 = vmul.f32 %v4441_v40, %v1356_v46  ;;  %v1608_v3 = vmul.f32 %v1558_v63, %v4423_v25 }
 0x1f7   : > { %v960_v33 = vadd.f32 1.0, %v910_v54  ;;  %v1853_v62 = vmul.f32 %v1803_v44, %v4357_v16  ;;  %v1257_v21 = vadd.f32 1.4214138, %v1207_v60  ;;  %3154 = vpow2.f32 %v1678_v27 }
 0x1f8   : > { %v911_v41 = vmul.f32 0.3275911, %v861_v58  ;;  %v4523_v10 = vmul.f32 %v1902_v43, %v4297_v31  ;;  %v4526_v26 = vsel %vm758_vm4, -1.0, %v5886_v35  ;;  %v4530_v19 = vadd.f32 %v5920_v50, %v3784_v6 }
 0x1f9   : > { %3156 = vrcp.f32 %v960_v33  ;;  %v1755_v2 = vmul.f32 %v3147_v11, %v1505_v20  ;;  %v1158_v17 = vadd.f32 -1.4531521, %v1108_v61  ;;  %v1609_v25 = vmul.f32 %v1559_v0, %v4460_v18  ;;  %v4541_v11 = vpop.f32.mrb[44].mxu0 }
 0x1fa   : > { %5919 = vst [vmem:[#allocation43_spill] sm:$0xff] %v4523_v10  ;;  %v961_v63 = vadd.f32 1.0, %v911_v41  ;;  %v1804_v60 = vsub.f32 1.0, %v1754_v34  ;;  %v1456_v27 = vadd.f32 0.2548296, %v1406_v28  ;;  %v4536_v31 = vmul.f32 0.5, %v4435_v51 }
 0x1fb   : > { %v4533_v16 = vpop.eup %3150  ;;  %v1680_v44 = vmul.f32 1.442695, %v1608_v3  ;;  %v1903_v43 = vadd.f32 1.0, %v1853_v62  ;;  %v1307_v46 = vmul.f32 %v4486_v56, %v1257_v21  ;;  %vm759_vm5 = vcmp.lt.f32.partialorder %v4448_v49, 0.0  ;;  %5921 = vst [vmem:[#allocation24_spill] sm:$0xff] %v4541_v11 }
 0x1fc   : > { %v1109_v54 = vmul.f32 1.0614054, %v4533_v16  ;;  %v4544_v18 = vmul.f32 0.5, %v4455_v47  ;;  %v1560_v41 = vsub.f32 0.0, %v4498_v45  ;;  %3158 = vrcp.f32 %v961_v63  ;;  %v5922_v47 = vld [vmem:[#allocation26_spill] sm:$0xff] }
 0x1fd   : > { %v4548_v20 = vmul.f32 0.70710677, %v4530_v19  ;;  %v1805_v51 = vsub.f32 1.0, %v1755_v2  ;;  %v1208_v61 = vmul.f32 %v4508_v14, %v1158_v17  ;;  %v1682_v0 = vmul.f32 1.442695, %v1609_v25 }
 0x1fe   : > { %v1561_v34 = vsub.f32 0.0, %v861_v58  ;;  %v3153_v28 = vpop.eup %3152  ;;  %v1854_v3 = vmul.f32 %v1804_v60, %v4374_v42  ;;  %v1506_v33 = vmul.f32 %v4441_v40, %v1456_v27  ;;  %v4558_v21 = vadd.f32 %v5922_v47, %v3786_v8 }
 0x1ff   : > { %v4554_v62 = vand.u32 2147483647, %v4548_v20  ;;  %v4561_v50 = vmul.f32 %v1903_v43, %v4333_v9  ;;  %v1357_v2 = vadd.f32 -0.28449672, %v1307_v46  ;;  %3160 = vpow2.f32 %v1680_v44  ;;  %v4574_v44 = vpop.f32.mrb[45].mxu0 }
 0x200   : > { %v1159_v17 = vadd.f32 -1.4531521, %v1109_v54  ;;  %v4566_v25 = vsel %vm759_vm5, -1.0, %v5886_v35  ;;  %vm760_vm6 = vcmp.lt.f32.partialorder %v4476_v29, 0.0  ;;  %v1610_v42 = vmul.f32 %v1560_v41, %v4498_v45  ;;  %5924 = vst [vmem:[#allocation44_spill] sm:$0xff] %v4574_v44 }
 0x201   : > { %5923 = vst [vmem:[#allocation26_spill] sm:$0xff] %v4561_v50  ;;  %v912_v40 = vmul.f32 0.3275911, %v4554_v62  ;;  %v4571_v63 = vpop.eup %3154  ;;  %v1855_v60 = vmul.f32 %v1805_v51, %v4420_v48  ;;  %v1258_v9 = vadd.f32 1.4214138, %v1208_v61  ;;  %3162 = vpow2.f32 %v1682_v0  ;;  %v5932_v50 = vld [vmem:[#allocation23_spill] sm:$0xff] }
 0x202   : > { %v1611_v27 = vmul.f32 %v1561_v34, %v861_v58  ;;  %v1904_v49 = vadd.f32 1.0, %v1854_v3  ;;  %v1756_v46 = vmul.f32 %v3153_v28, %v1506_v33  ;;  %v4579_v47 = vmul.f32 0.70710677, %v4558_v21 }
 0x203   : > { %v4576_v43 = vpop.eup %3156  ;;  %v962_v54 = vadd.f32 1.0, %v912_v40  ;;  %v1407_v45 = vmul.f32 %v4486_v56, %v1357_v2  ;;  %v1209_v41 = vmul.f32 %v4533_v16, %v1159_v17  ;;  %vm761_vm7 = vcmp.lt.f32.partialorder %v4502_v12, 0.0  ;;  %v5928_v17 = vld [vmem:[#allocation12_spill] sm:$0xff] }
 0x204   : > { %v1110_v10 = vmul.f32 1.0614054, %v4576_v43  ;;  %v4588_v48 = vsel %vm760_vm6, -1.0, %v5886_v35  ;;  %v1684_v58 = vmul.f32 1.442695, %v1610_v42  ;;  %v4591_v51 = vmul.f32 0.5, %v4482_v1 }
 0x205   : > { %3164 = vrcp.f32 %v962_v54  ;;  %v1905_v61 = vadd.f32 1.0, %v1855_v60  ;;  %v1308_v0 = vmul.f32 %v4508_v14, %v1258_v9  ;;  %v1686_v28 = vmul.f32 1.442695, %v1611_v27  ;;  %v4605_v1 = vpop.f32.mrb[46].mxu0  ;;  %v5930_v27 = vld [vmem:[#allocation16_spill] sm:$0xff] }
 0x206   : > { %5925 = vst [vmem:[#allocation45_spill] sm:$0xff] %v4591_v51  ;;  %v1160_v34 = vadd.f32 -1.4531521, %v1110_v10  ;;  %v4594_v3 = vpop.eup %3158  ;;  %v4597_v33 = vmul.f32 %v1904_v49, %v4366_v37  ;;  %v1806_v12 = vsub.f32 1.0, %v1756_v46  ;;  %v4600_v29 = vsel %vm761_vm7, -1.0, %v5886_v35  ;;  %5927 = vst [vmem:[#allocation47_spill] sm:$0xff] %v4605_v1 }
 0x207   : > { %v4603_v2 = vand.u32 2147483647, %v4579_v47  ;;  %vm737_vm8 = vcmp.lt.f32.partialorder %v5928_v17, 0.0  ;;  %v1457_v42 = vadd.f32 0.2548296, %v1407_v45  ;;  %3166 = vpow2.f32 %v1684_v58 }
 0x208   : > { %5926 = vst [vmem:[#allocation46_spill] sm:$0xff] %v4597_v33  ;;  %v1259_v40 = vadd.f32 1.4214138, %v1209_v41  ;;  %v1210_v10 = vmul.f32 %v4576_v43, %v1160_v34  ;;  %v1111_v60 = vmul.f32 1.0614054, %v4594_v3  ;;  %v4611_v37 = vmul.f32 0.5, %v4530_v19 }
 0x209   : > { %v913_v9 = vmul.f32 0.3275911, %v4603_v2  ;;  %v1087_v49 = vmul.f32 1.0614054, %v5930_v27  ;;  %v4615_v46 = vpop.eup %3160  ;;  %v4618_v54 = vmul.f32 %v1905_v61, %v4397_v39  ;;  %v1358_v1 = vadd.f32 -0.28449672, %v1308_v0 }
 0x20a   : > { %5929 = vst [vmem:[#allocation12_spill] sm:$0xff] %v4611_v37  ;;  %v1260_v45 = vadd.f32 1.4214138, %v1210_v10  ;;  %3168 = vpow2.f32 %v1686_v28  ;;  %v1856_v41 = vmul.f32 %v1806_v12, %v4466_v15  ;;  %v1161_v34 = vadd.f32 -1.4531521, %v1111_v60 }
 0x20b   : > { %5931 = vst [vmem:[#allocation16_spill] sm:$0xff] %v4618_v54  ;;  %vm762_vm9 = vcmp.lt.f32.partialorder %v4548_v20, 0.0  ;;  %v963_v58 = vadd.f32 1.0, %v913_v9  ;;  %v4622_v19 = vpop.eup %3162  ;;  %v1507_v44 = vmul.f32 %v4486_v56, %v1457_v42  ;;  %v1309_v33 = vmul.f32 %v4533_v16, %v1259_v40 }
 0x20c   : > { %v1310_v11 = vmul.f32 %v4576_v43, %v1260_v45  ;;  %v1089_v39 = vmul.f32 1.0614054, %v5932_v50  ;;  %v1211_v61 = vmul.f32 %v4594_v3, %v1161_v34  ;;  %v1137_v0 = vadd.f32 -1.4531521, %v1087_v49 }
 0x20d   : > { %3170 = vrcp.f32 %v963_v58  ;;  %v4631_v15 = vadd.f32 %v4168_v38, %v3784_v6  ;;  %v1408_v20 = vmul.f32 %v4508_v14, %v1358_v1  ;;  %v4635_v28 = vsel %vm762_vm9, -1.0, %v5886_v35  ;;  %v4646_v38 = vpop.f32.mrb[47].mxu0 }
 0x20e   : > { %v1562_v56 = vsub.f32 0.0, %v4554_v62  ;;  %v1139_v12 = vadd.f32 -1.4531521, %v1089_v39  ;;  %v4640_v40 = vadd.f32 1.0, %v1856_v41  ;;  %v1261_v10 = vadd.f32 1.4214138, %v1211_v61 }
 0x20f   : > { %v4638_v42 = vpop.eup %3164  ;;  %v4643_v60 = vmul.f32 0.5, %v4558_v21  ;;  %v1187_v9 = vmul.f32 %v5930_v27, %v1137_v0  ;;  %5934 = vst [vmem:[#allocation48_spill] sm:$0xff] %v4646_v38  ;;  %v1757_v1 = vmul.f32 %v4571_v63, %v1507_v44  ;;  %v1359_v49 = vadd.f32 -0.28449672, %v1309_v33  ;;  %v5935_v44 = vld [vmem:[#allocation13_spill] sm:$0xff] }
 0x210   : > { %v1360_v45 = vadd.f32 -0.28449672, %v1310_v11  ;;  %v1112_v34 = vmul.f32 1.0614054, %v4638_v42  ;;  %v1311_v58 = vmul.f32 %v4594_v3, %v1261_v10  ;;  %v1189_v39 = vmul.f32 %v5932_v50, %v1139_v12 }
 0x211   : > { %5933 = vst [vmem:[#allocation23_spill] sm:$0xff] %v4643_v60  ;;  %v1237_v41 = vadd.f32 1.4214138, %v1187_v9  ;;  %v4653_v61 = vmul.f32 0.70710677, %v4631_v15  ;;  %v1612_v0 = vmul.f32 %v1562_v56, %v4554_v62  ;;  %v3167_v63 = vpop.eup %3166  ;;  %vm739_vm10 = vcmp.lt.f32.partialorder %v5935_v44, 0.0 }
 0x212   : > { %v1458_v21 = vadd.f32 0.2548296, %v1408_v20  ;;  %v1162_v54 = vadd.f32 -1.4531521, %v1112_v34  ;;  %vm763_vm11 = vcmp.lt.f32.partialorder %v4579_v47, 0.0  ;;  %v787_v11 = vsel %vm737_vm8, -1.0, %v5886_v35 }
 0x213   : > { %v1239_v33 = vadd.f32 1.4214138, %v1189_v39  ;;  %v1287_v12 = vmul.f32 %v5930_v27, %v1237_v41  ;;  %v1807_v20 = vsub.f32 1.0, %v1757_v1  ;;  %v1409_v62 = vmul.f32 %v4533_v16, %v1359_v49 }
 0x214   : > { %v4664_v10 = vpop.eup %3168  ;;  %v1410_v56 = vmul.f32 %v4576_v43, %v1360_v45  ;;  %v1212_v9 = vmul.f32 %v4638_v42, %v1162_v54  ;;  %v1361_v34 = vadd.f32 -0.28449672, %v1311_v58  ;;  %v4671_v55 = vand.u32 2147483647, %v4653_v61 }
 0x215   : > { %v1289_v38 = vmul.f32 %v5932_v50, %v1239_v33  ;;  %v1337_v13 = vadd.f32 -0.28449672, %v1287_v12  ;;  %v1508_v17 = vmul.f32 %v4508_v14, %v1458_v21  ;;  %v1688_v41 = vmul.f32 1.442695, %v1612_v0 }
 0x216   : > { %v1262_v39 = vadd.f32 1.4214138, %v1212_v9  ;;  %v4677_v1 = vsel %vm763_vm11, -1.0, %v5886_v35  ;;  %v1563_v54 = vsub.f32 0.0, %v4603_v2  ;;  %v914_v33 = vmul.f32 0.3275911, %v4671_v55 }
 0x217   : > { %5936 = vst [vmem:[#allocation13_spill] sm:$0xff] %v4677_v1  ;;  %v4679_v49 = vpop.eup %3170  ;;  %v1339_v45 = vadd.f32 -0.28449672, %v1289_v38  ;;  %v1387_v58 = vmul.f32 %v5930_v27, %v1337_v13  ;;  %v1459_v12 = vadd.f32 0.2548296, %v1409_v62  ;;  %v1411_v0 = vmul.f32 %v4594_v3, %v1361_v34 }
 0x218   : > { %v1460_v60 = vadd.f32 0.2548296, %v1410_v56  ;;  %v1312_v14 = vmul.f32 %v4638_v42, %v1262_v39  ;;  %v1113_v21 = vmul.f32 1.0614054, %v4679_v49  ;;  %v964_v5 = vadd.f32 1.0, %v914_v33 }
 0x219   : > { %v1389_v47 = vmul.f32 %v5932_v50, %v1339_v45  ;;  %v1437_v9 = vadd.f32 0.2548296, %v1387_v58  ;;  %v1857_v37 = vmul.f32 %v1807_v20, %v4490_v52  ;;  %v1758_v38 = vmul.f32 %v4615_v46, %v1508_v17  ;;  %v5937_v17 = vld [vmem:[#allocation17_spill] sm:$0xff] }
 0x21a   : > { %v1362_v1 = vadd.f32 -0.28449672, %v1312_v14  ;;  %v1163_v13 = vadd.f32 -1.4531521, %v1113_v21  ;;  %3172 = vrcp.f32 %v964_v5  ;;  %v4693_v56 = vadd.f32 %v4191_v59, %v3786_v8 }
 0x21b   : > { %v1439_v51 = vadd.f32 0.2548296, %v1389_v47  ;;  %v1487_v62 = vmul.f32 %v5930_v27, %v1437_v9  ;;  %v1509_v34 = vmul.f32 %v4533_v16, %v1459_v12  ;;  %v1510_v39 = vmul.f32 %v4576_v43, %v1460_v60  ;;  %v4701_v27 = vpop.f32.mrb[48].mxu0  ;;  %v5938_v60 = vld [vmem:[#allocation25_spill] sm:$0xff] }
 0x21c   : > { %v1213_v45 = vmul.f32 %v4679_v49, %v1163_v13  ;;  %v1613_v52 = vmul.f32 %v1563_v54, %v4603_v2  ;;  %v1461_v20 = vadd.f32 0.2548296, %v1411_v0  ;;  %3174 = vpow2.f32 %v1688_v41  ;;  %v4729_v13 = vpop.f32.mrb[49].mxu0 }
 0x21d   : > { %v1489_v46 = vmul.f32 %v5932_v50, %v1439_v51  ;;  %v1737_v58 = vmul.f32 %v5937_v17, %v1487_v62  ;;  %v1907_v5 = vadd.f32 1.0, %v1857_v37  ;;  %v1412_v59 = vmul.f32 %v4638_v42, %v1362_v1 }
 0x21e   : > { %v1263_v33 = vadd.f32 1.4214138, %v1213_v45  ;;  %v789_v16 = vsel %vm739_vm10, -1.0, %v5886_v35  ;;  %v1808_v43 = vsub.f32 1.0, %v1758_v38  ;;  %v4709_v41 = vmul.f32 0.70710677, %v4693_v56 }
 0x21f   : > { %v1739_v12 = vmul.f32 %v5938_v60, %v1489_v46  ;;  %v1787_v2 = vsub.f32 1.0, %v1737_v58  ;;  %v1759_v50 = vmul.f32 %v4622_v19, %v1509_v34  ;;  %v1760_v51 = vmul.f32 %v3167_v63, %v1510_v39 }
 0x220   : > { %v1313_v54 = vmul.f32 %v4679_v49, %v1263_v33  ;;  %v1690_v37 = vmul.f32 1.442695, %v1613_v52  ;;  %v1511_v1 = vmul.f32 %v4594_v3, %v1461_v20  ;;  %v4716_v44 = vadd.f32 %v4197_v57, %v3784_v6 }
 0x221   : > { %v1789_v14 = vsub.f32 1.0, %v1739_v12  ;;  %v1837_v21 = vmul.f32 %v1787_v2, %v787_v11  ;;  %v4720_v0 = vmul.f32 %v4640_v40, %v4431_v53  ;;  %v1462_v47 = vadd.f32 0.2548296, %v1412_v59  ;;  %v633_v40 = vpop.f32.mrb[50].mxu0  ;;  %v5939_v59 = vld [vmem:[#allocation14_spill] sm:$0xff] }
 0x222   : > { %v1363_v9 = vadd.f32 -0.28449672, %v1313_v54  ;;  %v4723_v19 = vand.u32 2147483647, %v4709_v41  ;;  %v4726_v63 = vmul.f32 %v1907_v5, %v4469_v7  ;;  %v1858_v3 = vmul.f32 %v1808_v43, %v4526_v26  ;;  %v634_v26 = vpop.f32.mrb[51].mxu0 }
 0x223   : > { %v1839_v38 = vmul.f32 %v1789_v14, %v789_v16  ;;  %v1887_v11 = vadd.f32 1.0, %v1837_v21  ;;  %v1809_v57 = vsub.f32 1.0, %v1759_v50  ;;  %v1810_v62 = vsub.f32 1.0, %v1760_v51  ;;  %v5940_v16 = vld [vmem:[#allocation15_spill] sm:$0xff] }
 0x224   : > { %3176 = vpow2.f32 %v1690_v37  ;;  %v915_v53 = vmul.f32 0.3275911, %v4723_v19  ;;  %v4732_v34 = vpop.eup %3172  ;;  %v1761_v39 = vmul.f32 %v4664_v10, %v1511_v1  ;;  %v1564_v7 = vsub.f32 0.0, %v4671_v55 }
 0x225   : > { %v1889_v45 = vadd.f32 1.0, %v1839_v38  ;;  %v4737_v52 = vmul.f32 0.70710677, %v4716_v44  ;;  %v1512_v20 = vmul.f32 %v4638_v42, %v1462_v47  ;;  %v1413_v46 = vmul.f32 %v4679_v49, %v1363_v9 }
 0x226   : > { %v1114_v17 = vmul.f32 1.0614054, %v4732_v34  ;;  %v965_v58 = vadd.f32 1.0, %v915_v53  ;;  %v3175_v5 = vpop.eup %3174  ;;  %v1937_v33 = vmul.f32 %v1887_v11, %v5939_v59  ;;  %v4749_v60 = vadd.f32 %v4200_v36, %v3786_v8 }
 0x227   : > { %v1939_v43 = vmul.f32 %v1889_v45, %v5940_v16  ;;  %v4745_v10 = vand.u32 2147483647, %v4737_v52  ;;  %v1908_v12 = vadd.f32 1.0, %v1858_v3  ;;  %v1859_v42 = vmul.f32 %v1809_v57, %v4566_v25 }
 0x228   : > { %v1164_v2 = vadd.f32 -1.4531521, %v1114_v17  ;;  %3178 = vrcp.f32 %v965_v58  ;;  %v1860_v50 = vmul.f32 %v1810_v62, %v4588_v48  ;;  %v4754_v54 = vmul.f32 0.5, %v4631_v15 }
 0x229   : > { %v1987_v51 = vpack.c.bf16 %v1939_v43, %v1937_v33  ;;  %v916_v37 = vmul.f32 0.3275911, %v4745_v10  ;;  %v1811_v1 = vsub.f32 1.0, %v1761_v39  ;;  %v1463_v14 = vadd.f32 0.2548296, %v1413_v46 }
 0x22a   : > { %v1214_v21 = vmul.f32 %v4732_v34, %v1164_v2  ;;  %v1614_v36 = vmul.f32 %v1564_v7, %v4671_v55  ;;  %v1762_v47 = vmul.f32 %v3175_v5, %v1512_v20  ;;  %v4760_v25 = vmul.f32 0.70710677, %v4749_v60 }
 0x22b   : > { %2172 = vmatprep.mubr.bf16.mxu1 %v1987_v51  ;;  %v966_v9 = vadd.f32 1.0, %v916_v37  ;;  %v1989_v48 = vpack.c.bf16 %v4203_v22, %v4141_v24  ;;  %v4765_v15 = vmul.f32 %v1908_v12, %v4512_v4  ;;  %v1909_v3 = vadd.f32 1.0, %v1859_v42  ;;  %v5942_v24 = vld [vmem:[#allocation27_spill] sm:$0xff]  ;;  %v5943_v22 = vld [vmem:[#allocation28_spill] sm:$0xff] }
 0x22c   : > { %vm764_vm12 = vcmp.lt.f32.partialorder %v4653_v61, 0.0  ;;  %v5941_v38 = vpack.c.bf16 %v4113_v32, %v4085_v23  ;;  %v4773_v55 = vadd.f32 %v4229_v30, %v3784_v6  ;;  %v1264_v11 = vadd.f32 1.4214138, %v1214_v21 }
 0x22d   : > { %3180 = vrcp.f32 %v966_v9  ;;  %v4776_v57 = vand.u32 2147483647, %v4760_v25  ;;  %v1988_v4 = vpack.c.bf16 %v5943_v22, %v5942_v24  ;;  %v1910_v53 = vadd.f32 1.0, %v1860_v50 }
 0x22e   : > { %2173 = vmatmul.mubr.bf16.vlgmr.msra.gmra.mrb[0].mxu1 %v5941_v38  ;;  %v3177_v62 = vpop.eup %3176  ;;  %v1861_v61 = vmul.f32 %v1811_v1, %v4600_v29  ;;  %v1513_v23 = vmul.f32 %v4679_v49, %v1463_v14  ;;  %v1692_v32 = vmul.f32 1.442695, %v1614_v36  ;;  %v1812_v40 = vsub.f32 1.0, %v1762_v47  ;;  %v5944_v49 = vld [vmem:[#allocation30_spill] sm:$0xff] }
 0x22f   : > { %2180 = vmatprep.mubr.bf16.mxu1 %v1989_v48  ;;  %v4783_v30 = vsel %vm764_vm12, -1.0, %v5886_v35  ;;  %v917_v39 = vmul.f32 0.3275911, %v4776_v57  ;;  %v4787_v45 = vmul.f32 0.70710677, %v4773_v55  ;;  %v4790_v7 = vmul.f32 %v1909_v3, %v4536_v31  ;;  %v5946_v48 = vld [vmem:[#allocation45_spill] sm:$0xff] }
 0x230   : > { %v4793_v26 = vmul.f32 0.5, %v4693_v56  ;;  %v1565_v29 = vsub.f32 0.0, %v4723_v19  ;;  %v4798_v20 = vadd.f32 %v5944_v49, %v3786_v8  ;;  %v1314_v46 = vmul.f32 %v4732_v34, %v1264_v11 }
 0x231   : > { %vm765_vm13 = vcmp.lt.f32.partialorder %v4709_v41, 0.0  ;;  %v967_v17 = vadd.f32 1.0, %v917_v39  ;;  %v4803_v58 = vand.u32 2147483647, %v4787_v45  ;;  %v4808_v31 = vmul.f32 %v1910_v53, %v4544_v18 }
 0x232   : > { %v4805_v5 = vpop.eup %3178  ;;  %v1911_v56 = vadd.f32 1.0, %v1861_v61  ;;  %v1763_v59 = vmul.f32 %v3177_v62, %v1513_v23  ;;  %3182 = vpow2.f32 %v1692_v32  ;;  %v1862_v33 = vmul.f32 %v1812_v40, %v4635_v28  ;;  %v5945_v28 = vld [vmem:[#allocation31_spill] sm:$0xff]  ;;  %v5947_v62 = vld [vmem:[#allocation13_spill] sm:$0xff]  ;;  %v5948_v32 = vld [vmem:[#allocation12_spill] sm:$0xff] }
 0x233   : > { %v1115_v16 = vmul.f32 1.0614054, %v4805_v5  ;;  %3184 = vrcp.f32 %v967_v17  ;;  %v918_v43 = vmul.f32 0.3275911, %v4803_v58  ;;  %v4814_v41 = vsel %vm765_vm13, -1.0, %v5886_v35 }
 0x234   : > { %v1615_v12 = vmul.f32 %v1565_v29, %v4723_v19  ;;  %v1566_v42 = vsub.f32 0.0, %v4745_v10  ;;  %v4819_v18 = vmul.f32 0.70710677, %v4798_v20  ;;  %v1364_v2 = vadd.f32 -0.28449672, %v1314_v46 }
 0x235   : > { %v1165_v50 = vadd.f32 -1.4531521, %v1115_v16  ;;  %v968_v51 = vadd.f32 1.0, %v918_v43  ;;  %v4823_v37 = vadd.f32 %v5945_v28, %v3784_v6  ;;  %v1813_v1 = vsub.f32 1.0, %v1763_v59 }
 0x236   : > { %2181 = vmatmul.mubr.bf16.gmra.mrb[4].mxu1 %v1988_v4  ;;  %v4826_v14 = vmul.f32 0.5, %v4716_v44  ;;  %v4829_v21 = vmul.f32 0.5, %v4749_v60  ;;  %v4832_v19 = vand.u32 2147483647, %v4819_v18  ;;  %v1912_v47 = vadd.f32 1.0, %v1862_v33 }
 0x237   : > { %v4834_v36 = vpop.eup %3180  ;;  %v1215_v9 = vmul.f32 %v4805_v5, %v1165_v50  ;;  %vm766_vm14 = vcmp.lt.f32.partialorder %v4737_v52, 0.0  ;;  %3186 = vrcp.f32 %v968_v51  ;;  %v4839_v3 = vmul.f32 %v1911_v56, %v5946_v48 }
 0x238   : > { %v1694_v38 = vmul.f32 1.442695, %v1615_v12  ;;  %v1116_v44 = vmul.f32 1.0614054, %v4834_v36  ;;  %v919_v60 = vmul.f32 0.3275911, %v4832_v19  ;;  %v1414_v11 = vmul.f32 %v4732_v34, %v1364_v2 }
 0x239   : > { %v1265_v24 = vadd.f32 1.4214138, %v1215_v9  ;;  %v1616_v22 = vmul.f32 %v1566_v42, %v4745_v10  ;;  %v4846_v4 = vmul.f32 0.70710677, %v4823_v37  ;;  %v1863_v53 = vmul.f32 %v1813_v1, %v5947_v62  ;;  %v5949_v10 = vld [vmem:[#allocation32_spill] sm:$0xff]  ;;  %v5950_v12 = vld [vmem:[#allocation33_spill] sm:$0xff] }
 0x23a   : > { %v4850_v52 = vsel %vm766_vm14, -1.0, %v5886_v35  ;;  %v1166_v61 = vadd.f32 -1.4531521, %v1116_v44  ;;  %v969_v23 = vadd.f32 1.0, %v919_v60  ;;  %v4853_v40 = vmul.f32 %v1912_v47, %v5948_v32  ;;  %v5951_v42 = vld [vmem:[#allocation19_spill] sm:$0xff] }
 0x23b   : > { %v1567_v39 = vsub.f32 0.0, %v4776_v57  ;;  %v4857_v29 = vand.u32 2147483647, %v4846_v4  ;;  %v4861_v49 = vadd.f32 %v5949_v10, %v3786_v8  ;;  %v1315_v17 = vmul.f32 %v4805_v5, %v1265_v24 }
 0x23c   : > { %v3183_v46 = vpop.eup %3182  ;;  %v1216_v56 = vmul.f32 %v4834_v36, %v1166_v61  ;;  %vm767_vm15 = vcmp.lt.f32.partialorder %v4760_v25, 0.0  ;;  %3188 = vrcp.f32 %v969_v23  ;;  %v1464_v33 = vadd.f32 0.2548296, %v1414_v11 }
 0x23d   : > { %v4866_v59 = vpop.eup %3184  ;;  %v1696_v16 = vmul.f32 1.442695, %v1616_v22  ;;  %v920_v43 = vmul.f32 0.3275911, %v4857_v29  ;;  %v1991_v2 = vpack.c.bf16 %v5951_v42, %v5950_v12  ;;  %v1913_v50 = vadd.f32 1.0, %v1863_v53  ;;  %v5952_v22 = vld [vmem:[#allocation23_spill] sm:$0xff] }
 0x23e   : > { %3190 = vpow2.f32 %v1694_v38  ;;  %v1266_v51 = vadd.f32 1.4214138, %v1216_v56  ;;  %v1117_v28 = vmul.f32 1.0614054, %v4866_v59  ;;  %v4873_v1 = vsel %vm767_vm15, -1.0, %v5886_v35 }
 0x23f   : > { %v1617_v25 = vmul.f32 %v1567_v39, %v4776_v57  ;;  %v970_v47 = vadd.f32 1.0, %v920_v43  ;;  %v4877_v9 = vmul.f32 0.70710677, %v4861_v49  ;;  %2188 = vmatprep.mubr.bf16.mxu1 %v1991_v2  ;;  %v1365_v48 = vadd.f32 -0.28449672, %v1315_v17 }
 0x240   : > { %v1316_v44 = vmul.f32 %v4834_v36, %v1266_v51  ;;  %v1167_v60 = vadd.f32 -1.4531521, %v1117_v28  ;;  %vm768_vm0 = vcmp.lt.f32.partialorder %v4787_v45, 0.0  ;;  %v1514_v11 = vmul.f32 %v4732_v34, %v1464_v33  ;;  %v5954_v51 = vld [vmem:[#allocation29_spill] sm:$0xff] }
 0x241   : > { %v4881_v38 = vpop.eup %3186  ;;  %v4885_v24 = vmul.f32 0.5, %v4773_v55  ;;  %3192 = vrcp.f32 %v970_v47  ;;  %v4888_v57 = vand.u32 2147483647, %v4877_v9  ;;  %v4891_v62 = vmul.f32 %v1913_v50, %v5952_v22  ;;  %v5955_v28 = vld [vmem:[#allocation37_spill] sm:$0xff] }
 0x242   : > { %3194 = vpow2.f32 %v1696_v16  ;;  %v1217_v53 = vmul.f32 %v4866_v59, %v1167_v60  ;;  %v1118_v61 = vmul.f32 1.0614054, %v4881_v38  ;;  %v1698_v45 = vmul.f32 1.442695, %v1617_v25  ;;  %v5953_v16 = vld [vmem:[#allocation34_spill] sm:$0xff] }
 0x243   : > { %v4896_v23 = vsel %vm768_vm0, -1.0, %v5886_v35  ;;  %v1568_v34 = vsub.f32 0.0, %v4803_v58  ;;  %v921_v55 = vmul.f32 0.3275911, %v4888_v57  ;;  %v1415_v32 = vmul.f32 %v4805_v5, %v1365_v48 }
 0x244   : > { %v1366_v39 = vadd.f32 -0.28449672, %v1316_v44  ;;  %v1267_v10 = vadd.f32 1.4214138, %v1217_v53  ;;  %v1168_v17 = vadd.f32 -1.4531521, %v1118_v61  ;;  %v1764_v56 = vmul.f32 %v3183_v46, %v1514_v11 }
 0x245   : > { %vm769_vm1 = vcmp.lt.f32.partialorder %v4819_v18, 0.0  ;;  %v971_v33 = vadd.f32 1.0, %v921_v55  ;;  %v4904_v43 = vadd.f32 %v5953_v16, %v3784_v6  ;;  %v1569_v50 = vsub.f32 0.0, %v4832_v19 }
 0x246   : > { %v4906_v12 = vpop.eup %3188  ;;  %v1317_v42 = vmul.f32 %v4866_v59, %v1267_v10  ;;  %v1218_v2 = vmul.f32 %v4881_v38, %v1168_v17  ;;  %v1990_v25 = vpack.c.bf16 %v5955_v28, %v5954_v51  ;;  %v1618_v46 = vmul.f32 %v1568_v34, %v4803_v58  ;;  %v5956_v28 = vld [vmem:[#allocation35_spill] sm:$0xff] }
 0x247   : > { %v4915_v47 = vmul.f32 0.5, %v4798_v20  ;;  %v1119_v48 = vmul.f32 1.0614054, %v4906_v12  ;;  %3196 = vrcp.f32 %v971_v33  ;;  %v1465_v60 = vadd.f32 0.2548296, %v1415_v32 }
 0x248   : > { %v3191_v44 = vpop.eup %3190  ;;  %v1416_v11 = vmul.f32 %v4834_v36, %v1366_v39  ;;  %v1367_v22 = vadd.f32 -0.28449672, %v1317_v42  ;;  %v1268_v53 = vadd.f32 1.4214138, %v1218_v2  ;;  %2189 = vmatmul.mubr.bf16.gmra.mrb[8].mxu1 %v1990_v25  ;;  %3198 = vpow2.f32 %v1698_v45 }
 0x249   : > { %v4922_v61 = vsel %vm769_vm1, -1.0, %v5886_v35  ;;  %v1169_v58 = vadd.f32 -1.4531521, %v1119_v48  ;;  %v4925_v20 = vmul.f32 0.70710677, %v4904_v43  ;;  %v1814_v34 = vsub.f32 1.0, %v1764_v56 }
 0x24a   : > { %v1318_v55 = vmul.f32 %v4881_v38, %v1268_v53  ;;  %v1619_v32 = vmul.f32 %v1569_v50, %v4832_v19  ;;  %v4930_v39 = vmul.f32 0.5, %v4823_v37  ;;  %v1700_v45 = vmul.f32 1.442695, %v1618_v46 }
 0x24b   : > { %v4932_v10 = vpop.eup %3192  ;;  %v1219_v17 = vmul.f32 %v4906_v12, %v1169_v58  ;;  %v1570_v18 = vsub.f32 0.0, %v4857_v29  ;;  %v4937_v33 = vand.u32 2147483647, %v4925_v20  ;;  %v1515_v56 = vmul.f32 %v4805_v5, %v1465_v60 }
 0x24c   : > { %v3195_v16 = vpop.eup %3194  ;;  %v1466_v42 = vadd.f32 0.2548296, %v1416_v11  ;;  %v1417_v2 = vmul.f32 %v4866_v59, %v1367_v22  ;;  %v1368_v19 = vadd.f32 -0.28449672, %v1318_v55  ;;  %v1120_v37 = vmul.f32 1.0614054, %v4932_v10 }
 0x24d   : > { %v1269_v50 = vadd.f32 1.4214138, %v1219_v17  ;;  %v922_v51 = vmul.f32 0.3275911, %v4937_v33  ;;  %v4945_v25 = vadd.f32 %v5956_v28, %v3786_v8  ;;  %v1864_v46 = vmul.f32 %v1814_v34, %v4783_v30 }
 0x24e   : > { %v1702_v48 = vmul.f32 1.442695, %v1619_v32  ;;  %vm770_vm2 = vcmp.lt.f32.partialorder %v4846_v4, 0.0  ;;  %v4950_v5 = vmul.f32 0.5, %v4861_v49  ;;  %v1418_v60 = vmul.f32 %v4881_v38, %v1368_v19 }
 0x24f   : > { %v1319_v11 = vmul.f32 %v4906_v12, %v1269_v50  ;;  %v1170_v22 = vadd.f32 -1.4531521, %v1120_v37  ;;  %v972_v53 = vadd.f32 1.0, %v922_v51  ;;  %v1765_v58 = vmul.f32 %v3191_v44, %v1515_v56 }
 0x250   : > { %v1516_v55 = vmul.f32 %v4834_v36, %v1466_v42  ;;  %3200 = vpow2.f32 %v1700_v45  ;;  %v1620_v17 = vmul.f32 %v1570_v18, %v4857_v29  ;;  %v1467_v30 = vadd.f32 0.2548296, %v1417_v2 }
 0x251   : > { %v4956_v28 = vpop.eup %3196  ;;  %v1220_v34 = vmul.f32 %v4932_v10, %v1170_v22  ;;  %3202 = vrcp.f32 %v972_v53  ;;  %v4960_v49 = vmul.f32 0.70710677, %v4945_v25  ;;  %v1914_v32 = vadd.f32 1.0, %v1864_v46 }
 0x252   : > { %v4965_v19 = vsel %vm770_vm2, -1.0, %v5886_v35  ;;  %v1121_v36 = vmul.f32 1.0614054, %v4956_v28  ;;  %v1571_v44 = vsub.f32 0.0, %v4888_v57  ;;  %v3199_v29 = vpop.eup %3198  ;;  %v1468_v45 = vadd.f32 0.2548296, %v1418_v60 }
 0x253   : > { %v1369_v18 = vadd.f32 -0.28449672, %v1319_v11  ;;  %3204 = vpow2.f32 %v1702_v48  ;;  %v1270_v56 = vadd.f32 1.4214138, %v1220_v34  ;;  %v1815_v42 = vsub.f32 1.0, %v1765_v58  ;;  %v5958_v11 = vld [vmem:[#allocation36_spill] sm:$0xff] }
 0x254   : > { %v1704_v2 = vmul.f32 1.442695, %v1620_v17  ;;  %vm771_vm3 = vcmp.lt.f32.partialorder %v4877_v9, 0.0  ;;  %v1171_v50 = vadd.f32 -1.4531521, %v1121_v36  ;;  %v1766_v37 = vmul.f32 %v3195_v16, %v1516_v55 }
 0x255   : > { %v1517_v51 = vmul.f32 %v4866_v59, %v1467_v30  ;;  %v1320_v4 = vmul.f32 %v4932_v10, %v1270_v56  ;;  %v4973_v46 = vand.u32 2147483647, %v4960_v49  ;;  %v4976_v22 = vmul.f32 %v1914_v32, %v4754_v54 }
 0x256   : > { %v1221_v60 = vmul.f32 %v4956_v28, %v1171_v50  ;;  %v1621_v48 = vmul.f32 %v1571_v44, %v4888_v57  ;;  %v4982_v53 = vadd.f32 %v5958_v11, %v3784_v6  ;;  %v1518_v16 = vmul.f32 %v4881_v38, %v1468_v45 }
 0x257   : > { %5957 = vst [vmem:[#allocation17_spill] sm:$0xff] %v4976_v22  ;;  %v1419_v59 = vmul.f32 %v4906_v12, %v1369_v18  ;;  %v1370_v58 = vadd.f32 -0.28449672, %v1320_v4  ;;  %v923_v55 = vmul.f32 0.3275911, %v4973_v46  ;;  %v1865_v17 = vmul.f32 %v1815_v42, %v4814_v41  ;;  %v5959_v42 = vld [vmem:[#allocation18_spill] sm:$0xff] }
 0x258   : > { %3206 = vpow2.f32 %v1704_v2  ;;  %v4991_v54 = vsel %vm771_vm3, -1.0, %v5886_v35  ;;  %v1271_v57 = vadd.f32 1.4214138, %v1221_v60  ;;  %v1816_v30 = vsub.f32 1.0, %v1766_v37 }
 0x259   : > { %v1767_v34 = vmul.f32 %v3199_v29, %v1517_v51  ;;  %v1420_v32 = vmul.f32 %v4932_v10, %v1370_v58  ;;  %v973_v36 = vadd.f32 1.0, %v923_v55  ;;  %v1706_v45 = vmul.f32 1.442695, %v1621_v48 }
 0x25a   : > { %v3201_v38 = vpop.eup %3200  ;;  %v1321_v44 = vmul.f32 %v4956_v28, %v1271_v57  ;;  %vm772_vm4 = vcmp.lt.f32.partialorder %v4925_v20, 0.0  ;;  %v4997_v41 = vmul.f32 0.70710677, %v4982_v53  ;;  %v1469_v56 = vadd.f32 0.2548296, %v1419_v59  ;;  %v5960_v57 = vld [vmem:[#allocation20_spill] sm:$0xff] }
 0x25b   : > { %v4999_v18 = vpop.eup %3202  ;;  %v1768_v9 = vmul.f32 %v3201_v38, %v1518_v16  ;;  %3208 = vrcp.f32 %v973_v36  ;;  %v5003_v29 = vadd.f32 %v5959_v42, %v3786_v8  ;;  %v1915_v2 = vadd.f32 1.0, %v1865_v17  ;;  %v5961_v36 = vld [vmem:[#allocation42_spill] sm:$0xff] }
 0x25c   : > { %v5006_v50 = vmul.f32 0.5, %v4904_v43  ;;  %v1122_v37 = vmul.f32 1.0614054, %v4999_v18  ;;  %v1572_v20 = vsub.f32 0.0, %v4937_v33  ;;  %v1866_v4 = vmul.f32 %v1816_v30, %v4850_v52 }
 0x25d   : > { %v3205_v51 = vpop.eup %3204  ;;  %v1817_v60 = vsub.f32 1.0, %v1767_v34  ;;  %v1470_v48 = vadd.f32 0.2548296, %v1420_v32  ;;  %v5012_v11 = vsel %vm772_vm4, -1.0, %v5886_v35  ;;  %v1371_v16 = vadd.f32 -0.28449672, %v1321_v44 }
 0x25e   : > { %3210 = vpow2.f32 %v1706_v45  ;;  %v1172_v59 = vadd.f32 -1.4531521, %v1122_v37  ;;  %v5015_v58 = vand.u32 2147483647, %v4997_v41  ;;  %v1818_v43 = vsub.f32 1.0, %v1768_v9 }
 0x25f   : > { %v1519_v55 = vmul.f32 %v4906_v12, %v1469_v56  ;;  %v5019_v17 = vmul.f32 0.70710677, %v5003_v29  ;;  %v1993_v52 = vpack.c.bf16 %v5961_v36, %v5960_v57  ;;  %v1622_v34 = vmul.f32 %v1572_v20, %v4937_v33 }
 0x260   : > { %v1222_v30 = vmul.f32 %v4999_v18, %v1172_v59  ;;  %v1573_v32 = vsub.f32 0.0, %v4973_v46  ;;  %v924_v38 = vmul.f32 0.3275911, %v5015_v58  ;;  %v5028_v44 = vmul.f32 %v1915_v2, %v4793_v26 }
 0x261   : > { %v1916_v45 = vadd.f32 1.0, %v1866_v4  ;;  %vm773_vm5 = vcmp.lt.f32.partialorder %v4960_v49, 0.0  ;;  %v5032_v12 = vand.u32 2147483647, %v5019_v17  ;;  %2196 = vmatprep.mubr.bf16.mxu1 %v1993_v52  ;;  %v1867_v56 = vmul.f32 %v1817_v60, %v4873_v1 }
 0x262   : > { %v3207_v9 = vpop.eup %3206  ;;  %v1520_v42 = vmul.f32 %v4932_v10, %v1470_v48  ;;  %v1421_v33 = vmul.f32 %v4956_v28, %v1371_v16  ;;  %v974_v37 = vadd.f32 1.0, %v924_v38  ;;  %v1868_v20 = vmul.f32 %v1818_v43, %v4896_v23 }
 0x263   : > { %v1769_v59 = vmul.f32 %v3205_v51, %v1519_v55  ;;  %v1272_v26 = vadd.f32 1.4214138, %v1222_v30  ;;  %v925_v2 = vmul.f32 0.3275911, %v5032_v12  ;;  %v1708_v4 = vmul.f32 1.442695, %v1622_v34 }
 0x264   : > { %v5040_v57 = vmul.f32 0.5, %v4945_v25  ;;  %v1623_v36 = vmul.f32 %v1573_v32, %v4973_v46  ;;  %3212 = vrcp.f32 %v974_v37  ;;  %v5046_v1 = vmul.f32 %v1916_v45, %v4826_v14  ;;  %v5963_v51 = vld [vmem:[#allocation39_spill] sm:$0xff] }
 0x265   : > { %v5043_v52 = vpop.eup %3208  ;;  %v5051_v23 = vsel %vm773_vm5, -1.0, %v5886_v35  ;;  %v975_v10 = vadd.f32 1.0, %v925_v2  ;;  %v5055_v60 = vadd.f32 %v5963_v51, %v3784_v6  ;;  %v1917_v25 = vadd.f32 1.0, %v1867_v56  ;;  %v5965_v56 = vld [vmem:[#allocation40_spill] sm:$0xff]  ;;  %v5967_v2 = vld [vmem:[#allocation22_spill] sm:$0xff] }
 0x266   : > { %5962 = vst [vmem:[#allocation25_spill] sm:$0xff] %v5046_v1  ;;  %v1770_v48 = vmul.f32 %v3207_v9, %v1520_v42  ;;  %v1471_v16 = vadd.f32 0.2548296, %v1421_v33  ;;  %v1123_v46 = vmul.f32 1.0614054, %v5043_v52  ;;  %v1918_v43 = vadd.f32 1.0, %v1868_v20 }
 0x267   : > { %v1819_v55 = vsub.f32 1.0, %v1769_v59  ;;  %v1322_v14 = vmul.f32 %v4999_v18, %v1272_v26  ;;  %3214 = vrcp.f32 %v975_v10  ;;  %v1710_v34 = vmul.f32 1.442695, %v1623_v36  ;;  %v5964_v9 = vld [vmem:[#allocation38_spill] sm:$0xff]  ;;  %v5966_v33 = vld [vmem:[#allocation21_spill] sm:$0xff] }
 0x268   : > { %v3211_v30 = vpop.eup %3210  ;;  %3216 = vpow2.f32 %v1708_v4  ;;  %v1173_v49 = vadd.f32 -1.4531521, %v1123_v46  ;;  %v5060_v32 = vmul.f32 0.70710677, %v5055_v60  ;;  %v5063_v38 = vmul.f32 0.5, %v4982_v53 }
 0x269   : > { %v1574_v45 = vsub.f32 0.0, %v5015_v58  ;;  %v1992_v42 = vpack.c.bf16 %v5965_v56, %v5964_v9  ;;  %v5070_v37 = vadd.f32 %v5966_v33, %v3786_v8  ;;  %v1820_v20 = vsub.f32 1.0, %v1770_v48 }
 0x26a   : > { %v1521_v59 = vmul.f32 %v4956_v28, %v1471_v16  ;;  %v1223_v26 = vmul.f32 %v5043_v52, %v1173_v49  ;;  %v5076_v4 = vadd.f32 %v5967_v2, %v3784_v6  ;;  %v5079_v53 = vmul.f32 %v1917_v25, %v4829_v21 }
 0x26b   : > { %v1372_v36 = vadd.f32 -0.28449672, %v1322_v14  ;;  %v5082_v10 = vand.u32 2147483647, %v5060_v32  ;;  %2197 = vmatmul.mubr.bf16.gmra.mrb[12].mxu1 %v1992_v42  ;;  %v5085_v51 = vmul.f32 0.70710677, %v5070_v37  ;;  %v5088_v48 = vmul.f32 %v1918_v43, %v4885_v24 }
 0x26c   : > { %5968 = vst [vmem:[#allocation14_spill] sm:$0xff] %v5079_v53  ;;  %v1869_v28 = vmul.f32 %v1819_v55, %v4922_v61  ;;  %3218 = vpow2.f32 %v1710_v34  ;;  %vm774_vm6 = vcmp.lt.f32.partialorder %v4997_v41, 0.0  ;;  %v1273_v16 = vadd.f32 1.4214138, %v1223_v26 }
 0x26d   : > { %5969 = vst [vmem:[#allocation15_spill] sm:$0xff] %v5088_v48  ;;  %v1624_v21 = vmul.f32 %v1574_v45, %v5015_v58  ;;  %v926_v25 = vmul.f32 0.3275911, %v5082_v10  ;;  %v5095_v46 = vand.u32 2147483647, %v5085_v51  ;;  %v1870_v49 = vmul.f32 %v1820_v20, %v4965_v19 }
 0x26e   : > { %v5097_v14 = vpop.eup %3212  ;;  %v1771_v9 = vmul.f32 %v3211_v30, %v1521_v59  ;;  %v1575_v24 = vsub.f32 0.0, %v5032_v12  ;;  %v5102_v61 = vmul.f32 0.70710677, %v5076_v4  ;;  %v1422_v41 = vmul.f32 %v4999_v18, %v1372_v36 }
 0x26f   : > { %v1124_v43 = vmul.f32 1.0614054, %v5097_v14  ;;  %v976_v58 = vadd.f32 1.0, %v926_v25  ;;  %v927_v55 = vmul.f32 0.3275911, %v5095_v46  ;;  %v1919_v34 = vadd.f32 1.0, %v1869_v28 }
 0x270   : > { %v5108_v45 = vsel %vm774_vm6, -1.0, %v5886_v35  ;;  %v5111_v56 = vmul.f32 0.5, %v5003_v29  ;;  %vm775_vm7 = vcmp.lt.f32.partialorder %v5019_v17, 0.0  ;;  %v1323_v30 = vmul.f32 %v5043_v52, %v1273_v16 }
 0x271   : > { %v5114_v19 = vpop.eup %3214  ;;  %v1174_v42 = vadd.f32 -1.4531521, %v1124_v43  ;;  %3220 = vrcp.f32 %v976_v58  ;;  %v977_v33 = vadd.f32 1.0, %v927_v55  ;;  %v1821_v59 = vsub.f32 1.0, %v1771_v9 }
 0x272   : > { %v3217_v20 = vpop.eup %3216  ;;  %v1712_v26 = vmul.f32 1.442695, %v1624_v21  ;;  %v1125_v2 = vmul.f32 1.0614054, %v5114_v19  ;;  %v1625_v36 = vmul.f32 %v1575_v24, %v5032_v12  ;;  %v1920_v28 = vadd.f32 1.0, %v1870_v49  ;;  %v5971_v49 = vld [vmem:[#allocation41_spill] sm:$0xff] }
 0x273   : > { %v1472_v25 = vadd.f32 0.2548296, %v1422_v41  ;;  %v1224_v29 = vmul.f32 %v5097_v14, %v1174_v42  ;;  %v5121_v48 = vand.u32 2147483647, %v5102_v61  ;;  %v5124_v1 = vmul.f32 %v1919_v34, %v4915_v47 }
 0x274   : > { %v5129_v16 = vsel %vm775_vm7, -1.0, %v5886_v35  ;;  %v1175_v21 = vadd.f32 -1.4531521, %v1125_v2  ;;  %3222 = vrcp.f32 %v977_v33  ;;  %v1373_v9 = vadd.f32 -0.28449672, %v1323_v30 }
 0x275   : > { %5970 = vst [vmem:[#allocation27_spill] sm:$0xff] %v5124_v1  ;;  %v1274_v43 = vadd.f32 1.4214138, %v1224_v29  ;;  %v928_v12 = vmul.f32 0.3275911, %v5121_v48  ;;  %v5134_v24 = vadd.f32 %v5971_v49, %v3786_v8  ;;  %v1871_v47 = vmul.f32 %v1821_v59, %v4991_v54 }
 0x276   : > { %v5136_v41 = vpop.eup %3218  ;;  %3224 = vpow2.f32 %v1712_v26  ;;  %v1225_v58 = vmul.f32 %v5114_v19, %v1175_v21  ;;  %v1714_v17 = vmul.f32 1.442695, %v1625_v36  ;;  %v5141_v55 = vmul.f32 %v1920_v28, %v4930_v39  ;;  %v5973_v39 = vld [vmem:[#allocation26_spill] sm:$0xff]  ;;  %v5974_v36 = vld [vmem:[#allocation16_spill] sm:$0xff] }
 0x277   : > { %v1522_v34 = vmul.f32 %v4999_v18, %v1472_v25  ;;  %v1324_v30 = vmul.f32 %v5097_v14, %v1274_v43  ;;  %v978_v42 = vadd.f32 1.0, %v928_v12  ;;  %v5146_v2 = vmul.f32 0.5, %v5055_v60  ;;  %v5975_v60 = vld [vmem:[#allocation24_spill] sm:$0xff] }
 0x278   : > { %5972 = vst [vmem:[#allocation28_spill] sm:$0xff] %v5141_v55  ;;  %v1275_v33 = vadd.f32 1.4214138, %v1225_v58  ;;  %vm776_vm8 = vcmp.lt.f32.partialorder %v5060_v32, 0.0  ;;  %v5150_v54 = vmul.f32 0.70710677, %v5134_v24  ;;  %v1423_v59 = vmul.f32 %v5043_v52, %v1373_v9 }
 0x279   : > { %v1374_v26 = vadd.f32 -0.28449672, %v1324_v30  ;;  %3226 = vrcp.f32 %v978_v42  ;;  %v1995_v28 = vpack.c.bf16 %v5974_v36, %v5973_v39  ;;  %v5155_v18 = vadd.f32 1.0, %v1871_v47  ;;  %v5978_v42 = vld [vmem:[#allocation46_spill] sm:$0xff] }
 0x27a   : > { %v1325_v25 = vmul.f32 %v5114_v19, %v1275_v33  ;;  %3228 = vpow2.f32 %v1714_v17  ;;  %v5160_v29 = vadd.f32 %v5975_v60, %v3784_v6  ;;  %v1772_v21 = vmul.f32 %v3217_v20, %v1522_v34  ;;  %v5977_v34 = vld [vmem:[#allocation43_spill] sm:$0xff] }
 0x27b   : > { %v5162_v32 = vpop.eup %3220  ;;  %v5165_v43 = vsel %vm776_vm8, -1.0, %v5886_v35  ;;  %v1576_v9 = vsub.f32 0.0, %v5082_v10  ;;  %v879_v12 = vand.u32 2147483647, %v5150_v54  ;;  %2204 = vmatprep.mubr.bf16.mxu1 %v1995_v28  ;;  %v1424_v49 = vmul.f32 %v5097_v14, %v1374_v26 }
 0x27c   : > { %5976 = vst [vmem:[#allocation30_spill] sm:$0xff] %v5160_v29  ;;  %v1126_v47 = vmul.f32 1.0614054, %v5162_v32  ;;  %v5172_v58 = vmul.f32 0.5, %v5070_v37  ;;  %vm777_vm9 = vcmp.lt.f32.partialorder %v5085_v51, 0.0  ;;  %v1994_v33 = vpack.c.bf16 %v5978_v42, %v5977_v34 }
 0x27d   : > { %v1473_v17 = vadd.f32 0.2548296, %v1423_v59  ;;  %v1375_v30 = vadd.f32 -0.28449672, %v1325_v25  ;;  %v929_v20 = vmul.f32 0.3275911, %v879_v12  ;;  %v1626_v55 = vmul.f32 %v1576_v9, %v5082_v10 }
 0x27e   : > { %v5177_v39 = vpop.eup %3222  ;;  %v1176_v36 = vadd.f32 -1.4531521, %v1126_v47  ;;  %v1577_v28 = vsub.f32 0.0, %v5095_v46  ;;  %v5181_v26 = vmul.f32 0.5, %v5076_v4  ;;  %v5184_v60 = vmul.f32 0.70710677, %v5160_v29  ;;  %2205 = vmatmul.mubr.bf16.gmra.mrb[16].mxu1 %v1994_v33 }
 0x27f   : > { %v1822_v37 = vsub.f32 1.0, %v1772_v21  ;;  %v1127_v59 = vmul.f32 1.0614054, %v5177_v39  ;;  %v979_v25 = vadd.f32 1.0, %v929_v20  ;;  %v1474_v34 = vadd.f32 0.2548296, %v1424_v49 }
 0x280   : > { %5979 = vst [vmem:[#allocation31_spill] sm:$0xff] %v5181_v26  ;;  %5980 = vst [vmem:[#allocation45_spill] sm:$0xff] %v5184_v60  ;;  %v3225_v1 = vpop.eup %3224  ;;  %v1226_v42 = vmul.f32 %v5162_v32, %v1176_v36  ;;  %v5192_v47 = vsel %vm777_vm9, -1.0, %v5886_v35  ;;  %vm778_vm10 = vcmp.lt.f32.partialorder %v5102_v61, 0.0  ;;  %v1523_v4 = vmul.f32 %v5043_v52, %v1473_v17  ;;  %v5981_v52 = vld [vmem:[#allocation44_spill] sm:$0xff] }
 0x281   : > { %v1425_v21 = vmul.f32 %v5114_v19, %v1375_v30  ;;  %v1177_v10 = vadd.f32 -1.4531521, %v1127_v59  ;;  %3230 = vrcp.f32 %v979_v25  ;;  %v1627_v20 = vmul.f32 %v1577_v28, %v5095_v46 }
 0x282   : > { %v1276_v9 = vadd.f32 1.4214138, %v1226_v42  ;;  %v1578_v49 = vsub.f32 0.0, %v5121_v48  ;;  %v5200_v33 = vand.u32 2147483647, %v5184_v60  ;;  %v1872_v51 = vmul.f32 %v1822_v37, %v5012_v11 }
 0x283   : > { %v5202_v36 = vpop.eup %3226  ;;  %v1716_v29 = vmul.f32 1.442695, %v1626_v55  ;;  %v1227_v22 = vmul.f32 %v5177_v39, %v1177_v10  ;;  %v5208_v17 = vadd.f32 %v5981_v52, %v3786_v8  ;;  %v1524_v59 = vmul.f32 %v5097_v14, %v1474_v34 }
 0x284   : > { %v3229_v30 = vpop.eup %3228  ;;  %v1326_v46 = vmul.f32 %v5162_v32, %v1276_v9  ;;  %v1128_v28 = vmul.f32 1.0614054, %v5202_v36  ;;  %v930_v25 = vmul.f32 0.3275911, %v5200_v33  ;;  %v1773_v42 = vmul.f32 %v5136_v41, %v1523_v4 }
 0x285   : > { %v1475_v60 = vadd.f32 0.2548296, %v1425_v21  ;;  %v1277_v11 = vadd.f32 1.4214138, %v1227_v22  ;;  %v1579_v55 = vsub.f32 0.0, %v879_v12  ;;  %v1628_v26 = vmul.f32 %v1578_v49, %v5121_v48 }
 0x286   : > { %v1718_v37 = vmul.f32 1.442695, %v1627_v20  ;;  %v1178_v10 = vadd.f32 -1.4531521, %v1128_v28  ;;  %v980_v52 = vadd.f32 1.0, %v930_v25  ;;  %3232 = vpow2.f32 %v1716_v29  ;;  %v5982_v25 = vld [vmem:[#allocation47_spill] sm:$0xff] }
 0x287   : > { %v1376_v53 = vadd.f32 -0.28449672, %v1326_v46  ;;  %v1327_v14 = vmul.f32 %v5177_v39, %v1277_v11  ;;  %v5218_v34 = vmul.f32 0.70710677, %v5208_v17  ;;  %v1774_v9 = vmul.f32 %v3225_v1, %v1524_v59 }
 0x288   : > { %v5223_v41 = vsel %vm778_vm10, -1.0, %v5886_v35  ;;  %v1228_v22 = vmul.f32 %v5202_v36, %v1178_v10  ;;  %3234 = vrcp.f32 %v980_v52  ;;  %v1823_v4 = vsub.f32 1.0, %v1773_v42 }
 0x289   : > { %v1525_v48 = vmul.f32 %v5114_v19, %v1475_v60  ;;  %v1377_v21 = vadd.f32 -0.28449672, %v1327_v14  ;;  %v1629_v20 = vmul.f32 %v1579_v55, %v879_v12  ;;  %v1922_v29 = vadd.f32 1.0, %v1872_v51 }
 0x28a   : > { %3236 = vpow2.f32 %v1718_v37  ;;  %v1278_v49 = vadd.f32 1.4214138, %v1228_v22  ;;  %v1720_v46 = vmul.f32 1.442695, %v1628_v26  ;;  %v1426_v1 = vmul.f32 %v5162_v32, %v1376_v53 }
 0x28b   : > { %v5227_v28 = vpop.eup %3230  ;;  %v1427_v61 = vmul.f32 %v5177_v39, %v1377_v21  ;;  %v5232_v59 = vand.u32 2147483647, %v5218_v34  ;;  %v5236_v42 = vadd.f32 %v5982_v25, %v3784_v6  ;;  %v1824_v19 = vsub.f32 1.0, %v1774_v9 }
 0x28c   : > { %v1328_v12 = vmul.f32 %v5202_v36, %v1278_v49  ;;  %vm779_vm11 = vcmp.lt.f32.partialorder %v5150_v54, 0.0  ;;  %v1129_v26 = vmul.f32 1.0614054, %v5227_v28  ;;  %v1873_v60 = vmul.f32 %v1823_v4, %v5051_v23 }
 0x28d   : > { %v1775_v51 = vmul.f32 %v3229_v30, %v1525_v48  ;;  %v1722_v53 = vmul.f32 1.442695, %v1629_v20  ;;  %v931_v11 = vmul.f32 0.3275911, %v5232_v59  ;;  %v5245_v55 = vmul.f32 %v5155_v18, %v4950_v5  ;;  %v5983_v20 = vld [vmem:[#allocation48_spill] sm:$0xff] }
 0x28e   : > { %v1378_v37 = vadd.f32 -0.28449672, %v1328_v12  ;;  %v1179_v10 = vadd.f32 -1.4531521, %v1129_v26  ;;  %v5248_v52 = vmul.f32 0.70710677, %v5236_v42  ;;  %3238 = vpow2.f32 %v1720_v46 }
 0x28f   : > { %v1476_v14 = vadd.f32 0.2548296, %v1426_v1  ;;  %v1477_v9 = vadd.f32 0.2548296, %v1427_v61  ;;  %v981_v22 = vadd.f32 1.0, %v931_v11  ;;  %v1874_v21 = vmul.f32 %v1824_v19, %v5108_v45 }
 0x290   : > { %v1428_v23 = vmul.f32 %v5202_v36, %v1378_v37  ;;  %v1229_v30 = vmul.f32 %v5227_v28, %v1179_v10  ;;  %v1580_v4 = vsub.f32 0.0, %v5200_v33  ;;  %v3233_v48 = vpop.eup %3232  ;;  %v1923_v5 = vadd.f32 1.0, %v1873_v60 }
 0x291   : > { %v1825_v18 = vsub.f32 1.0, %v1775_v51  ;;  %3240 = vrcp.f32 %v981_v22  ;;  %v5256_v49 = vadd.f32 %v5983_v20, %v3786_v8  ;;  %v5261_v46 = vmul.f32 %v1922_v29, %v5006_v50 }
 0x292   : > { %v5258_v1 = vpop.eup %3234  ;;  %v1478_v45 = vadd.f32 0.2548296, %v1428_v23  ;;  %v1279_v61 = vadd.f32 1.4214138, %v1229_v30  ;;  %v882_v25 = vand.u32 2147483647, %v5248_v52  ;;  %v1526_v19 = vmul.f32 %v5162_v32, %v1476_v14 }
 0x293   : > { %v1527_v12 = vmul.f32 %v5177_v39, %v1477_v9  ;;  %3242 = vpow2.f32 %v1722_v53  ;;  %v1130_v26 = vmul.f32 1.0614054, %v5258_v1  ;;  %v1924_v51 = vadd.f32 1.0, %v1874_v21 }
 0x294   : > { %v3237_v60 = vpop.eup %3236  ;;  %v1329_v11 = vmul.f32 %v5227_v28, %v1279_v61  ;;  %v1630_v37 = vmul.f32 %v1580_v4, %v5200_v33  ;;  %v932_v10 = vmul.f32 0.3275911, %v882_v25  ;;  %v1875_v50 = vmul.f32 %v1825_v18, %v5129_v16 }
 0x295   : > { %v5271_v29 = vmul.f32 0.5, %v5134_v24  ;;  %v1180_v22 = vadd.f32 -1.4531521, %v1130_v26  ;;  %v5274_v32 = vmul.f32 0.70710677, %v5256_v49  ;;  %v1528_v39 = vmul.f32 %v5202_v36, %v1478_v45 }
 0x296   : > { %v829_v53 = vsel %vm779_vm11, -1.0, %v5886_v35  ;;  %v1379_v14 = vadd.f32 -0.28449672, %v1329_v11  ;;  %v982_v9 = vadd.f32 1.0, %v932_v10  ;;  %v5281_v33 = vmul.f32 %v1923_v5, %v5040_v57 }
 0x297   : > { %v1776_v21 = vmul.f32 %v3233_v48, %v1526_v19  ;;  %v1777_v16 = vmul.f32 %v3237_v60, %v1527_v12  ;;  %v1230_v24 = vmul.f32 %v5258_v1, %v1180_v22  ;;  %v5285_v23 = vmul.f32 %v1924_v51, %v5063_v38 }
 0x298   : > { %v1429_v30 = vmul.f32 %v5227_v28, %v1379_v14  ;;  %v1724_v4 = vmul.f32 1.442695, %v1630_v37  ;;  %3244 = vrcp.f32 %v982_v9  ;;  %v3239_v36 = vpop.eup %3238  ;;  %v1925_v18 = vadd.f32 1.0, %v1875_v50 }
 0x299   : > { %v1280_v54 = vadd.f32 1.4214138, %v1230_v24  ;;  %v1581_v20 = vsub.f32 0.0, %v5232_v59  ;;  %v883_v45 = vand.u32 2147483647, %v5274_v32  ;;  %v1778_v57 = vmul.f32 %v3239_v36, %v1528_v39 }
 0x29a   : > { %v1479_v5 = vadd.f32 0.2548296, %v1429_v30  ;;  %v1997_v48 = vpack.c.bf16 %v4790_v7, %v4726_v63  ;;  %v5294_v38 = vadd.f32 %v4701_v27, %v3784_v6  ;;  %v1826_v19 = vsub.f32 1.0, %v1776_v21 }
 0x29b   : > { %v5296_v61 = vpop.eup %3240  ;;  %v1827_v12 = vsub.f32 1.0, %v1777_v16  ;;  %v1330_v26 = vmul.f32 %v5258_v1, %v1280_v54  ;;  %v933_v60 = vmul.f32 0.3275911, %v883_v45  ;;  %3246 = vpow2.f32 %v1724_v4 }
 0x29c   : > { %v1529_v51 = vmul.f32 %v5227_v28, %v1479_v5  ;;  %v1131_v11 = vmul.f32 1.0614054, %v5296_v61  ;;  %v1582_v37 = vsub.f32 0.0, %v882_v25  ;;  %2212 = vmatprep.mubr.bf16.mxu1 %v1997_v48  ;;  %v1631_v7 = vmul.f32 %v1581_v20, %v5232_v59 }
 0x29d   : > { %v3243_v10 = vpop.eup %3242  ;;  %v1380_v63 = vadd.f32 -0.28449672, %v1330_v26  ;;  %v983_v6 = vadd.f32 1.0, %v933_v60  ;;  %v5303_v27 = vmul.f32 0.70710677, %v5294_v38  ;;  %v1828_v50 = vsub.f32 1.0, %v1778_v57 }
 0x29e   : > { %v1779_v22 = vmul.f32 %v3243_v10, %v1529_v51  ;;  %v1181_v39 = vadd.f32 -1.4531521, %v1131_v11  ;;  %v1996_v14 = vpack.c.bf16 %v4765_v15, %v4720_v0  ;;  %v5308_v28 = vmul.f32 %v1925_v18, %v5111_v56 }
 0x29f   : > { %v1876_v9 = vmul.f32 %v1826_v19, %v5165_v43  ;;  %v1877_v21 = vmul.f32 %v1827_v12, %v5192_v47  ;;  %3248 = vrcp.f32 %v983_v6  ;;  %v1632_v24 = vmul.f32 %v1582_v37, %v882_v25 }
 0x2a0   : > { %v1829_v16 = vsub.f32 1.0, %v1779_v22  ;;  %v1231_v59 = vmul.f32 %v5296_v61, %v1181_v39  ;;  %v5314_v30 = vand.u32 2147483647, %v5303_v27  ;;  %2213 = vmatmul.mubr.bf16.gmra.mrb[20].mxu1 %v1996_v14  ;;  %v1430_v4 = vmul.f32 %v5258_v1, %v1380_v63  ;;  %v5984_v14 = vld [vmem:[#allocation14_spill] sm:$0xff] }
 0x2a1   : > { %v1726_v36 = vmul.f32 1.442695, %v1631_v7  ;;  %v5319_v0 = vadd.f32 %v4729_v13, %v3786_v8  ;;  %v1999_v15 = vpack.c.bf16 %v4891_v62, %v4839_v3  ;;  %v1878_v43 = vmul.f32 %v1828_v50, %v5223_v41 }
 0x2a2   : > { %v5323_v56 = vpop.eup %3244  ;;  %v1879_v47 = vmul.f32 %v1829_v16, %v829_v53  ;;  %v1281_v25 = vadd.f32 1.4214138, %v1231_v59  ;;  %v934_v18 = vmul.f32 0.3275911, %v5314_v30  ;;  %v1926_v54 = vadd.f32 1.0, %v1876_v9  ;;  %v5985_v9 = vld [vmem:[#allocation31_spill] sm:$0xff] }
 0x2a3   : > { %v1132_v20 = vmul.f32 1.0614054, %v5323_v56  ;;  %v1583_v57 = vsub.f32 0.0, %v883_v45  ;;  %v5329_v5 = vmul.f32 0.70710677, %v5319_v0  ;;  %2220 = vmatprep.mubr.bf16.mxu1 %v1999_v15  ;;  %v1927_v8 = vadd.f32 1.0, %v1877_v21 }
 0x2a4   : > { %v1331_v13 = vmul.f32 %v5296_v61, %v1281_v25  ;;  %v1728_v3 = vmul.f32 1.442695, %v1632_v24  ;;  %v984_v62 = vadd.f32 1.0, %v934_v18  ;;  %v1480_v48 = vadd.f32 0.2548296, %v1430_v4  ;;  %v5986_v59 = vld [vmem:[#allocation17_spill] sm:$0xff] }
 0x2a5   : > { %3250 = vpow2.f32 %v1726_v36  ;;  %v1182_v41 = vadd.f32 -1.4531521, %v1132_v20  ;;  %v5333_v53 = vand.u32 2147483647, %v5329_v5  ;;  %v3247_v19 = vpop.eup %3246  ;;  %v1928_v12 = vadd.f32 1.0, %v1878_v43  ;;  %v5988_v4 = vld [vmem:[#allocation27_spill] sm:$0xff] }
 0x2a6   : > { %v1929_v26 = vadd.f32 1.0, %v1879_v47  ;;  %v1381_v60 = vadd.f32 -0.28449672, %v1331_v13  ;;  %3252 = vrcp.f32 %v984_v62  ;;  %v5336_v51 = vmul.f32 %v1926_v54, %v5146_v2  ;;  %v5990_v47 = vld [vmem:[#allocation28_spill] sm:$0xff] }
 0x2a7   : > { %v1232_v11 = vmul.f32 %v5323_v56, %v1182_v41  ;;  %v1633_v37 = vmul.f32 %v1583_v57, %v883_v45  ;;  %v935_v10 = vmul.f32 0.3275911, %v5333_v53  ;;  %v5341_v63 = vmul.f32 %v1927_v8, %v5172_v58 }
 0x2a8   : > { %v1431_v7 = vmul.f32 %v5296_v61, %v1381_v60  ;;  %3254 = vpow2.f32 %v1728_v3  ;;  %v1998_v6 = vpack.c.bf16 %v4853_v40, %v4808_v31  ;;  %v1530_v22 = vmul.f32 %v5258_v1, %v1480_v48  ;;  %v5987_v31 = vld [vmem:[#allocation25_spill] sm:$0xff] }
 0x2a9   : > { %v5346_v50 = vpop.eup %3248  ;;  %v1282_v2 = vadd.f32 1.4214138, %v1232_v11  ;;  %v985_v39 = vadd.f32 1.0, %v935_v10  ;;  %v2001_v45 = vpack.c.bf16 %v5984_v14, %v5028_v44  ;;  %v5352_v21 = vmul.f32 %v1928_v12, %v5985_v9  ;;  %v5991_v3 = vld [vmem:[#allocation45_spill] sm:$0xff] }
 0x2aa   : > { %v5355_v58 = vmul.f32 %v1929_v26, %v5271_v29  ;;  %v1133_v16 = vmul.f32 1.0614054, %v5346_v50  ;;  %2221 = vmatmul.mubr.bf16.gmra.mrb[24].mxu1 %v1998_v6  ;;  %v2000_v40 = vpack.c.bf16 %v5987_v31, %v5986_v59  ;;  %v1730_v1 = vmul.f32 1.442695, %v1633_v37  ;;  %v5989_v29 = vld [vmem:[#allocation15_spill] sm:$0xff] }
 0x2ab   : > { %v1332_v24 = vmul.f32 %v5323_v56, %v1282_v2  ;;  %3256 = vrcp.f32 %v985_v39  ;;  %2228 = vmatprep.mubr.bf16.mxu1 %v2001_v45  ;;  %v2003_v44 = vpack.c.bf16 %v5245_v55, %v5988_v4  ;;  %v1481_v36 = vadd.f32 0.2548296, %v1431_v7 }
 0x2ac   : > { %v1183_v15 = vadd.f32 -1.4531521, %v1133_v16  ;;  %v1584_v43 = vsub.f32 0.0, %v5314_v30  ;;  %v2002_v25 = vpack.c.bf16 %v5990_v47, %v5989_v29  ;;  %v1780_v18 = vmul.f32 %v3247_v19, %v1530_v22 }
 0x2ad   : > { %v1382_v54 = vadd.f32 -0.28449672, %v1332_v24  ;;  %v2005_v20 = vpack.c.bf16 %v5308_v28, %v5281_v33  ;;  %v2004_v57 = vpack.c.bf16 %v5285_v23, %v5261_v46  ;;  %v2007_v55 = vpack.c.bf16 %v5355_v58, %v5341_v63 }
 0x2ae   : > { %v1233_v8 = vmul.f32 %v5346_v50, %v1183_v15  ;;  %vm780_vm12 = vcmp.lt.f32.partialorder %v5991_v3, 0.0  ;;  %v2006_v48 = vpack.c.bf16 %v5352_v21, %v5336_v51  ;;  %v1531_v33 = vmul.f32 %v5296_v61, %v1481_v36 }
 0x2af   : > { %v3251_v13 = vpop.eup %3250  ;;  %v1432_v62 = vmul.f32 %v5323_v56, %v1382_v54  ;;  %3258 = vpow2.f32 %v1730_v1  ;;  %v1634_v19 = vmul.f32 %v1584_v43, %v5314_v30  ;;  %v1830_v12 = vsub.f32 1.0, %v1780_v18 }
 0x2b0   : > { %v5377_v41 = vpop.eup %3252  ;;  %v1283_v28 = vadd.f32 1.4214138, %v1233_v8  ;;  %v1585_v11 = vsub.f32 0.0, %v5333_v53  ;;  %v830_v7 = vsel %vm780_vm12, -1.0, %v5886_v35  ;;  %v1781_v61 = vmul.f32 %v3251_v13, %v1531_v33 }
 0x2b1   : > { %v1482_v26 = vadd.f32 0.2548296, %v1432_v62  ;;  %v1134_v60 = vmul.f32 1.0614054, %v5377_v41  ;;  %vm782_vm13 = vcmp.lt.f32.partialorder %v5248_v52, 0.0  ;;  %v1880_v14 = vmul.f32 %v1830_v12, %v830_v7 }
 0x2b2   : > { %v3255_v37 = vpop.eup %3254  ;;  %v1333_v10 = vmul.f32 %v5346_v50, %v1283_v28  ;;  %2229 = vmatmul.mubr.bf16.gmra.mrb[28].mxu1 %v2000_v40  ;;  %v1732_v2 = vmul.f32 1.442695, %v1634_v19  ;;  %v1635_v16 = vmul.f32 %v1585_v11, %v5333_v53  ;;  %vm781_vm14 = vcmp.lt.f32.partialorder %v5218_v34, 0.0  ;;  %v5992_v53 = vld [vmem:[#allocation30_spill] sm:$0xff] }
 0x2b3   : > { %v1532_v6 = vmul.f32 %v5323_v56, %v1482_v26  ;;  %v1184_v22 = vadd.f32 -1.4531521, %v1134_v60  ;;  %2236 = vmatprep.mubr.bf16.mxu1 %v2003_v44  ;;  %v832_v56 = vsel %vm782_vm13, -1.0, %v5886_v35  ;;  %v1831_v1 = vsub.f32 1.0, %v1781_v61 }
 0x2b4   : > { %v1383_v30 = vadd.f32 -0.28449672, %v1333_v10  ;;  %3260 = vpow2.f32 %v1732_v2  ;;  %v1930_v44 = vadd.f32 1.0, %v1880_v14  ;;  %v1734_v43 = vmul.f32 1.442695, %v1635_v16 }
 0x2b5   : > { %v3257_v39 = vpop.eup %3256  ;;  %v1782_v45 = vmul.f32 %v3255_v37, %v1532_v6  ;;  %v1234_v9 = vmul.f32 %v5377_v41, %v1184_v22  ;;  %v680_v47 = vmul.f32 0.5, %v5992_v53  ;;  %v831_v8 = vsel %vm781_vm14, -1.0, %v5886_v35 }
 0x2b6   : > { %v1433_v59 = vmul.f32 %v5346_v50, %v1383_v30  ;;  %v1135_v31 = vmul.f32 1.0614054, %v3257_v39  ;;  %v682_v13 = vmul.f32 0.5, %v5236_v42  ;;  %v1881_v33 = vmul.f32 %v1831_v1, %v831_v8  ;;  %v3316_v8 = vld [vmem:[%s3733_s11 + $0x10] sm:$0xff] }
 0x2b7   : > { %v1832_v40 = vsub.f32 1.0, %v1782_v45  ;;  %v1284_v24 = vadd.f32 1.4214138, %v1234_v9  ;;  %vm783_vm15 = vcmp.lt.f32.partialorder %v5274_v32, 0.0  ;;  %v1980_v12 = vmul.f32 %v1930_v44, %v680_v47  ;;  %v3315_v44 = vld [vmem:[%s3733_s11 + $0x8] sm:$0xff] }
 0x2b8   : > { %v1483_v52 = vadd.f32 0.2548296, %v1433_v59  ;;  %v1185_v4 = vadd.f32 -1.4531521, %v1135_v31  ;;  %3262 = vpow2.f32 %v1734_v43  ;;  %v833_v34 = vsel %vm783_vm15, -1.0, %v5886_v35 }
 0x2b9   : > { %v1882_v36 = vmul.f32 %v1832_v40, %v832_v56  ;;  %v1334_v15 = vmul.f32 %v5377_v41, %v1284_v24  ;;  %v3259_v29 = vpop.eup %3258  ;;  %v1931_v42 = vadd.f32 1.0, %v1881_v33  ;;  %v681_v32 = vmul.f32 0.5, %v5208_v17 }
 0x2ba   : > { %v1533_v18 = vmul.f32 %v5346_v50, %v1483_v52  ;;  %v1235_v54 = vmul.f32 %v3257_v39, %v1185_v4  ;;  %2237 = vmatmul.mubr.bf16.gmra.mrb[32].mxu1 %v2002_v25  ;;  %v683_v22 = vmul.f32 0.5, %v5256_v49  ;;  %vm784_vm0 = vcmp.lt.f32.partialorder %v5303_v27, 0.0  ;;  %v3314_v52 = vld [vmem:[%s3733_s11] sm:$0xff] }
 0x2bb   : > { %v1932_v3 = vadd.f32 1.0, %v1882_v36  ;;  %v1384_v62 = vadd.f32 -0.28449672, %v1334_v15  ;;  %2244 = vmatprep.mubr.bf16.mxu1 %v2005_v20  ;;  %v1981_v2 = vmul.f32 %v1931_v42, %v681_v32  ;;  %vm785_vm1 = vcmp.lt.f32.partialorder %v5329_v5, 0.0  ;;  %v3319_v42 = vld [vmem:[%s3733_s11 + $0x28] sm:$0xff] }
 0x2bc   : > { %v1783_v28 = vmul.f32 %v3259_v29, %v1533_v18  ;;  %v1285_v19 = vadd.f32 1.4214138, %v1235_v54  ;;  %v834_v46 = vsel %vm784_vm0, -1.0, %v5886_v35  ;;  %v835_v23 = vsel %vm785_vm1, -1.0, %v5886_v35 }
 0x2bd   : > { %v1982_v26 = vmul.f32 %v1932_v3, %v682_v13  ;;  %v1434_v50 = vmul.f32 %v5377_v41, %v1384_v62  ;;  %v684_v5 = vmul.f32 0.5, %v5294_v38  ;;  %v3317_v62 = vld [vmem:[%s3733_s11 + $0x18] sm:$0xff] }
 0x2be   : > { %v1833_v25 = vsub.f32 1.0, %v1783_v28  ;;  %v1335_v60 = vmul.f32 %v3257_v39, %v1285_v19  ;;  %v3261_v6 = vpop.eup %3260 }
 0x2bf   : > { %v1484_v11 = vadd.f32 0.2548296, %v1434_v50  ;;  %v2008_v37 = vpack.c.bf16 %v1982_v26, %v1980_v12 }
 0x2c0   : > { %v1883_v10 = vmul.f32 %v1833_v25, %v833_v34  ;;  %v1385_v7 = vadd.f32 -0.28449672, %v1335_v60  ;;  %v3318_v34 = vld [vmem:[%s3733_s11 + $0x20] sm:$0xff] }
 0x2c1   : > { %v1534_v20 = vmul.f32 %v5377_v41, %v1484_v11 }
 0x2c2   : > { %v1933_v61 = vadd.f32 1.0, %v1883_v10  ;;  %v1435_v30 = vmul.f32 %v3257_v39, %v1385_v7  ;;  %2245 = vmatmul.mubr.bf16.gmra.mrb[36].mxu1 %v2004_v57  ;;  %v3263_v59 = vpop.eup %3262  ;;  %v685_v57 = vmul.f32 0.5, %v5319_v0  ;;  %v5423_v0 = vld [vmem:[%s5844_s4] ss:$0 sm:$0xff] }
 0x2c3   : > { %2252 = vmatprep.mubr.bf16.mxu1 %v2007_v55  ;;  %v1784_v45 = vmul.f32 %v3261_v6, %v1534_v20 }
 0x2c4   : > { %v1983_v14 = vmul.f32 %v1933_v61, %v683_v22  ;;  %v1485_v9 = vadd.f32 0.2548296, %v1435_v30 }
 0x2c5   : > { %v1834_v17 = vsub.f32 1.0, %v1784_v45 }
 0x2c6   : > { %v1535_v41 = vmul.f32 %v3257_v39, %v1485_v9  ;;  %v2009_v16 = vpack.c.bf16 %v1983_v14, %v1981_v2  ;;  %v3320_v2 = vld [vmem:[%s3733_s11 + $0x30] sm:$0xff]  ;;  %v3321_v9 = vld [vmem:[%s3733_s11 + $0x38] sm:$0xff] }
 0x2c7   : > { %v1884_v63 = vmul.f32 %v1834_v17, %v834_v46 }
 0x2c8   : > { %v1785_v49 = vmul.f32 %v3263_v59, %v1535_v41 }
 0x2c9   : > { %v1934_v39 = vadd.f32 1.0, %v1884_v63  ;;  %v3322_v63 = vld [vmem:[%s3733_s11 + $0x40] sm:$0xff] }
 0x2ca   : > { %v1835_v31 = vsub.f32 1.0, %v1785_v49  ;;  %2253 = vmatmul.mubr.bf16.gmra.mrb[40].mxu1 %v2006_v48 }
 0x2cb   : > { %2260 = vmatprep.mubr.bf16.mxu1 %v2009_v16  ;;  %v1984_v51 = vmul.f32 %v1934_v39, %v684_v5 }
 0x2cc   : > { %v1885_v58 = vmul.f32 %v1835_v31, %v835_v23 }
 0x2cd   : > { %v2010_v21 = vpack.c.bf16 %v1984_v51, %v1984_v51 }
 0x2ce   : > { %v1935_v55 = vadd.f32 1.0, %v1885_v58 }
 0x2d0   : > { %v1985_v27 = vmul.f32 %v1935_v55, %v685_v57  ;;  %v3323_v55 = vld [vmem:[%s3733_s11 + $0x48] sm:$0xff] }
 0x2d2   : > { %2261 = vmatmul.mubr.bf16.gmra.mrb[44].mxu1 %v2008_v37  ;;  %v2011_v56 = vpack.c.bf16 %v1985_v27, %v1985_v27 }
 0x2d4   : > { %2268 = vmatprep.mubr.bf16.mxu1 %v2011_v56 }
 0x2da   : > { %2269 = vmatmul.mubr.bf16.gmra.mrb[48].mxu1 %v2010_v21 }
 0x301   : > { %v2869_v48 = vpop.f32.mrb[0].mxu1 }
 0x302   : > { %v2870_v35 = vpop.f32.mrb[1].mxu1 }
 0x303   : > { %v2871_v40 = vadd.f32 %v2870_v35, %v2869_v48  ;;  %v2872_v24 = vpop.f32.mrb[2].mxu1 }
 0x304   : > { %v2873_v1 = vpop.f32.mrb[3].mxu1 }
 0x305   : > { %v2276_v38 = vadd.f32 %v3314_v52, %v2871_v40  ;;  %v2874_v4 = vadd.f32 %v2873_v1, %v2872_v24  ;;  %v3324_v40 = vld [vmem:[%s3733_s11 + $0x50] sm:$0xff]  ;;  %v3325_v52 = vld [vmem:[%s3733_s11 + $0x58] sm:$0xff] }
 0x307   : > { %v2277_v36 = vadd.f32 %v3315_v44, %v2874_v4  ;;  %v5428_v15 = vadd.f32 %v5423_v0, %v2276_v38 }
 0x309   : > { %v2875_v43 = vpop.f32.mrb[4].mxu1  ;;  %2335 = vadd.xlane.f32.xlu0 %v5428_v15  ;;  %v5432_v18 = vadd.f32 %v5423_v0, %v2277_v36 }
 0x30a   : > { %v2876_v29 = vpop.f32.mrb[5].mxu1 }
 0x30b   : > { %v2877_v53 = vadd.f32 %v2876_v29, %v2875_v43  ;;  %v2878_v47 = vpop.f32.mrb[6].mxu1 }
 0x30c   : > { %v2879_v54 = vpop.f32.mrb[7].mxu1 }
 0x30d   : > { %v2278_v13 = vadd.f32 %v3316_v8, %v2877_v53  ;;  %v2880_v3 = vadd.f32 %v2879_v54, %v2878_v47  ;;  %2337 = vadd.xlane.f32.xlu0 %v5432_v18  ;;  %v3326_v54 = vld [vmem:[%s3733_s11 + $0x60] sm:$0xff] }
 0x30f   : > { %v2279_v33 = vadd.f32 %v3317_v62, %v2880_v3  ;;  %v5438_v28 = vadd.f32 %v5423_v0, %v2278_v13  ;;  %v3327_v3 = vld [vmem:[%s3733_s11 + $0x68] sm:$0xff] }
 0x311   : > { %2339 = vadd.xlane.f32.xlu1 %v5438_v28  ;;  %v5442_v19 = vadd.f32 %v5423_v0, %v2279_v33 }
 0x315   : > { %2341 = vadd.xlane.f32.xlu1 %v5442_v19 }
 0x31b   : > { %v2881_v12 = vpop.f32.mrb[8].mxu1 }
 0x31c   : > { %v2882_v26 = vpop.f32.mrb[9].mxu1 }
 0x31d   : > { %v2883_v50 = vadd.f32 %v2882_v26, %v2881_v12  ;;  %v2884_v25 = vpop.f32.mrb[10].mxu1 }
 0x31e   : > { %v2885_v60 = vpop.f32.mrb[11].mxu1 }
 0x31f   : > { %v2280_v11 = vadd.f32 %v3318_v34, %v2883_v50  ;;  %v2886_v37 = vadd.f32 %v2885_v60, %v2884_v25 }
 0x321   : > { %v2281_v10 = vadd.f32 %v3319_v42, %v2886_v37  ;;  %v5448_v7 = vadd.f32 %v5423_v0, %v2280_v11  ;;  %v3328_v11 = vld [vmem:[%s3733_s11 + $0x70] sm:$0xff] }
 0x323   : > { %2343 = vadd.xlane.f32.xlu0 %v5448_v7  ;;  %v5452_v20 = vadd.f32 %v5423_v0, %v2281_v10  ;;  %v3329_v10 = vld [vmem:[%s3733_s11 + $0x78] sm:$0xff] }
 0x325   : > { %2345 = vadd.xlane.f32.xlu1 %v5452_v20 }
 0x33e   : > { %v2887_v6 = vpop.f32.mrb[12].mxu1 }
 0x33f   : > { %v2888_v32 = vpop.f32.mrb[13].mxu1 }
 0x340   : > { %v2889_v22 = vadd.f32 %v2888_v32, %v2887_v6  ;;  %v2890_v61 = vpop.f32.mrb[14].mxu1 }
 0x341   : > { %v2891_v30 = vpop.f32.mrb[15].mxu1 }
 0x342   : > { %v2282_v14 = vadd.f32 %v3320_v2, %v2889_v22  ;;  %v2892_v45 = vadd.f32 %v2891_v30, %v2890_v61 }
 0x344   : > { %v2283_v41 = vadd.f32 %v3321_v9, %v2892_v45  ;;  %v5458_v16 = vadd.f32 %v5423_v0, %v2282_v14  ;;  %v3330_v9 = vld [vmem:[%s3733_s11 + $0x80] sm:$0xff] }
 0x346   : > { %2347 = vadd.xlane.f32.xlu0 %v5458_v16  ;;  %v5462_v59 = vadd.f32 %v5423_v0, %v2283_v41 }
 0x348   : > { %2349 = vadd.xlane.f32.xlu1 %v5462_v59 }
 0x351   : > { %v2893_v17 = vpop.f32.mrb[16].mxu1 }
 0x352   : > { %v2894_v49 = vpop.f32.mrb[17].mxu1 }
 0x353   : > { %v2895_v31 = vadd.f32 %v2894_v49, %v2893_v17  ;;  %v2896_v46 = vpop.f32.mrb[18].mxu1  ;;  %v3331_v49 = vld [vmem:[%s3733_s11 + $0x88] sm:$0xff] }
 0x354   : > { %v2897_v23 = vpop.f32.mrb[19].mxu1 }
 0x355   : > { %v2284_v58 = vadd.f32 %v3322_v63, %v2895_v31  ;;  %v2898_v57 = vadd.f32 %v2897_v23, %v2896_v46 }
 0x357   : > { %v2285_v27 = vadd.f32 %v3323_v55, %v2898_v57  ;;  %v5468_v39 = vadd.f32 %v5423_v0, %v2284_v58 }
 0x359   : > { %2351 = vadd.xlane.f32.xlu0 %v5468_v39  ;;  %v5472_v5 = vadd.f32 %v5423_v0, %v2285_v27 }
 0x35b   : > { %2353 = vadd.xlane.f32.xlu1 %v5472_v5 }
 0x373   : > { %v2899_v56 = vpop.f32.mrb[20].mxu1 }
 0x374   : > { %v2900_v51 = vpop.f32.mrb[21].mxu1 }
 0x375   : > { %v2901_v21 = vadd.f32 %v2900_v51, %v2899_v56  ;;  %v2902_v48 = vpop.f32.mrb[22].mxu1  ;;  %v3332_v56 = vld [vmem:[%s3733_s11 + $0x90] sm:$0xff] }
 0x376   : > { %v2903_v35 = vpop.f32.mrb[23].mxu1 }
 0x377   : > { %v2286_v24 = vadd.f32 %v3324_v40, %v2901_v21  ;;  %v2904_v1 = vadd.f32 %v2903_v35, %v2902_v48  ;;  %v3333_v48 = vld [vmem:[%s3733_s11 + $0x98] sm:$0xff] }
 0x379   : > { %v2287_v38 = vadd.f32 %v3325_v52, %v2904_v1  ;;  %v5478_v4 = vadd.f32 %v5423_v0, %v2286_v24 }
 0x37b   : > { %2355 = vadd.xlane.f32.xlu0 %v5478_v4  ;;  %v5482_v44 = vadd.f32 %v5423_v0, %v2287_v38 }
 0x37d   : > { %v2905_v36 = vpop.f32.mrb[24].mxu1  ;;  %2357 = vadd.xlane.f32.xlu1 %v5482_v44 }
 0x37e   : > { %v2906_v43 = vpop.f32.mrb[25].mxu1 }
 0x37f   : > { %v2907_v29 = vadd.f32 %v2906_v43, %v2905_v36  ;;  %v2908_v53 = vpop.f32.mrb[26].mxu1 }
 0x380   : > { %v2909_v47 = vpop.f32.mrb[27].mxu1 }
 0x381   : > { %v2288_v8 = vadd.f32 %v3326_v54, %v2907_v29  ;;  %v2910_v13 = vadd.f32 %v2909_v47, %v2908_v53  ;;  %v3334_v29 = vld [vmem:[%s3733_s11 + $0xa0] sm:$0xff]  ;;  %v3335_v54 = vld [vmem:[%s3733_s11 + $0xa8] sm:$0xff] }
 0x383   : > { %v2289_v62 = vadd.f32 %v3327_v3, %v2910_v13  ;;  %v5488_v33 = vadd.f32 %v5423_v0, %v2288_v8 }
 0x385   : > { %v2911_v12 = vpop.f32.mrb[28].mxu1  ;;  %2359 = vadd.xlane.f32.xlu0 %v5488_v33  ;;  %v5492_v26 = vadd.f32 %v5423_v0, %v2289_v62 }
 0x386   : > { %v2912_v50 = vpop.f32.mrb[29].mxu1 }
 0x387   : > { %v2913_v25 = vadd.f32 %v2912_v50, %v2911_v12  ;;  %v2914_v60 = vpop.f32.mrb[30].mxu1  ;;  %2361 = vadd.xlane.f32.xlu1 %v5492_v26 }
 0x388   : > { %v2915_v34 = vpop.f32.mrb[31].mxu1 }
 0x389   : > { %v2290_v37 = vadd.f32 %v3328_v11, %v2913_v25  ;;  %v2916_v42 = vadd.f32 %v2915_v34, %v2914_v60 }
 0x38b   : > { %v2291_v6 = vadd.f32 %v3329_v10, %v2916_v42  ;;  %v5498_v32 = vadd.f32 %v5423_v0, %v2290_v37  ;;  %v3336_v42 = vld [vmem:[%s3733_s11 + $0xb0] sm:$0xff] }
 0x38d   : > { %v2917_v22 = vpop.f32.mrb[32].mxu1  ;;  %2363 = vadd.xlane.f32.xlu0 %v5498_v32  ;;  %v5502_v61 = vadd.f32 %v5423_v0, %v2291_v6 }
 0x38e   : > { %v2918_v30 = vpop.f32.mrb[33].mxu1 }
 0x38f   : > { %v2919_v2 = vadd.f32 %v2918_v30, %v2917_v22  ;;  %v2920_v14 = vpop.f32.mrb[34].mxu1  ;;  %2365 = vadd.xlane.f32.xlu1 %v5502_v61  ;;  %v3337_v30 = vld [vmem:[%s3733_s11 + $0xb8] sm:$0xff] }
 0x390   : > { %v2921_v45 = vpop.f32.mrb[35].mxu1 }
 0x391   : > { %v2292_v41 = vadd.f32 %v3330_v9, %v2919_v2  ;;  %v2922_v17 = vadd.f32 %v2921_v45, %v2920_v14 }
 0x393   : > { %v2293_v31 = vadd.f32 %v3331_v49, %v2922_v17  ;;  %v5508_v46 = vadd.f32 %v5423_v0, %v2292_v41 }
 0x395   : > { %v2923_v23 = vpop.f32.mrb[36].mxu1  ;;  %2367 = vadd.xlane.f32.xlu0 %v5508_v46  ;;  %v5512_v63 = vadd.f32 %v5423_v0, %v2293_v31 }
 0x396   : > { %v2924_v58 = vpop.f32.mrb[37].mxu1  ;;  %v2336_v3 = vpop.xlane.xlu0 %2335 }
 0x397   : > { %v2925_v57 = vadd.f32 %v2924_v58, %v2923_v23  ;;  %v2926_v55 = vpop.f32.mrb[38].mxu1  ;;  %2369 = vadd.xlane.f32.xlu1 %v5512_v63  ;;  %v2386_v34 = vmul.f32 0.0078125, %v2336_v3 }
 0x398   : > { %v2927_v27 = vpop.f32.mrb[39].mxu1 }
 0x399   : > { %v2294_v51 = vadd.f32 %v3332_v56, %v2925_v57  ;;  %v2928_v21 = vadd.f32 %v2927_v27, %v2926_v55  ;;  %v5541_v45 = vsub.f32 %v5428_v15, %v2386_v34 }
 0x39a   : > { %v2338_v22 = vpop.xlane.xlu0 %2337 }
 0x39b   : > { %v2295_v35 = vadd.f32 %v3333_v48, %v2928_v21  ;;  %v5518_v40 = vadd.f32 %v5423_v0, %v2294_v51  ;;  %v2387_v49 = vmul.f32 0.0078125, %v2338_v22  ;;  %v2436_v55 = vmul.f32 %v5541_v45, %v5541_v45  ;;  %v3338_v51 = vld [vmem:[%s3733_s11 + $0xc0] sm:$0xff]  ;;  %s5792_s11 = scalar_lea.hbm %s5847_s7, %s2852_s23 }
 0x39d   : > { %v2929_v24 = vpop.f32.mrb[40].mxu1  ;;  %2371 = vadd.xlane.f32.xlu0 %v5518_v40  ;;  %v5522_v1 = vadd.f32 %v5423_v0, %v2295_v35  ;;  %v5555_v48 = vsub.f32 %v5432_v18, %v2387_v49 }
 0x39e   : > { %v2930_v52 = vpop.f32.mrb[41].mxu1  ;;  %v2340_v37 = vpop.xlane.xlu1 %2339 }
 0x39f   : > { %v2931_v38 = vadd.f32 %v2930_v52, %v2929_v24  ;;  %v2932_v36 = vpop.f32.mrb[42].mxu1  ;;  %2373 = vadd.xlane.f32.xlu1 %v5522_v1  ;;  %v2388_v9 = vmul.f32 0.0078125, %v2340_v37 }
 0x3a0   : > { %v2933_v43 = vpop.f32.mrb[43].mxu1 }
 0x3a1   : > { %v2296_v53 = vadd.f32 %v3334_v29, %v2931_v38  ;;  %v2934_v47 = vadd.f32 %v2933_v43, %v2932_v36  ;;  %v5551_v15 = vsub.f32 %v5438_v28, %v2388_v9  ;;  %v2437_v43 = vmul.f32 %v5555_v48, %v5555_v48 }
 0x3a2   : > { %v2342_v23 = vpop.xlane.xlu1 %2341 }
 0x3a3   : > { %v2297_v8 = vadd.f32 %v3335_v54, %v2934_v47  ;;  %v5528_v13 = vadd.f32 %v5423_v0, %v2296_v53  ;;  %v2389_v35 = vmul.f32 0.0078125, %v2342_v23  ;;  %v2438_v36 = vmul.f32 %v5551_v15, %v5551_v15 }
 0x3a5   : > { %v2935_v62 = vpop.f32.mrb[44].mxu1  ;;  %2375 = vadd.xlane.f32.xlu0 %v5528_v13  ;;  %v5532_v12 = vadd.f32 %v5423_v0, %v2297_v8  ;;  %v5569_v18 = vsub.f32 %v5442_v19, %v2389_v35 }
 0x3a6   : > { %v2936_v50 = vpop.f32.mrb[45].mxu1 }
 0x3a7   : > { %v2937_v25 = vadd.f32 %v2936_v50, %v2935_v62  ;;  %v2938_v60 = vpop.f32.mrb[46].mxu1  ;;  %2377 = vadd.xlane.f32.xlu1 %v5532_v12 }
 0x3a8   : > { %v2939_v11 = vpop.f32.mrb[47].mxu1 }
 0x3a9   : > { %v2298_v10 = vadd.f32 %v3336_v42, %v2937_v25  ;;  %v2940_v6 = vadd.f32 %v2939_v11, %v2938_v60 }
 0x3ab   : > { %v2299_v2 = vadd.f32 %v3337_v30, %v2940_v6  ;;  %v5538_v14 = vadd.f32 %v5423_v0, %v2298_v10 }
 0x3ad   : > { %v2941_v41 = vpop.f32.mrb[48].mxu1  ;;  %2379 = vadd.xlane.f32.xlu0 %v5538_v14  ;;  %v5545_v17 = vadd.f32 %v5423_v0, %v2299_v2 }
 0x3ae   : > { %v2942_v31 = vpop.f32.mrb[49].mxu1 }
 0x3af   : > { %v2943_v58 = vadd.f32 %v2942_v31, %v2941_v41  ;;  %v2944_v57 = vpop.f32.mrb[50].mxu1  ;;  %2381 = vadd.xlane.f32.xlu1 %v5545_v17 }
 0x3b0   : > { %v2945_v27 = vpop.f32.mrb[51].mxu1  ;;  %v2344_v56 = vpop.xlane.xlu0 %2343 }
 0x3b1   : > { %v2300_v21 = vadd.f32 %v3338_v51, %v2943_v58  ;;  %v2390_v24 = vmul.f32 0.0078125, %v2344_v56 }
 0x3b2   : > { %v2346_v52 = vpop.xlane.xlu1 %2345 }
 0x3b3   : > { %v5558_v38 = vadd.f32 %v5423_v0, %v2300_v21  ;;  %2461 = vadd.xlane.f32.xlu1 %v2436_v55  ;;  %v5563_v28 = vsub.f32 %v5448_v7, %v2390_v24  ;;  %v2391_v29 = vmul.f32 0.0078125, %v2346_v52  ;;  %v2439_v7 = vmul.f32 %v5569_v18, %v5569_v18 }
 0x3b5   : > { %2383 = vadd.xlane.f32.xlu0 %v5558_v38  ;;  %v2440_v0 = vmul.f32 %v5563_v28, %v5563_v28  ;;  %v5574_v53 = vsub.f32 %v5452_v20, %v2391_v29 }
 0x3b7   : > { %2465 = vadd.xlane.f32.xlu1 %v2438_v36  ;;  %v2441_v47 = vmul.f32 %v5574_v53, %v5574_v53 }
 0x3b9   : > { %2463 = vadd.xlane.f32.xlu0 %v2437_v43 }
 0x3bb   : > { %2469 = vadd.xlane.f32.xlu1 %v2440_v0 }
 0x3bd   : > { %2467 = vadd.xlane.f32.xlu0 %v2439_v7 }
 0x3c1   : > { %2471 = vadd.xlane.f32.xlu0 %v2441_v47 }
 0x3d3   : > { %v2348_v19 = vpop.xlane.xlu0 %2347 }
 0x3d4   : > { %v2392_v54 = vmul.f32 0.0078125, %v2348_v19 }
 0x3d5   : > { %v2350_v8 = vpop.xlane.xlu1 %2349 }
 0x3d6   : > { %v5581_v3 = vsub.f32 %v5458_v16, %v2392_v54  ;;  %v2393_v62 = vmul.f32 0.0078125, %v2350_v8 }
 0x3d8   : > { %v5584_v50 = vsub.f32 %v5462_v59, %v2393_v62  ;;  %v2442_v20 = vmul.f32 %v5581_v3, %v5581_v3 }
 0x3da   : > { %2473 = vadd.xlane.f32.xlu1 %v2442_v20  ;;  %v2443_v25 = vmul.f32 %v5584_v50, %v5584_v50 }
 0x3dc   : > { %2475 = vadd.xlane.f32.xlu0 %v2443_v25 }
 0x3e6   : > { %v2352_v60 = vpop.xlane.xlu0 %2351 }
 0x3e7   : > { %v2394_v34 = vmul.f32 0.0078125, %v2352_v60 }
 0x3e8   : > { %v2354_v11 = vpop.xlane.xlu1 %2353 }
 0x3e9   : > { %v5591_v37 = vsub.f32 %v5468_v39, %v2394_v34  ;;  %v2395_v16 = vmul.f32 0.0078125, %v2354_v11 }
 0x3eb   : > { %v5594_v42 = vsub.f32 %v5472_v5, %v2395_v16  ;;  %v2444_v59 = vmul.f32 %v5591_v37, %v5591_v37 }
 0x3ed   : > { %2477 = vadd.xlane.f32.xlu1 %v2444_v59  ;;  %v2445_v10 = vmul.f32 %v5594_v42, %v5594_v42 }
 0x3ef   : > { %2479 = vadd.xlane.f32.xlu0 %v2445_v10 }
 0x408   : > { %v2356_v6 = vpop.xlane.xlu0 %2355 }
 0x409   : > { %v2396_v22 = vmul.f32 0.0078125, %v2356_v6 }
 0x40a   : > { %v2358_v30 = vpop.xlane.xlu1 %2357 }
 0x40b   : > { %v5601_v2 = vsub.f32 %v5478_v4, %v2396_v22  ;;  %v2397_v39 = vmul.f32 0.0078125, %v2358_v30 }
 0x40d   : > { %v5604_v9 = vsub.f32 %v5482_v44, %v2397_v39  ;;  %v2446_v5 = vmul.f32 %v5601_v2, %v5601_v2 }
 0x40f   : > { %2481 = vadd.xlane.f32.xlu1 %v2446_v5  ;;  %v2447_v41 = vmul.f32 %v5604_v9, %v5604_v9 }
 0x411   : > { %2483 = vadd.xlane.f32.xlu0 %v2447_v41 }
 0x412   : > { %v2360_v49 = vpop.xlane.xlu0 %2359 }
 0x413   : > { %v2398_v31 = vmul.f32 0.0078125, %v2360_v49 }
 0x414   : > { %v2362_v23 = vpop.xlane.xlu1 %2361 }
 0x415   : > { %v5611_v58 = vsub.f32 %v5488_v33, %v2398_v31  ;;  %v2399_v4 = vmul.f32 0.0078125, %v2362_v23 }
 0x417   : > { %v5614_v57 = vsub.f32 %v5492_v26, %v2399_v4  ;;  %v2448_v44 = vmul.f32 %v5611_v58, %v5611_v58 }
 0x419   : > { %2485 = vadd.xlane.f32.xlu1 %v2448_v44  ;;  %v2449_v55 = vmul.f32 %v5614_v57, %v5614_v57 }
 0x41a   : > { %v2364_v27 = vpop.xlane.xlu0 %2363 }
 0x41b   : > { %v2400_v56 = vmul.f32 0.0078125, %v2364_v27  ;;  %2487 = vadd.xlane.f32.xlu0 %v2449_v55 }
 0x41c   : > { %v2366_v51 = vpop.xlane.xlu1 %2365 }
 0x41d   : > { %v5621_v21 = vsub.f32 %v5498_v32, %v2400_v56  ;;  %v2401_v33 = vmul.f32 0.0078125, %v2366_v51 }
 0x41f   : > { %v5624_v35 = vsub.f32 %v5502_v61, %v2401_v33  ;;  %v2450_v26 = vmul.f32 %v5621_v21, %v5621_v21 }
 0x421   : > { %2489 = vadd.xlane.f32.xlu1 %v2450_v26  ;;  %v2451_v24 = vmul.f32 %v5624_v35, %v5624_v35 }
 0x422   : > { %v2368_v52 = vpop.xlane.xlu0 %2367 }
 0x423   : > { %v2402_v36 = vmul.f32 0.0078125, %v2368_v52  ;;  %2491 = vadd.xlane.f32.xlu0 %v2451_v24 }
 0x424   : > { %v2370_v43 = vpop.xlane.xlu1 %2369 }
 0x425   : > { %v5631_v29 = vsub.f32 %v5508_v46, %v2402_v36  ;;  %v2403_v32 = vmul.f32 0.0078125, %v2370_v43 }
 0x427   : > { %v5634_v0 = vsub.f32 %v5512_v63, %v2403_v32  ;;  %v2452_v61 = vmul.f32 %v5631_v29, %v5631_v29 }
 0x429   : > { %2493 = vadd.xlane.f32.xlu1 %v2452_v61  ;;  %v2453_v7 = vmul.f32 %v5634_v0, %v5634_v0 }
 0x42a   : > { %v2372_v47 = vpop.xlane.xlu0 %2371 }
 0x42b   : > { %v2404_v19 = vmul.f32 0.0078125, %v2372_v47  ;;  %2495 = vadd.xlane.f32.xlu0 %v2453_v7 }
 0x42c   : > { %v2374_v54 = vpop.xlane.xlu1 %2373 }
 0x42d   : > { %v5641_v8 = vsub.f32 %v5518_v40, %v2404_v19  ;;  %v2405_v46 = vmul.f32 0.0078125, %v2374_v54  ;;  %v5684_v54 = vld [vmem:[%s5846_s6] ss:$0 sm:$0xff] }
 0x42f   : > { %v5644_v62 = vsub.f32 %v5522_v1, %v2405_v46  ;;  %v2454_v63 = vmul.f32 %v5641_v8, %v5641_v8 }
 0x431   : > { %2497 = vadd.xlane.f32.xlu1 %v2454_v63  ;;  %v2455_v20 = vmul.f32 %v5644_v62, %v5644_v62 }
 0x432   : > { %v2376_v25 = vpop.xlane.xlu0 %2375 }
 0x433   : > { %v2406_v60 = vmul.f32 0.0078125, %v2376_v25  ;;  %2499 = vadd.xlane.f32.xlu0 %v2455_v20 }
 0x434   : > { %v2378_v34 = vpop.xlane.xlu1 %2377 }
 0x435   : > { %v5651_v11 = vsub.f32 %v5528_v13, %v2406_v60  ;;  %v2407_v40 = vmul.f32 0.0078125, %v2378_v34 }
 0x437   : > { %v5654_v16 = vsub.f32 %v5532_v12, %v2407_v40  ;;  %v2456_v1 = vmul.f32 %v5651_v11, %v5651_v11 }
 0x439   : > { %2501 = vadd.xlane.f32.xlu1 %v2456_v1  ;;  %v2457_v59 = vmul.f32 %v5654_v16, %v5654_v16 }
 0x43a   : > { %v2380_v10 = vpop.xlane.xlu0 %2379 }
 0x43b   : > { %v2408_v6 = vmul.f32 0.0078125, %v2380_v10  ;;  %2503 = vadd.xlane.f32.xlu0 %v2457_v59 }
 0x43c   : > { %v2382_v22 = vpop.xlane.xlu1 %2381 }
 0x43d   : > { %v5661_v30 = vsub.f32 %v5538_v14, %v2408_v6  ;;  %v2409_v13 = vmul.f32 0.0078125, %v2382_v22 }
 0x43f   : > { %v5664_v39 = vsub.f32 %v5545_v17, %v2409_v13  ;;  %v2458_v12 = vmul.f32 %v5661_v30, %v5661_v30 }
 0x440   : > { %v2462_v5 = vpop.xlane.xlu1 %2461 }
 0x441   : > { %2505 = vadd.xlane.f32.xlu1 %v2458_v12  ;;  %v2459_v41 = vmul.f32 %v5664_v39, %v5664_v39  ;;  %v2511_v49 = vmul.f32 0.0078125, %v2462_v5 }
 0x442   : > { %v2384_v31 = vpop.xlane.xlu0 %2383 }
 0x443   : > { %v2410_v23 = vmul.f32 0.0078125, %v2384_v31  ;;  %2507 = vadd.xlane.f32.xlu0 %v2459_v41  ;;  %v2536_v4 = vadd.f32 1e-05, %v2511_v49 }
 0x444   : > { %v2466_v44 = vpop.xlane.xlu1 %2465 }
 0x445   : > { %v5671_v14 = vsub.f32 %v5558_v38, %v2410_v23  ;;  %3264 = vrsqrt.f32 %v2536_v4  ;;  %v2513_v17 = vmul.f32 0.0078125, %v2466_v44  ;;  %v5678_v38 = vld [vmem:[%s5845_s5] ss:$0 sm:$0xff] }
 0x446   : > { %v2464_v55 = vpop.xlane.xlu0 %2463 }
 0x447   : > { %v2460_v27 = vmul.f32 %v5671_v14, %v5671_v14  ;;  %v2512_v56 = vmul.f32 0.0078125, %v2464_v55  ;;  %v2538_v51 = vadd.f32 1e-05, %v2513_v17 }
 0x448   : > { %v2470_v33 = vpop.xlane.xlu1 %2469 }
 0x449   : > { %2509 = vadd.xlane.f32.xlu1 %v2460_v27  ;;  %v2537_v26 = vadd.f32 1e-05, %v2512_v56  ;;  %3266 = vrsqrt.f32 %v2538_v51  ;;  %v2515_v24 = vmul.f32 0.0078125, %v2470_v33 }
 0x44a   : > { %v2468_v52 = vpop.xlane.xlu0 %2467 }
 0x44b   : > { %3268 = vrsqrt.f32 %v2537_v26  ;;  %v2514_v36 = vmul.f32 0.0078125, %v2468_v52  ;;  %v2540_v43 = vadd.f32 1e-05, %v2515_v24 }
 0x44d   : > { %v2539_v32 = vadd.f32 1e-05, %v2514_v36  ;;  %3270 = vrsqrt.f32 %v2540_v43 }
 0x44e   : > { %v2472_v61 = vpop.xlane.xlu0 %2471 }
 0x44f   : > { %v3265_v7 = vpop.eup %3264  ;;  %3272 = vrsqrt.f32 %v2539_v32  ;;  %v2516_v47 = vmul.f32 0.0078125, %v2472_v61 }
 0x450   : > { %v2592_v19 = vmul.f32 %v3265_v7, %v5678_v38 }
 0x451   : > { %v2541_v46 = vadd.f32 1e-05, %v2516_v47 }
 0x452   : > { %v2617_v63 = vmul.f32 %v2592_v19, %v5541_v45 }
 0x453   : > { %v3267_v20 = vpop.eup %3266  ;;  %3274 = vrsqrt.f32 %v2541_v46 }
 0x454   : > { %v2648_v25 = vadd.f32 %v5684_v54, %v2617_v63  ;;  %v2594_v60 = vmul.f32 %v3267_v20, %v5678_v38 }
 0x455   : > { %v3269_v34 = vpop.eup %3268 }
 0x456   : > { %2673 = vst [vmem:[%s5691_s1] sm:$0xff] %v2648_v25  ;;  %v2593_v40 = vmul.f32 %v3269_v34, %v5678_v38  ;;  %v2619_v1 = vmul.f32 %v2594_v60, %v5551_v15 }
 0x457   : > { %v3271_v45 = vpop.eup %3270 }
 0x458   : > { %v2618_v59 = vmul.f32 %v2593_v40, %v5555_v48  ;;  %v2650_v10 = vadd.f32 %v5684_v54, %v2619_v1  ;;  %v2596_v6 = vmul.f32 %v3271_v45, %v5678_v38 }
 0x459   : > { %v3273_v22 = vpop.eup %3272 }
 0x45a   : > { %v2649_v13 = vadd.f32 %v5684_v54, %v2618_v59  ;;  %2675 = vst [vmem:[%s5691_s1 + $0x10] sm:$0xff] %v2650_v10  ;;  %v2595_v12 = vmul.f32 %v3273_v22, %v5678_v38  ;;  %v2621_v5 = vmul.f32 %v2596_v6, %v5563_v28 }
 0x45c   : > { %2674 = vst [vmem:[%s5691_s1 + $0x8] sm:$0xff] %v2649_v13  ;;  %v2620_v15 = vmul.f32 %v2595_v12, %v5569_v18  ;;  %v2652_v41 = vadd.f32 %v5684_v54, %v2621_v5 }
 0x45d   : > { %v3275_v49 = vpop.eup %3274 }
 0x45e   : > { %v2651_v48 = vadd.f32 %v5684_v54, %v2620_v15  ;;  %2677 = vst [vmem:[%s5691_s1 + $0x20] sm:$0xff] %v2652_v41  ;;  %v2597_v31 = vmul.f32 %v3275_v49, %v5678_v38 }
 0x460   : > { %2676 = vst [vmem:[%s5691_s1 + $0x18] sm:$0xff] %v2651_v48  ;;  %v2622_v23 = vmul.f32 %v2597_v31, %v5574_v53 }
 0x462   : > { %v2653_v4 = vadd.f32 %v5684_v54, %v2622_v23 }
 0x464   : > { %2678 = vst [vmem:[%s5691_s1 + $0x28] sm:$0xff] %v2653_v4 }
 0x467   : > { %v2474_v44 = vpop.xlane.xlu1 %2473 }
 0x468   : > { %v2517_v17 = vmul.f32 0.0078125, %v2474_v44 }
 0x469   : > { %v2476_v28 = vpop.xlane.xlu0 %2475 }
 0x46a   : > { %v2542_v55 = vadd.f32 1e-05, %v2517_v17  ;;  %v2518_v18 = vmul.f32 0.0078125, %v2476_v28 }
 0x46c   : > { %3276 = vrsqrt.f32 %v2542_v55  ;;  %v2543_v27 = vadd.f32 1e-05, %v2518_v18 }
 0x46e   : > { %3278 = vrsqrt.f32 %v2543_v27 }
 0x476   : > { %v3277_v56 = vpop.eup %3276 }
 0x477   : > { %v2598_v51 = vmul.f32 %v3277_v56, %v5678_v38 }
 0x478   : > { %v3279_v33 = vpop.eup %3278 }
 0x479   : > { %v2623_v26 = vmul.f32 %v2598_v51, %v5581_v3  ;;  %v2599_v53 = vmul.f32 %v3279_v33, %v5678_v38 }
 0x47a   : > { %v2478_v36 = vpop.xlane.xlu1 %2477 }
 0x47b   : > { %v2654_v24 = vadd.f32 %v5684_v54, %v2623_v26  ;;  %v2624_v52 = vmul.f32 %v2599_v53, %v5584_v50  ;;  %v2519_v43 = vmul.f32 0.0078125, %v2478_v36 }
 0x47c   : > { %v2480_v61 = vpop.xlane.xlu0 %2479 }
 0x47d   : > { %2679 = vst [vmem:[%s5691_s1 + $0x30] sm:$0xff] %v2654_v24  ;;  %v2655_v32 = vadd.f32 %v5684_v54, %v2624_v52  ;;  %v2544_v7 = vadd.f32 1e-05, %v2519_v43  ;;  %v2520_v47 = vmul.f32 0.0078125, %v2480_v61 }
 0x47f   : > { %2680 = vst [vmem:[%s5691_s1 + $0x38] sm:$0xff] %v2655_v32  ;;  %3280 = vrsqrt.f32 %v2544_v7  ;;  %v2545_v19 = vadd.f32 1e-05, %v2520_v47 }
 0x481   : > { %3282 = vrsqrt.f32 %v2545_v19 }
 0x489   : > { %v3281_v3 = vpop.eup %3280 }
 0x48a   : > { %v2600_v46 = vmul.f32 %v3281_v3, %v5678_v38 }
 0x48b   : > { %v3283_v63 = vpop.eup %3282 }
 0x48c   : > { %v2625_v50 = vmul.f32 %v2600_v46, %v5591_v37  ;;  %v2601_v20 = vmul.f32 %v3283_v63, %v5678_v38 }
 0x48e   : > { %v2656_v25 = vadd.f32 %v5684_v54, %v2625_v50  ;;  %v2626_v60 = vmul.f32 %v2601_v20, %v5594_v42 }
 0x490   : > { %2681 = vst [vmem:[%s5691_s1 + $0x40] sm:$0xff] %v2656_v25  ;;  %v2657_v34 = vadd.f32 %v5684_v54, %v2626_v60 }
 0x492   : > { %2682 = vst [vmem:[%s5691_s1 + $0x48] sm:$0xff] %v2657_v34 }
 0x49c   : > { %v2482_v40 = vpop.xlane.xlu1 %2481 }
 0x49d   : > { %v2521_v1 = vmul.f32 0.0078125, %v2482_v40 }
 0x49e   : > { %v2484_v45 = vpop.xlane.xlu0 %2483 }
 0x49f   : > { %v2546_v59 = vadd.f32 1e-05, %v2521_v1  ;;  %v2522_v10 = vmul.f32 0.0078125, %v2484_v45 }
 0x4a1   : > { %3284 = vrsqrt.f32 %v2546_v59  ;;  %v2547_v6 = vadd.f32 1e-05, %v2522_v10 }
 0x4a3   : > { %3286 = vrsqrt.f32 %v2547_v6 }
 0x4a6   : > { %v2486_v22 = vpop.xlane.xlu1 %2485 }
 0x4a7   : > { %v2523_v37 = vmul.f32 0.0078125, %v2486_v22 }
 0x4a8   : > { %v2488_v13 = vpop.xlane.xlu0 %2487 }
 0x4a9   : > { %v2548_v12 = vadd.f32 1e-05, %v2523_v37  ;;  %v2524_v5 = vmul.f32 0.0078125, %v2488_v13 }
 0x4ab   : > { %v3285_v15 = vpop.eup %3284  ;;  %3288 = vrsqrt.f32 %v2548_v12  ;;  %v2549_v42 = vadd.f32 1e-05, %v2524_v5 }
 0x4ac   : > { %v2602_v41 = vmul.f32 %v3285_v15, %v5678_v38 }
 0x4ad   : > { %v3287_v49 = vpop.eup %3286  ;;  %3290 = vrsqrt.f32 %v2549_v42 }
 0x4ae   : > { %v2627_v48 = vmul.f32 %v2602_v41, %v5601_v2  ;;  %v2603_v31 = vmul.f32 %v3287_v49, %v5678_v38  ;;  %v2490_v23 = vpop.xlane.xlu1 %2489 }
 0x4af   : > { %v2525_v4 = vmul.f32 0.0078125, %v2490_v23 }
 0x4b0   : > { %v2658_v44 = vadd.f32 %v5684_v54, %v2627_v48  ;;  %v2628_v17 = vmul.f32 %v2603_v31, %v5604_v9  ;;  %v2492_v28 = vpop.xlane.xlu0 %2491 }
 0x4b1   : > { %v2550_v55 = vadd.f32 1e-05, %v2525_v4  ;;  %v2526_v18 = vmul.f32 0.0078125, %v2492_v28 }
 0x4b2   : > { %2683 = vst [vmem:[%s5691_s1 + $0x50] sm:$0xff] %v2658_v44  ;;  %v2659_v27 = vadd.f32 %v5684_v54, %v2628_v17 }
 0x4b3   : > { %3292 = vrsqrt.f32 %v2550_v55  ;;  %v2551_v56 = vadd.f32 1e-05, %v2526_v18 }
 0x4b4   : > { %2684 = vst [vmem:[%s5691_s1 + $0x58] sm:$0xff] %v2659_v27 }
 0x4b5   : > { %v3289_v51 = vpop.eup %3288  ;;  %3294 = vrsqrt.f32 %v2551_v56 }
 0x4b6   : > { %v2604_v2 = vmul.f32 %v3289_v51, %v5678_v38  ;;  %v2494_v33 = vpop.xlane.xlu1 %2493 }
 0x4b7   : > { %v3291_v26 = vpop.eup %3290  ;;  %v2527_v53 = vmul.f32 0.0078125, %v2494_v33 }
 0x4b8   : > { %v2629_v9 = vmul.f32 %v2604_v2, %v5611_v58  ;;  %v2605_v24 = vmul.f32 %v3291_v26, %v5678_v38  ;;  %v2496_v52 = vpop.xlane.xlu0 %2495 }
 0x4b9   : > { %v2552_v36 = vadd.f32 1e-05, %v2527_v53  ;;  %v2528_v43 = vmul.f32 0.0078125, %v2496_v52 }
 0x4ba   : > { %v2660_v32 = vadd.f32 %v5684_v54, %v2629_v9  ;;  %v2630_v61 = vmul.f32 %v2605_v24, %v5614_v57 }
 0x4bb   : > { %3296 = vrsqrt.f32 %v2552_v36  ;;  %v2553_v7 = vadd.f32 1e-05, %v2528_v43 }
 0x4bc   : > { %2685 = vst [vmem:[%s5691_s1 + $0x60] sm:$0xff] %v2660_v32  ;;  %v2661_v47 = vadd.f32 %v5684_v54, %v2630_v61 }
 0x4bd   : > { %v3293_v19 = vpop.eup %3292  ;;  %3298 = vrsqrt.f32 %v2553_v7 }
 0x4be   : > { %2686 = vst [vmem:[%s5691_s1 + $0x68] sm:$0xff] %v2661_v47  ;;  %v2606_v58 = vmul.f32 %v3293_v19, %v5678_v38  ;;  %v2498_v3 = vpop.xlane.xlu1 %2497 }
 0x4bf   : > { %v3295_v46 = vpop.eup %3294  ;;  %v2529_v63 = vmul.f32 0.0078125, %v2498_v3 }
 0x4c0   : > { %v2631_v50 = vmul.f32 %v2606_v58, %v5621_v21  ;;  %v2607_v20 = vmul.f32 %v3295_v46, %v5678_v38  ;;  %v2500_v57 = vpop.xlane.xlu0 %2499 }
 0x4c1   : > { %v2554_v25 = vadd.f32 1e-05, %v2529_v63  ;;  %v2530_v60 = vmul.f32 0.0078125, %v2500_v57 }
 0x4c2   : > { %v2662_v34 = vadd.f32 %v5684_v54, %v2631_v50  ;;  %v2632_v40 = vmul.f32 %v2607_v20, %v5624_v35 }
 0x4c3   : > { %3300 = vrsqrt.f32 %v2554_v25  ;;  %v2555_v1 = vadd.f32 1e-05, %v2530_v60 }
 0x4c4   : > { %2687 = vst [vmem:[%s5691_s1 + $0x70] sm:$0xff] %v2662_v34  ;;  %v2663_v45 = vadd.f32 %v5684_v54, %v2632_v40 }
 0x4c5   : > { %v3297_v59 = vpop.eup %3296  ;;  %3302 = vrsqrt.f32 %v2555_v1 }
 0x4c6   : > { %2688 = vst [vmem:[%s5691_s1 + $0x78] sm:$0xff] %v2663_v45  ;;  %v2608_v21 = vmul.f32 %v3297_v59, %v5678_v38  ;;  %v2502_v10 = vpop.xlane.xlu1 %2501 }
 0x4c7   : > { %v3299_v6 = vpop.eup %3298  ;;  %v2531_v22 = vmul.f32 0.0078125, %v2502_v10 }
 0x4c8   : > { %v2633_v37 = vmul.f32 %v2608_v21, %v5631_v29  ;;  %v2609_v13 = vmul.f32 %v3299_v6, %v5678_v38  ;;  %v2504_v35 = vpop.xlane.xlu0 %2503 }
 0x4c9   : > { %v2556_v12 = vadd.f32 1e-05, %v2531_v22  ;;  %v2532_v5 = vmul.f32 0.0078125, %v2504_v35 }
 0x4ca   : > { %v2664_v15 = vadd.f32 %v5684_v54, %v2633_v37  ;;  %v2634_v42 = vmul.f32 %v2609_v13, %v5634_v0 }
 0x4cb   : > { %3304 = vrsqrt.f32 %v2556_v12  ;;  %v2557_v41 = vadd.f32 1e-05, %v2532_v5 }
 0x4cc   : > { %2689 = vst [vmem:[%s5691_s1 + $0x80] sm:$0xff] %v2664_v15  ;;  %v2665_v49 = vadd.f32 %v5684_v54, %v2634_v42 }
 0x4cd   : > { %v3301_v48 = vpop.eup %3300  ;;  %3306 = vrsqrt.f32 %v2557_v41 }
 0x4ce   : > { %2690 = vst [vmem:[%s5691_s1 + $0x88] sm:$0xff] %v2665_v49  ;;  %v2610_v29 = vmul.f32 %v3301_v48, %v5678_v38  ;;  %v2506_v31 = vpop.xlane.xlu1 %2505 }
 0x4cf   : > { %v3303_v23 = vpop.eup %3302  ;;  %v2533_v4 = vmul.f32 0.0078125, %v2506_v31 }
 0x4d0   : > { %v2635_v44 = vmul.f32 %v2610_v29, %v5641_v8  ;;  %v2611_v17 = vmul.f32 %v3303_v23, %v5678_v38  ;;  %v2508_v0 = vpop.xlane.xlu0 %2507 }
 0x4d1   : > { %v2558_v28 = vadd.f32 1e-05, %v2533_v4  ;;  %v2534_v55 = vmul.f32 0.0078125, %v2508_v0 }
 0x4d2   : > { %v2666_v18 = vadd.f32 %v5684_v54, %v2635_v44  ;;  %v2636_v27 = vmul.f32 %v2611_v17, %v5644_v62 }
 0x4d3   : > { %3308 = vrsqrt.f32 %v2558_v28  ;;  %v2559_v56 = vadd.f32 1e-05, %v2534_v55 }
 0x4d4   : > { %2691 = vst [vmem:[%s5691_s1 + $0x90] sm:$0xff] %v2666_v18  ;;  %v2667_v51 = vadd.f32 %v5684_v54, %v2636_v27 }
 0x4d5   : > { %v3305_v2 = vpop.eup %3304  ;;  %3310 = vrsqrt.f32 %v2559_v56 }
 0x4d6   : > { %2692 = vst [vmem:[%s5691_s1 + $0x98] sm:$0xff] %v2667_v51  ;;  %v2612_v8 = vmul.f32 %v3305_v2, %v5678_v38  ;;  %v2510_v33 = vpop.xlane.xlu1 %2509 }
 0x4d7   : > { %v3307_v26 = vpop.eup %3306  ;;  %v2535_v53 = vmul.f32 0.0078125, %v2510_v33 }
 0x4d8   : > { %v2637_v9 = vmul.f32 %v2612_v8, %v5651_v11  ;;  %v2613_v62 = vmul.f32 %v3307_v26, %v5678_v38 }
 0x4d9   : > { %v2560_v24 = vadd.f32 1e-05, %v2535_v53 }
 0x4da   : > { %v2668_v52 = vadd.f32 %v5684_v54, %v2637_v9  ;;  %v2638_v36 = vmul.f32 %v2613_v62, %v5654_v16 }
 0x4db   : > { %3312 = vrsqrt.f32 %v2560_v24 }
 0x4dc   : > { %2693 = vst [vmem:[%s5691_s1 + $0xa0] sm:$0xff] %v2668_v52  ;;  %v2669_v43 = vadd.f32 %v5684_v54, %v2638_v36 }
 0x4dd   : > { %v3309_v32 = vpop.eup %3308 }
 0x4de   : > { %2694 = vst [vmem:[%s5691_s1 + $0xa8] sm:$0xff] %v2669_v43  ;;  %v2614_v61 = vmul.f32 %v3309_v32, %v5678_v38 }
 0x4df   : > { %v3311_v11 = vpop.eup %3310 }
 0x4e0   : > { %v2639_v7 = vmul.f32 %v2614_v61, %v5661_v30  ;;  %v2615_v47 = vmul.f32 %v3311_v11, %v5678_v38 }
 0x4e2   : > { %v2670_v19 = vadd.f32 %v5684_v54, %v2639_v7  ;;  %v2640_v16 = vmul.f32 %v2615_v47, %v5664_v39 }
 0x4e4   : > { %2695 = vst [vmem:[%s5691_s1 + $0xb0] sm:$0xff] %v2670_v19  ;;  %v2671_v58 = vadd.f32 %v5684_v54, %v2640_v16 }
 0x4e5   : > { %v3313_v3 = vpop.eup %3312 }
 0x4e6   : > { %2696 = vst [vmem:[%s5691_s1 + $0xb8] sm:$0xff] %v2671_v58  ;;  %v2616_v46 = vmul.f32 %v3313_v3, %v5678_v38 }
 0x4e8   : > { %v2641_v63 = vmul.f32 %v2616_v46, %v5671_v14 }
 0x4ea   : > { %v2672_v30 = vadd.f32 %v5684_v54, %v2641_v63 }
 0x4ec   : > { %2697 = vst [vmem:[%s5691_s1 + $0xc0] sm:$0xff] %v2672_v30 }
 0x4ed   : > { %3438 = shalt.err (!%p3435_p1)
}
 0x4ee   : > { %s3439_s18 = scalar_lea.hbm %s5792_s11, 3200  ;;  %s3443_s15 = scalar_lea.hbm %s5847_s7, 6400 }
 0x4ef   : > { %p3440_p13 = scmp.ne.s32.totalorder %s5792_s11, %s3439_s18  ;;  %p3444_p4 = scmp.lt.u32.totalorder %s5792_s11, %s5847_s7 }
 0x4f0   : > { %p3445_p7 = scmp.lt.u32.totalorder %s3443_s15, %s3439_s18  ;;  %p3447_p11 = scmp.lt.u32.totalorder %s3439_s18, %s5792_s11 }
 0x4f1   : > { %p3441_p6 = pnand %p3440_p13, %p5993_p0 }
 0x4f2   : > { %p3446_p8 = por %p3445_p7, %p3444_p4 }
 0x4f3   : > { %p3442_p10 = pneg %p3441_p6 }
 0x4f4   : > { %p3448_p2 = por %p3447_p11, %p3446_p8 }
 0x4f6   : > { %p3449_p3 = pnand %p3448_p2, %p3442_p10 }
 0x4f8   : > { %3452 = shalt.err (!%p3449_p3)
}
 0x4f9   : > { %s3507_s22 = smov 128   ;;  %s3508_s10 = smov 8  }
 0x4fa   : > { %2959 = dma.vmem_to_hbm [thread:$0]  (%p5993_p0), %s5795_s29, 3200, %s5792_s11, %s2699_s28, %s3507_s22, %s3507_s22, %s3508_s10  }
 0x4fb PF: > { %s2727_s30 = sand.u32 1, %s3483_s24   ;;  %p5994_p5 = scmp.ne.s32.totalorder %s5865_s8, 0 }
 0x4fc   : > { %p5995_p9 = scmp.ge.s32.totalorder %s3495_s27, 2  ;;  %s2728_s9 = scalar_lea.sflag [#allocation4], %s2727_s30 }
 0x4fe   : > { %p2973_p12 = pnand %p5995_p9, %p5994_p5 }
 0x500   : > { %3478 = dma.done.wait (!%p2973_p12), %s2728_s9, 3200  }
 0x501   : > { %3480 = vsyncadd (!%p2973_p12), %s2728_s9, 4294964096  ;;  %p21_p1 = scmp.ge.s32.totalorder %s3662_s16, 4   ;;  %s5996_s24 = smov %s3487_s25 }
 0x502   : > { %s5997_s25 = smov %s3491_s26  ;;  %s5998_s26 = smov %s3671_s19 }
 0x503   : > { %s5999_s27 = smov %s3662_s16  ;;  %23 = sbr.rel (!%p21_p1) target bundleno = 8 (0x8), region = 101 }
 0x50a   :  { %2733 = vsyncpa [#allocation3], 1 }
 0x50b   :  { %2735 = vsyncpa [#allocation3 + $0x1], 1 }
 0x50c   :  { %2736 = vsyncpa [#allocation6], 1 }
 0x50d   :  { %2737 = vsyncpa [#allocation4], 1 }
 0x50e   :  { %2739 = vsyncpa [#allocation4 + $0x1], 1 }

</bundles_post_ra>
